<compile_context>
chip_gen: v7x
topology: tpu7x:2x2x1
jax: 0.10.0
libtpu: 0.0.40
codegen_flags: <defaults>
</compile_context>

<pallas_src>
import jax
import jax.numpy as jnp
from jax.experimental import pallas as pl
from jax.experimental.pallas import tpu as pltpu


def to_patch_reference(x, img_size, patch_size):
    """Pure-JAX reference matching the PyTorch unfold/reshape chain."""
    C, H, W = img_size
    ph, pw = patch_size if isinstance(patch_size, tuple) else (patch_size, patch_size)
    B = x.shape[0]
    nH, nW = H // ph, W // pw
    y = x.reshape(B, C, nH, ph, nW, pw)
    y = y.transpose(0, 2, 4, 1, 3, 5)          # (B, nH, nW, C, ph, pw)
    return y.reshape(B, nH * nW, C, ph, pw)


def _round_up(v, m):
    return -(-v // m) * m


def _divisors(n):
    return [d for d in range(1, n + 1) if n % d == 0]


def _hw_profile():
    """Returns (per-step raw payload target, vmem_limit_bytes) per generation."""
    try:
        cap = int(pltpu.get_tpu_info().vmem_capacity_bytes)
    except Exception:
        cap = 64 << 20                       # assume smallest VMEM (v7x-like)
    if cap >= (100 << 20):                   # v5e / v6e: 128 MiB physical VMEM
        return 12 << 20, 64 << 20
    return 8 << 20, 48 << 20                 # v7x: 64 MiB VMEM, ~3.2 TB/s HBM


def make_to_patch(img_size, patch_size):
    C, H, W = img_size
    if not isinstance(patch_size, tuple):
        patch_size = (patch_size, patch_size)
    ph, pw = patch_size
    assert H % ph == 0 and W % pw == 0, "patch size must divide spatial dims"
    nH, nW = H // ph, W // pw
    P = nH * nW
    K = C * ph * pw

    # -------------------------------------------------------------- kernel bodies
    def _kernel_fast(bt, nh_t):
        # x_ref: (bt, C, nh_t, ph, W) dense row slabs (lane dim = W)
        # o_ref: (bt, nh_t, nW*K)     fully lane-dense output rows
        def kernel(x_ref, o_ref):
            for r in range(nh_t):
                xr = x_ref[:, :, r, :, :]                 # (bt, C, ph, W)
                xr = xr.reshape(bt, C * ph, nW, pw)       # split W -> (nW, pw)
                xr = jnp.swapaxes(xr, 1, 2)               # (bt, nW, C*ph, pw)
                o_ref[:, r, :] = xr.reshape(bt, nW * K)   # full-lane-width store
        return kernel

    def _kernel_safe(bt, nh_t):
        # Same dense input slab; only rectangular slice copies (guaranteed
        # lowering).  Output block is (bt, nh_t, nW, K).
        def kernel(x_ref, o_ref):
            for c in range(C):
                for i in range(ph):
                    row = x_ref[:, c, :, i, :]            # (bt, nh_t, W)
                    col = (c * ph + i) * pw
                    for iw in range(nW):
                        o_ref[:, :, iw, col:col + pw] = row[:, :, iw * pw:(iw + 1) * pw]
        return kernel

    # -------------------------------------------------------------- tile planning
    def _vmem_block_bytes(bt, nh_t, itemsize, fast):
        # (8,128)-padded VMEM footprint of one (input + output) block.
        in_b = bt * C * nh_t * _round_up(ph, 8) * _round_up(W, 128) * itemsize
        if fast:
            out_b = bt * _round_up(nh_t, 8) * _round_up(nW * K, 128) * itemsize
        else:
            out_b = bt * nh_t * _round_up(nW, 8) * _round_up(K, 128) * itemsize
        return in_b + out_b

    def _plan(B, itemsize, fast, target, usable):
        row_raw = C * ph * W * itemsize              # one patch-row slab, per side
        total_raw = 2 * B * nH * row_raw
        want_multi = total_raw >= (2 << 20)          # keep 2 TCs busy on big problems
        if fast:
            # Fast out block has nh_t as its second-minor dim -> keep it either
            # the full nH or a multiple of 8 (the (8,128) block-shape rule).
            nh_opts = [d for d in _divisors(nH) if d == nH or d % 8 == 0]
        else:
            nh_opts = _divisors(nH)
        best, best_key = None, None
        for nh_t in nh_opts:
            for bt in range(1, B + 1):
                if 2 * _vmem_block_bytes(bt, nh_t, itemsize, fast) > usable:
                    continue                          # double-buffered footprint
                raw = 2 * bt * nh_t * row_raw
                steps = ((B + bt - 1) // bt) * (nH // nh_t)
                key = (
                    (steps >= 2) if want_multi else True,  # >=2 grid steps (v7x 2 TCs)
                    min(raw, target),                      # amortize ~0.35us/step overhead
                    -max(raw - target, 0),                 # don't balloon past target
                    B % bt == 0,                           # prefer no partial batch block
                    nh_t, bt,                              # deterministic tie-break
                )
                if best_key is None or key > best_key:
                    best, best_key = (bt, nh_t), key
        return best

    _call_cache = {}
    _mode_cache = {}
    _probe_error = {}

    # ---------------------------------------------------------------- pallas_call
    def _build(B, dtype, fast):
        itemsize = jnp.dtype(dtype).itemsize
        target, vmem_limit = _hw_profile()
        usable = vmem_limit - (4 << 20)
        plan = _plan(B, itemsize, fast, target, usable)
        if plan is None:
            return None
        bt, nh_t = plan
        grid = ((B + bt - 1) // bt, nH // nh_t)

        # Input viewed as (B, C, nH, ph, W): dense row-slab loads, lane dim = W.
        in_spec = pl.BlockSpec((bt, C, nh_t, ph, W),
                               lambda bb, rr: (bb, 0, rr, 0, 0))
        if fast:
            out_shape = jax.ShapeDtypeStruct((B, nH, nW * K), dtype)
            out_spec = pl.BlockSpec((bt, nh_t, nW * K), lambda bb, rr: (bb, rr, 0))
            kernel = _kernel_fast(bt, nh_t)
        else:
            out_shape = jax.ShapeDtypeStruct((B, nH, nW, K), dtype)
            out_spec = pl.BlockSpec((bt, nh_t, nW, K), lambda bb, rr: (bb, rr, 0, 0))
            kernel = _kernel_safe(bt, nh_t)

        return pl.pallas_call(
            kernel,
            out_shape=out_shape,
            grid=grid,
            in_specs=[in_spec],
            out_specs=out_spec,
            compiler_params=pltpu.CompilerParams(
                dimension_semantics=("parallel", "parallel"),
                vmem_limit_bytes=vmem_limit,
            ),
            cost_estimate=pl.CostEstimate(
                flops=0, transcendentals=0,
                bytes_accessed=2 * B * C * H * W * itemsize,
            ),
        )

    def _build_cached(B, dtype, fast):
        key = (B, str(jnp.dtype(dtype)), fast)
        if key not in _call_cache:
            _call_cache[key] = _build(B, dtype, fast)
        return _call_cache[key]

    def _run(x, fast):
        B = x.shape[0]
        call = _build_cached(B, x.dtype, fast)
        if call is None:
            raise ValueError("to_patch: no tiling fits VMEM for this configuration")
        xin = x.reshape(B, C, nH, ph, W)          # metadata-only reshape (splits H)
        out = call(xin)                           # (B, nH, nW*K) or (B, nH, nW, K)
        return out.reshape(B, P, C, ph, pw)       # metadata-only reshape

    def _probe(dtype):
        """Decide fast vs safe ONCE per dtype on a concrete dummy input.

        Runs eagerly (never touches traced values, so it is jax.jit-safe) and
        verifies exact numerics.  The except is broader than LoweringException
        because Mosaic/XLA compile failures surface under several exception
        types; failures are recorded on to_patch.probe_errors, not swallowed
        silently.
        """
        Bp = 2
        n = Bp * C * H * W
        dummy = (jnp.arange(n, dtype=jnp.float32) % 113.0).astype(dtype)
        dummy = dummy.reshape(Bp, C, H, W)
        try:
            if _build_cached(Bp, dtype, True) is None:
                return False
            out = _run(dummy, True)
            ref = to_patch_reference(dummy, (C, H, W), (ph, pw))
            return bool(jnp.array_equal(out, ref))   # concrete values only
        except Exception as exc:                      # incl. pltpu.LoweringException
            _probe_error[str(jnp.dtype(dtype))] = repr(exc)
            return False

    def to_patch(x):
        assert x.shape[1:] == (C, H, W), x.shape
        B = x.shape[0]
        dkey = str(jnp.dtype(x.dtype))
        if dkey not in _mode_cache:
            _mode_cache[dkey] = _probe(x.dtype)
        fast = _mode_cache[dkey]
        if fast and _build_cached(B, x.dtype, True) is None:
            fast = False                              # fast tiling infeasible for this B
        return _run(x, fast)

    to_patch.mode_cache = _mode_cache
    to_patch.probe_errors = _probe_error

    # Probe the common dtype up front (build-time decision, per the review).
    _mode_cache[str(jnp.dtype(jnp.float32))] = _probe(jnp.float32)

    return to_patch, P


if __name__ == "__main__":
    # Small shapes consistent with the module: img_size=(C, H, W)=(4, 16, 16),
    # patch_size=4 -> patch_count = 16*16 / (4*4) = 16
    img_size = (4, 16, 16)
    patch_size = 4
    B = 2

    key = jax.random.PRNGKey(0)
    x = jax.random.normal(key, (B,) + img_size, dtype=jnp.float32)

    to_patch, P = make_to_patch(img_size, patch_size)

    out = jax.block_until_ready(to_patch(x))
    ref = to_patch_reference(x, img_size, (patch_size, patch_size))

    assert out.shape == (B, P, img_size[0], patch_size, patch_size), out.shape
    assert out.dtype == x.dtype
    assert jnp.array_equal(out, ref), "mismatch vs reference (eager)"

    # jit-safety check: the fast/safe decision was made on concrete data, so the
    # jitted path traces straight through the cached pallas_call.
    out_j = jax.block_until_ready(jax.jit(to_patch)(x))
    assert jnp.array_equal(out_j, ref), "mismatch vs reference (jit)"

    print("KERNEL_OK")
</pallas_src>

<mosaic_0001>
module attributes {stable_mosaic.version = 11 : i64} {
  func.func @kernel(%arg0: i32, %arg1: i32, %arg2: memref<2x4x4x4x16xf32, #tpu.memory_space<vmem>>, %arg3: memref<2x4x256xf32, #tpu.memory_space<vmem>>) attributes {dimension_semantics = [#tpu.dimension_semantics<parallel>, #tpu.dimension_semantics<parallel>], iteration_bounds = array<i64: 1, 1>, scalar_prefetch = 0 : i64, scratch_operands = 0 : i64, tpu.core_type = #tpu.core_type<tc>, window_params = [{transform_indices = @transform_0, window_bounds = array<i64: 2, 4, 4, 4, 16>}, {transform_indices = @transform_1, window_bounds = array<i64: 2, 4, 256>}]} {
    %c0 = arith.constant 0 : index
    %c0_0 = arith.constant 0 : index
    %c0_1 = arith.constant 0 : index
    %c0_2 = arith.constant 0 : index
    %c0_3 = arith.constant 0 : index
    %0 = vector.load %arg2[%c0, %c0_0, %c0_1, %c0_2, %c0_3] : memref<2x4x4x4x16xf32, #tpu.memory_space<vmem>>, vector<2x4x1x4x16xf32>
    %1 = vector.shape_cast %0 : vector<2x4x1x4x16xf32> to vector<2x4x4x16xf32>
    %2 = vector.shape_cast %1 : vector<2x4x4x16xf32> to vector<2x16x4x4xf32>
    %3 = tpu.transpose %2, [0, 2, 1, 3] : vector<2x16x4x4xf32> -> vector<2x4x16x4xf32>
    %4 = vector.shape_cast %3 : vector<2x4x16x4xf32> to vector<2x256xf32>
    %c0_4 = arith.constant 0 : index
    %c0_5 = arith.constant 0 : index
    %c0_6 = arith.constant 0 : index
    %5 = vector.load %arg3[%c0_4, %c0_5, %c0_6] : memref<2x4x256xf32, #tpu.memory_space<vmem>>, vector<2x1x256xf32>
    %6 = vector.shape_cast %5 : vector<2x1x256xf32> to vector<2x256xf32>
    %7 = vector.shape_cast %4 : vector<2x256xf32> to vector<2x1x256xf32>
    tpu.vector_store %arg3[%c0_4, %c0_5, %c0_6], %7 {strides = array<i32>} : memref<2x4x256xf32, #tpu.memory_space<vmem>>, vector<2x1x256xf32>,
    %c0_7 = arith.constant 0 : index
    %c0_8 = arith.constant 0 : index
    %c1 = arith.constant 1 : index
    %c0_9 = arith.constant 0 : index
    %c0_10 = arith.constant 0 : index
    %8 = vector.load %arg2[%c0_7, %c0_8, %c1, %c0_9, %c0_10] : memref<2x4x4x4x16xf32, #tpu.memory_space<vmem>>, vector<2x4x1x4x16xf32>
    %9 = vector.shape_cast %8 : vector<2x4x1x4x16xf32> to vector<2x4x4x16xf32>
    %10 = vector.shape_cast %9 : vector<2x4x4x16xf32> to vector<2x16x4x4xf32>
    %11 = tpu.transpose %10, [0, 2, 1, 3] : vector<2x16x4x4xf32> -> vector<2x4x16x4xf32>
    %12 = vector.shape_cast %11 : vector<2x4x16x4xf32> to vector<2x256xf32>
    %c0_11 = arith.constant 0 : index
    %c1_12 = arith.constant 1 : index
    %c0_13 = arith.constant 0 : index
    %13 = vector.load %arg3[%c0_11, %c1_12, %c0_13] : memref<2x4x256xf32, #tpu.memory_space<vmem>>, vector<2x1x256xf32>
    %14 = vector.shape_cast %13 : vector<2x1x256xf32> to vector<2x256xf32>
    %15 = vector.shape_cast %12 : vector<2x256xf32> to vector<2x1x256xf32>
    tpu.vector_store %arg3[%c0_11, %c1_12, %c0_13], %15 {strides = array<i32>} : memref<2x4x256xf32, #tpu.memory_space<vmem>>, vector<2x1x256xf32>,
    %c0_14 = arith.constant 0 : index
    %c0_15 = arith.constant 0 : index
    %c2 = arith.constant 2 : index
    %c0_16 = arith.constant 0 : index
    %c0_17 = arith.constant 0 : index
    %16 = vector.load %arg2[%c0_14, %c0_15, %c2, %c0_16, %c0_17] : memref<2x4x4x4x16xf32, #tpu.memory_space<vmem>>, vector<2x4x1x4x16xf32>
    %17 = vector.shape_cast %16 : vector<2x4x1x4x16xf32> to vector<2x4x4x16xf32>
    %18 = vector.shape_cast %17 : vector<2x4x4x16xf32> to vector<2x16x4x4xf32>
    %19 = tpu.transpose %18, [0, 2, 1, 3] : vector<2x16x4x4xf32> -> vector<2x4x16x4xf32>
    %20 = vector.shape_cast %19 : vector<2x4x16x4xf32> to vector<2x256xf32>
    %c0_18 = arith.constant 0 : index
    %c2_19 = arith.constant 2 : index
    %c0_20 = arith.constant 0 : index
    %21 = vector.load %arg3[%c0_18, %c2_19, %c0_20] : memref<2x4x256xf32, #tpu.memory_space<vmem>>, vector<2x1x256xf32>
    %22 = vector.shape_cast %21 : vector<2x1x256xf32> to vector<2x256xf32>
    %23 = vector.shape_cast %20 : vector<2x256xf32> to vector<2x1x256xf32>
    tpu.vector_store %arg3[%c0_18, %c2_19, %c0_20], %23 {strides = array<i32>} : memref<2x4x256xf32, #tpu.memory_space<vmem>>, vector<2x1x256xf32>,
    %c0_21 = arith.constant 0 : index
    %c0_22 = arith.constant 0 : index
    %c3 = arith.constant 3 : index
    %c0_23 = arith.constant 0 : index
    %c0_24 = arith.constant 0 : index
    %24 = vector.load %arg2[%c0_21, %c0_22, %c3, %c0_23, %c0_24] : memref<2x4x4x4x16xf32, #tpu.memory_space<vmem>>, vector<2x4x1x4x16xf32>
    %25 = vector.shape_cast %24 : vector<2x4x1x4x16xf32> to vector<2x4x4x16xf32>
    %26 = vector.shape_cast %25 : vector<2x4x4x16xf32> to vector<2x16x4x4xf32>
    %27 = tpu.transpose %26, [0, 2, 1, 3] : vector<2x16x4x4xf32> -> vector<2x4x16x4xf32>
    %28 = vector.shape_cast %27 : vector<2x4x16x4xf32> to vector<2x256xf32>
    %c0_25 = arith.constant 0 : index
    %c3_26 = arith.constant 3 : index
    %c0_27 = arith.constant 0 : index
    %29 = vector.load %arg3[%c0_25, %c3_26, %c0_27] : memref<2x4x256xf32, #tpu.memory_space<vmem>>, vector<2x1x256xf32>
    %30 = vector.shape_cast %29 : vector<2x1x256xf32> to vector<2x256xf32>
    %31 = vector.shape_cast %28 : vector<2x256xf32> to vector<2x1x256xf32>
    tpu.vector_store %arg3[%c0_25, %c3_26, %c0_27], %31 {strides = array<i32>} : memref<2x4x256xf32, #tpu.memory_space<vmem>>, vector<2x1x256xf32>,
    return
  }
  func.func @transform_0(%arg0: i32, %arg1: i32) -> (i32, i32, i32, i32, i32) {
    %c0_i32 = arith.constant 0 : i32
    %c0_i32_0 = arith.constant 0 : i32
    %c0_i32_1 = arith.constant 0 : i32
    %c0_i32_2 = arith.constant 0 : i32
    return %arg0, %c0_i32, %arg1, %c0_i32_0, %c0_i32_1 : i32, i32, i32, i32, i32
  }
  func.func @transform_1(%arg0: i32, %arg1: i32) -> (i32, i32, i32) {
    %c0_i32 = arith.constant 0 : i32
    %c0_i32_0 = arith.constant 0 : i32
    return %arg0, %arg1, %c0_i32 : i32, i32, i32
  }
}

module attributes {stable_mosaic.version = 11 : i64} {
  func.func @kernel(%arg0: i32, %arg1: i32, %arg2: memref<2x4x4x4x16xf32, #tpu.memory_space<vmem>>, %arg3: memref<2x4x4x64xf32, #tpu.memory_space<vmem>>) attributes {dimension_semantics = [#tpu.dimension_semantics<parallel>, #tpu.dimension_semantics<parallel>], iteration_bounds = array<i64: 1, 1>, scalar_prefetch = 0 : i64, scratch_operands = 0 : i64, tpu.core_type = #tpu.core_type<tc>, window_params = [{transform_indices = @transform_0, window_bounds = array<i64: 2, 4, 4, 4, 16>}, {transform_indices = @transform_1, window_bounds = array<i64: 2, 4, 4, 64>}]} {
    %c0 = arith.constant 0 : index
    %c0_0 = arith.constant 0 : index
    %c0_1 = arith.constant 0 : index
    %c0_2 = arith.constant 0 : index
    %c0_3 = arith.constant 0 : index
    %0 = vector.load %arg2[%c0, %c0_0, %c0_1, %c0_2, %c0_3] : memref<2x4x4x4x16xf32, #tpu.memory_space<vmem>>, vector<2x1x4x1x16xf32>
    %1 = vector.shape_cast %0 : vector<2x1x4x1x16xf32> to vector<2x4x16xf32>
    %2 = vector.extract_strided_slice %1 {offsets = [0, 0, 0], sizes = [2, 4, 4], strides = [1, 1, 1]} : vector<2x4x16xf32> to vector<2x4x4xf32>
    %c0_4 = arith.constant 0 : index
    %c0_5 = arith.constant 0 : index
    %c0_6 = arith.constant 0 : index
    %c0_7 = arith.constant 0 : index
    %3 = vector.load %arg3[%c0_4, %c0_5, %c0_6, %c0_7] : memref<2x4x4x64xf32, #tpu.memory_space<vmem>>, vector<2x4x1x4xf32>
    %4 = vector.shape_cast %3 : vector<2x4x1x4xf32> to vector<2x4x4xf32>
    %5 = vector.shape_cast %2 : vector<2x4x4xf32> to vector<2x4x1x4xf32>
    tpu.vector_store %arg3[%c0_4, %c0_5, %c0_6, %c0_7], %5 {strides = array<i32>} : memref<2x4x4x64xf32, #tpu.memory_space<vmem>>, vector<2x4x1x4xf32>,
    %6 = vector.extract_strided_slice %1 {offsets = [0, 0, 4], sizes = [2, 4, 4], strides = [1, 1, 1]} : vector<2x4x16xf32> to vector<2x4x4xf32>
    %c0_8 = arith.constant 0 : index
    %c0_9 = arith.constant 0 : index
    %c1 = arith.constant 1 : index
    %c0_10 = arith.constant 0 : index
    %7 = vector.load %arg3[%c0_8, %c0_9, %c1, %c0_10] : memref<2x4x4x64xf32, #tpu.memory_space<vmem>>, vector<2x4x1x4xf32>
    %8 = vector.shape_cast %7 : vector<2x4x1x4xf32> to vector<2x4x4xf32>
    %9 = vector.shape_cast %6 : vector<2x4x4xf32> to vector<2x4x1x4xf32>
    tpu.vector_store %arg3[%c0_8, %c0_9, %c1, %c0_10], %9 {strides = array<i32>} : memref<2x4x4x64xf32, #tpu.memory_space<vmem>>, vector<2x4x1x4xf32>,
    %10 = vector.extract_strided_slice %1 {offsets = [0, 0, 8], sizes = [2, 4, 4], strides = [1, 1, 1]} : vector<2x4x16xf32> to vector<2x4x4xf32>
    %c0_11 = arith.constant 0 : index
    %c0_12 = arith.constant 0 : index
    %c2 = arith.constant 2 : index
    %c0_13 = arith.constant 0 : index
    %11 = vector.load %arg3[%c0_11, %c0_12, %c2, %c0_13] : memref<2x4x4x64xf32, #tpu.memory_space<vmem>>, vector<2x4x1x4xf32>
    %12 = vector.shape_cast %11 : vector<2x4x1x4xf32> to vector<2x4x4xf32>
    %13 = vector.shape_cast %10 : vector<2x4x4xf32> to vector<2x4x1x4xf32>
    tpu.vector_store %arg3[%c0_11, %c0_12, %c2, %c0_13], %13 {strides = array<i32>} : memref<2x4x4x64xf32, #tpu.memory_space<vmem>>, vector<2x4x1x4xf32>,
    %14 = vector.extract_strided_slice %1 {offsets = [0, 0, 12], sizes = [2, 4, 4], strides = [1, 1, 1]} : vector<2x4x16xf32> to vector<2x4x4xf32>
    %c0_14 = arith.constant 0 : index
    %c0_15 = arith.constant 0 : index
    %c3 = arith.constant 3 : index
    %c0_16 = arith.constant 0 : index
    %15 = vector.load %arg3[%c0_14, %c0_15, %c3, %c0_16] : memref<2x4x4x64xf32, #tpu.memory_space<vmem>>, vector<2x4x1x4xf32>
    %16 = vector.shape_cast %15 : vector<2x4x1x4xf32> to vector<2x4x4xf32>
    %17 = vector.shape_cast %14 : vector<2x4x4xf32> to vector<2x4x1x4xf32>
    tpu.vector_store %arg3[%c0_14, %c0_15, %c3, %c0_16], %17 {strides = array<i32>} : memref<2x4x4x64xf32, #tpu.memory_space<vmem>>, vector<2x4x1x4xf32>,
    %c0_17 = arith.constant 0 : index
    %c0_18 = arith.constant 0 : index
    %c0_19 = arith.constant 0 : index
    %c1_20 = arith.constant 1 : index
    %c0_21 = arith.constant 0 : index
    %18 = vector.load %arg2[%c0_17, %c0_18, %c0_19, %c1_20, %c0_21] : memref<2x4x4x4x16xf32, #tpu.memory_space<vmem>>, vector<2x1x4x1x16xf32>
    %19 = vector.shape_cast %18 : vector<2x1x4x1x16xf32> to vector<2x4x16xf32>
    %20 = vector.extract_strided_slice %19 {offsets = [0, 0, 0], sizes = [2, 4, 4], strides = [1, 1, 1]} : vector<2x4x16xf32> to vector<2x4x4xf32>
    %c0_22 = arith.constant 0 : index
    %c0_23 = arith.constant 0 : index
    %c0_24 = arith.constant 0 : index
    %c4 = arith.constant 4 : index
    %21 = vector.load %arg3[%c0_22, %c0_23, %c0_24, %c4] : memref<2x4x4x64xf32, #tpu.memory_space<vmem>>, vector<2x4x1x4xf32>
    %22 = vector.shape_cast %21 : vector<2x4x1x4xf32> to vector<2x4x4xf32>
    %23 = vector.shape_cast %20 : vector<2x4x4xf32> to vector<2x4x1x4xf32>
    tpu.vector_store %arg3[%c0_22, %c0_23, %c0_24, %c4], %23 {strides = array<i32>} : memref<2x4x4x64xf32, #tpu.memory_space<vmem>>, vector<2x4x1x4xf32>,
    %24 = vector.extract_strided_slice %19 {offsets = [0, 0, 4], sizes = [2, 4, 4], strides = [1, 1, 1]} : vector<2x4x16xf32> to vector<2x4x4xf32>
    %c0_25 = arith.constant 0 : index
    %c0_26 = arith.constant 0 : index
    %c1_27 = arith.constant 1 : index
    %c4_28 = arith.constant 4 : index
    %25 = vector.load %arg3[%c0_25, %c0_26, %c1_27, %c4_28] : memref<2x4x4x64xf32, #tpu.memory_space<vmem>>, vector<2x4x1x4xf32>
    %26 = vector.shape_cast %25 : vector<2x4x1x4xf32> to vector<2x4x4xf32>
    %27 = vector.shape_cast %24 : vector<2x4x4xf32> to vector<2x4x1x4xf32>
    tpu.vector_store %arg3[%c0_25, %c0_26, %c1_27, %c4_28], %27 {strides = array<i32>} : memref<2x4x4x64xf32, #tpu.memory_space<vmem>>, vector<2x4x1x4xf32>,
    %28 = vector.extract_strided_slice %19 {offsets = [0, 0, 8], sizes = [2, 4, 4], strides = [1, 1, 1]} : vector<2x4x16xf32> to vector<2x4x4xf32>
    %c0_29 = arith.constant 0 : index
    %c0_30 = arith.constant 0 : index
    %c2_31 = arith.constant 2 : index
    %c4_32 = arith.constant 4 : index
    %29 = vector.load %arg3[%c0_29, %c0_30, %c2_31, %c4_32] : memref<2x4x4x64xf32, #tpu.memory_space<vmem>>, vector<2x4x1x4xf32>
    %30 = vector.shape_cast %29 : vector<2x4x1x4xf32> to vector<2x4x4xf32>
    %31 = vector.shape_cast %28 : vector<2x4x4xf32> to vector<2x4x1x4xf32>
    tpu.vector_store %arg3[%c0_29, %c0_30, %c2_31, %c4_32], %31 {strides = array<i32>} : memref<2x4x4x64xf32, #tpu.memory_space<vmem>>, vector<2x4x1x4xf32>,
    %32 = vector.extract_strided_slice %19 {offsets = [0, 0, 12], sizes = [2, 4, 4], strides = [1, 1, 1]} : vector<2x4x16xf32> to vector<2x4x4xf32>
    %c0_33 = arith.constant 0 : index
    %c0_34 = arith.constant 0 : index
    %c3_35 = arith.constant 3 : index
    %c4_36 = arith.constant 4 : index
    %33 = vector.load %arg3[%c0_33, %c0_34, %c3_35, %c4_36] : memref<2x4x4x64xf32, #tpu.memory_space<vmem>>, vector<2x4x1x4xf32>
    %34 = vector.shape_cast %33 : vector<2x4x1x4xf32> to vector<2x4x4xf32>
    %35 = vector.shape_cast %32 : vector<2x4x4xf32> to vector<2x4x1x4xf32>
    tpu.vector_store %arg3[%c0_33, %c0_34, %c3_35, %c4_36], %35 {strides = array<i32>} : memref<2x4x4x64xf32, #tpu.memory_space<vmem>>, vector<2x4x1x4xf32>,
    %c0_37 = arith.constant 0 : index
    %c0_38 = arith.constant 0 : index
    %c0_39 = arith.constant 0 : index
    %c2_40 = arith.constant 2 : index
    %c0_41 = arith.constant 0 : index
    %36 = vector.load %arg2[%c0_37, %c0_38, %c0_39, %c2_40, %c0_41] : memref<2x4x4x4x16xf32, #tpu.memory_space<vmem>>, vector<2x1x4x1x16xf32>
    %37 = vector.shape_cast %36 : vector<2x1x4x1x16xf32> to vector<2x4x16xf32>
    %38 = vector.extract_strided_slice %37 {offsets = [0, 0, 0], sizes = [2, 4, 4], strides = [1, 1, 1]} : vector<2x4x16xf32> to vector<2x4x4xf32>
    %c0_42 = arith.constant 0 : index
    %c0_43 = arith.constant 0 : index
    %c0_44 = arith.constant 0 : index
    %c8 = arith.constant 8 : index
    %39 = vector.load %arg3[%c0_42, %c0_43, %c0_44, %c8] : memref<2x4x4x64xf32, #tpu.memory_space<vmem>>, vector<2x4x1x4xf32>
    %40 = vector.shape_cast %39 : vector<2x4x1x4xf32> to vector<2x4x4xf32>
    %41 = vector.shape_cast %38 : vector<2x4x4xf32> to vector<2x4x1x4xf32>
    tpu.vector_store %arg3[%c0_42, %c0_43, %c0_44, %c8], %41 {strides = array<i32>} : memref<2x4x4x64xf32, #tpu.memory_space<vmem>>, vector<2x4x1x4xf32>,
    %42 = vector.extract_strided_slice %37 {offsets = [0, 0, 4], sizes = [2, 4, 4], strides = [1, 1, 1]} : vector<2x4x16xf32> to vector<2x4x4xf32>
    %c0_45 = arith.constant 0 : index
    %c0_46 = arith.constant 0 : index
    %c1_47 = arith.constant 1 : index
    %c8_48 = arith.constant 8 : index
    %43 = vector.load %arg3[%c0_45, %c0_46, %c1_47, %c8_48] : memref<2x4x4x64xf32, #tpu.memory_space<vmem>>, vector<2x4x1x4xf32>
    %44 = vector.shape_cast %43 : vector<2x4x1x4xf32> to vector<2x4x4xf32>
    %45 = vector.shape_cast %42 : vector<2x4x4xf32> to vector<2x4x1x4xf32>
    tpu.vector_store %arg3[%c0_45, %c0_46, %c1_47, %c8_48], %45 {strides = array<i32>} : memref<2x4x4x64xf32, #tpu.memory_space<vmem>>, vector<2x4x1x4xf32>,
    %46 = vector.extract_strided_slice %37 {offsets = [0, 0, 8], sizes = [2, 4, 4], strides = [1, 1, 1]} : vector<2x4x16xf32> to vector<2x4x4xf32>
    %c0_49 = arith.constant 0 : index
    %c0_50 = arith.constant 0 : index
    %c2_51 = arith.constant 2 : index
    %c8_52 = arith.constant 8 : index
    %47 = vector.load %arg3[%c0_49, %c0_50, %c2_51, %c8_52] : memref<2x4x4x64xf32, #tpu.memory_space<vmem>>, vector<2x4x1x4xf32>
    %48 = vector.shape_cast %47 : vector<2x4x1x4xf32> to vector<2x4x4xf32>
    %49 = vector.shape_cast %46 : vector<2x4x4xf32> to vector<2x4x1x4xf32>
    tpu.vector_store %arg3[%c0_49, %c0_50, %c2_51, %c8_52], %49 {strides = array<i32>} : memref<2x4x4x64xf32, #tpu.memory_space<vmem>>, vector<2x4x1x4xf32>,
    %50 = vector.extract_strided_slice %37 {offsets = [0, 0, 12], sizes = [2, 4, 4], strides = [1, 1, 1]} : vector<2x4x16xf32> to vector<2x4x4xf32>
    %c0_53 = arith.constant 0 : index
    %c0_54 = arith.constant 0 : index
    %c3_55 = arith.constant 3 : index
    %c8_56 = arith.constant 8 : index
    %51 = vector.load %arg3[%c0_53, %c0_54, %c3_55, %c8_56] : memref<2x4x4x64xf32, #tpu.memory_space<vmem>>, vector<2x4x1x4xf32>
    %52 = vector.shape_cast %51 : vector<2x4x1x4xf32> to vector<2x4x4xf32>
    %53 = vector.shape_cast %50 : vector<2x4x4xf32> to vector<2x4x1x4xf32>
    tpu.vector_store %arg3[%c0_53, %c0_54, %c3_55, %c8_56], %53 {strides = array<i32>} : memref<2x4x4x64xf32, #tpu.memory_space<vmem>>, vector<2x4x1x4xf32>,
    %c0_57 = arith.constant 0 : index
    %c0_58 = arith.constant 0 : index
    %c0_59 = arith.constant 0 : index
    %c3_60 = arith.constant 3 : index
    %c0_61 = arith.constant 0 : index
    %54 = vector.load %arg2[%c0_57, %c0_58, %c0_59, %c3_60, %c0_61] : memref<2x4x4x4x16xf32, #tpu.memory_space<vmem>>, vector<2x1x4x1x16xf32>
    %55 = vector.shape_cast %54 : vector<2x1x4x1x16xf32> to vector<2x4x16xf32>
    %56 = vector.extract_strided_slice %55 {offsets = [0, 0, 0], sizes = [2, 4, 4], strides = [1, 1, 1]} : vector<2x4x16xf32> to vector<2x4x4xf32>
    %c0_62 = arith.constant 0 : index
    %c0_63 = arith.constant 0 : index
    %c0_64 = arith.constant 0 : index
    %c12 = arith.constant 12 : index
    %57 = vector.load %arg3[%c0_62, %c0_63, %c0_64, %c12] : memref<2x4x4x64xf32, #tpu.memory_space<vmem>>, vector<2x4x1x4xf32>
    %58 = vector.shape_cast %57 : vector<2x4x1x4xf32> to vector<2x4x4xf32>
    %59 = vector.shape_cast %56 : vector<2x4x4xf32> to vector<2x4x1x4xf32>
    tpu.vector_store %arg3[%c0_62, %c0_63, %c0_64, %c12], %59 {strides = array<i32>} : memref<2x4x4x64xf32, #tpu.memory_space<vmem>>, vector<2x4x1x4xf32>,
    %60 = vector.extract_strided_slice %55 {offsets = [0, 0, 4], sizes = [2, 4, 4], strides = [1, 1, 1]} : vector<2x4x16xf32> to vector<2x4x4xf32>
    %c0_65 = arith.constant 0 : index
    %c0_66 = arith.constant 0 : index
    %c1_67 = arith.constant 1 : index
    %c12_68 = arith.constant 12 : index
    %61 = vector.load %arg3[%c0_65, %c0_66, %c1_67, %c12_68] : memref<2x4x4x64xf32, #tpu.memory_space<vmem>>, vector<2x4x1x4xf32>
    %62 = vector.shape_cast %61 : vector<2x4x1x4xf32> to vector<2x4x4xf32>
    %63 = vector.shape_cast %60 : vector<2x4x4xf32> to vector<2x4x1x4xf32>
    tpu.vector_store %arg3[%c0_65, %c0_66, %c1_67, %c12_68], %63 {strides = array<i32>} : memref<2x4x4x64xf32, #tpu.memory_space<vmem>>, vector<2x4x1x4xf32>,
    %64 = vector.extract_strided_slice %55 {offsets = [0, 0, 8], sizes = [2, 4, 4], strides = [1, 1, 1]} : vector<2x4x16xf32> to vector<2x4x4xf32>
    %c0_69 = arith.constant 0 : index
    %c0_70 = arith.constant 0 : index
    %c2_71 = arith.constant 2 : index
    %c12_72 = arith.constant 12 : index
    %65 = vector.load %arg3[%c0_69, %c0_70, %c2_71, %c12_72] : memref<2x4x4x64xf32, #tpu.memory_space<vmem>>, vector<2x4x1x4xf32>
    %66 = vector.shape_cast %65 : vector<2x4x1x4xf32> to vector<2x4x4xf32>
    %67 = vector.shape_cast %64 : vector<2x4x4xf32> to vector<2x4x1x4xf32>
    tpu.vector_store %arg3[%c0_69, %c0_70, %c2_71, %c12_72], %67 {strides = array<i32>} : memref<2x4x4x64xf32, #tpu.memory_space<vmem>>, vector<2x4x1x4xf32>,
    %68 = vector.extract_strided_slice %55 {offsets = [0, 0, 12], sizes = [2, 4, 4], strides = [1, 1, 1]} : vector<2x4x16xf32> to vector<2x4x4xf32>
    %c0_73 = arith.constant 0 : index
    %c0_74 = arith.constant 0 : index
    %c3_75 = arith.constant 3 : index
    %c12_76 = arith.constant 12 : index
    %69 = vector.load %arg3[%c0_73, %c0_74, %c3_75, %c12_76] : memref<2x4x4x64xf32, #tpu.memory_space<vmem>>, vector<2x4x1x4xf32>
    %70 = vector.shape_cast %69 : vector<2x4x1x4xf32> to vector<2x4x4xf32>
    %71 = vector.shape_cast %68 : vector<2x4x4xf32> to vector<2x4x1x4xf32>
    tpu.vector_store %arg3[%c0_73, %c0_74, %c3_75, %c12_76], %71 {strides = array<i32>} : memref<2x4x4x64xf32, #tpu.memory_space<vmem>>, vector<2x4x1x4xf32>,
    %c0_77 = arith.constant 0 : index
    %c1_78 = arith.constant 1 : index
    %c0_79 = arith.constant 0 : index
    %c0_80 = arith.constant 0 : index
    %c0_81 = arith.constant 0 : index
    %72 = vector.load %arg2[%c0_77, %c1_78, %c0_79, %c0_80, %c0_81] : memref<2x4x4x4x16xf32, #tpu.memory_space<vmem>>, vector<2x1x4x1x16xf32>
    %73 = vector.shape_cast %72 : vector<2x1x4x1x16xf32> to vector<2x4x16xf32>
    %74 = vector.extract_strided_slice %73 {offsets = [0, 0, 0], sizes = [2, 4, 4], strides = [1, 1, 1]} : vector<2x4x16xf32> to vector<2x4x4xf32>
    %c0_82 = arith.constant 0 : index
    %c0_83 = arith.constant 0 : index
    %c0_84 = arith.constant 0 : index
    %c16 = arith.constant 16 : index
    %75 = vector.load %arg3[%c0_82, %c0_83, %c0_84, %c16] : memref<2x4x4x64xf32, #tpu.memory_space<vmem>>, vector<2x4x1x4xf32>
    %76 = vector.shape_cast %75 : vector<2x4x1x4xf32> to vector<2x4x4xf32>
    %77 = vector.shape_cast %74 : vector<2x4x4xf32> to vector<2x4x1x4xf32>
    tpu.vector_store %arg3[%c0_82, %c0_83, %c0_84, %c16], %77 {strides = array<i32>} : memref<2x4x4x64xf32, #tpu.memory_space<vmem>>, vector<2x4x1x4xf32>,
    %78 = vector.extract_strided_slice %73 {offsets = [0, 0, 4], sizes = [2, 4, 4], strides = [1, 1, 1]} : vector<2x4x16xf32> to vector<2x4x4xf32>
    %c0_85 = arith.constant 0 : index
    %c0_86 = arith.constant 0 : index
    %c1_87 = arith.constant 1 : index
    %c16_88 = arith.constant 16 : index
    %79 = vector.load %arg3[%c0_85, %c0_86, %c1_87, %c16_88] : memref<2x4x4x64xf32, #tpu.memory_space<vmem>>, vector<2x4x1x4xf32>
    %80 = vector.shape_cast %79 : vector<2x4x1x4xf32> to vector<2x4x4xf32>
    %81 = vector.shape_cast %78 : vector<2x4x4xf32> to vector<2x4x1x4xf32>
    tpu.vector_store %arg3[%c0_85, %c0_86, %c1_87, %c16_88], %81 {strides = array<i32>} : memref<2x4x4x64xf32, #tpu.memory_space<vmem>>, vector<2x4x1x4xf32>,
    %82 = vector.extract_strided_slice %73 {offsets = [0, 0, 8], sizes = [2, 4, 4], strides = [1, 1, 1]} : vector<2x4x16xf32> to vector<2x4x4xf32>
    %c0_89 = arith.constant 0 : index
    %c0_90 = arith.constant 0 : index
    %c2_91 = arith.constant 2 : index
    %c16_92 = arith.constant 16 : index
    %83 = vector.load %arg3[%c0_89, %c0_90, %c2_91, %c16_92] : memref<2x4x4x64xf32, #tpu.memory_space<vmem>>, vector<2x4x1x4xf32>
    %84 = vector.shape_cast %83 : vector<2x4x1x4xf32> to vector<2x4x4xf32>
    %85 = vector.shape_cast %82 : vector<2x4x4xf32> to vector<2x4x1x4xf32>
    tpu.vector_store %arg3[%c0_89, %c0_90, %c2_91, %c16_92], %85 {strides = array<i32>} : memref<2x4x4x64xf32, #tpu.memory_space<vmem>>, vector<2x4x1x4xf32>,
    %86 = vector.extract_strided_slice %73 {offsets = [0, 0, 12], sizes = [2, 4, 4], strides = [1, 1, 1]} : vector<2x4x16xf32> to vector<2x4x4xf32>
    %c0_93 = arith.constant 0 : index
    %c0_94 = arith.constant 0 : index
    %c3_95 = arith.constant 3 : index
    %c16_96 = arith.constant 16 : index
    %87 = vector.load %arg3[%c0_93, %c0_94, %c3_95, %c16_96] : memref<2x4x4x64xf32, #tpu.memory_space<vmem>>, vector<2x4x1x4xf32>
    %88 = vector.shape_cast %87 : vector<2x4x1x4xf32> to vector<2x4x4xf32>
    %89 = vector.shape_cast %86 : vector<2x4x4xf32> to vector<2x4x1x4xf32>
    tpu.vector_store %arg3[%c0_93, %c0_94, %c3_95, %c16_96], %89 {strides = array<i32>} : memref<2x4x4x64xf32, #tpu.memory_space<vmem>>, vector<2x4x1x4xf32>,
    %c0_97 = arith.constant 0 : index
    %c1_98 = arith.constant 1 : index
    %c0_99 = arith.constant 0 : index
    %c1_100 = arith.constant 1 : index
    %c0_101 = arith.constant 0 : index
    %90 = vector.load %arg2[%c0_97, %c1_98, %c0_99, %c1_100, %c0_101] : memref<2x4x4x4x16xf32, #tpu.memory_space<vmem>>, vector<2x1x4x1x16xf32>
    %91 = vector.shape_cast %90 : vector<2x1x4x1x16xf32> to vector<2x4x16xf32>
    %92 = vector.extract_strided_slice %91 {offsets = [0, 0, 0], sizes = [2, 4, 4], strides = [1, 1, 1]} : vector<2x4x16xf32> to vector<2x4x4xf32>
    %c0_102 = arith.constant 0 : index
    %c0_103 = arith.constant 0 : index
    %c0_104 = arith.constant 0 : index
    %c20 = arith.constant 20 : index
    %93 = vector.load %arg3[%c0_102, %c0_103, %c0_104, %c20] : memref<2x4x4x64xf32, #tpu.memory_space<vmem>>, vector<2x4x1x4xf32>
    %94 = vector.shape_cast %93 : vector<2x4x1x4xf32> to vector<2x4x4xf32>
    %95 = vector.shape_cast %92 : vector<2x4x4xf32> to vector<2x4x1x4xf32>
    tpu.vector_store %arg3[%c0_102, %c0_103, %c0_104, %c20], %95 {strides = array<i32>} : memref<2x4x4x64xf32, #tpu.memory_space<vmem>>, vector<2x4x1x4xf32>,
    %96 = vector.extract_strided_slice %91 {offsets = [0, 0, 4], sizes = [2, 4, 4], strides = [1, 1, 1]} : vector<2x4x16xf32> to vector<2x4x4xf32>
    %c0_105 = arith.constant 0 : index
    %c0_106 = arith.constant 0 : index
    %c1_107 = arith.constant 1 : index
    %c20_108 = arith.constant 20 : index
    %97 = vector.load %arg3[%c0_105, %c0_106, %c1_107, %c20_108] : memref<2x4x4x64xf32, #tpu.memory_space<vmem>>, vector<2x4x1x4xf32>
    %98 = vector.shape_cast %97 : vector<2x4x1x4xf32> to vector<2x4x4xf32>
    %99 = vector.shape_cast %96 : vector<2x4x4xf32> to vector<2x4x1x4xf32>
    tpu.vector_store %arg3[%c0_105, %c0_106, %c1_107, %c20_108], %99 {strides = array<i32>} : memref<2x4x4x64xf32, #tpu.memory_space<vmem>>, vector<2x4x1x4xf32>,
    %100 = vector.extract_strided_slice %91 {offsets = [0, 0, 8], sizes = [2, 4, 4], strides = [1, 1, 1]} : vector<2x4x16xf32> to vector<2x4x4xf32>
    %c0_109 = arith.constant 0 : index
    %c0_110 = arith.constant 0 : index
    %c2_111 = arith.constant 2 : index
    %c20_112 = arith.constant 20 : index
    %101 = vector.load %arg3[%c0_109, %c0_110, %c2_111, %c20_112] : memref<2x4x4x64xf32, #tpu.memory_space<vmem>>, vector<2x4x1x4xf32>
    %102 = vector.shape_cast %101 : vector<2x4x1x4xf32> to vector<2x4x4xf32>
    %103 = vector.shape_cast %100 : vector<2x4x4xf32> to vector<2x4x1x4xf32>
    tpu.vector_store %arg3[%c0_109, %c0_110, %c2_111, %c20_112], %103 {strides = array<i32>} : memref<2x4x4x64xf32, #tpu.memory_space<vmem>>, vector<2x4x1x4xf32>,
    %104 = vector.extract_strided_slice %91 {offsets = [0, 0, 12], sizes = [2, 4, 4], strides = [1, 1, 1]} : vector<2x4x16xf32> to vector<2x4x4xf32>
    %c0_113 = arith.constant 0 : index
    %c0_114 = arith.constant 0 : index
    %c3_115 = arith.constant 3 : index
    %c20_116 = arith.constant 20 : index
    %105 = vector.load %arg3[%c0_113, %c0_114, %c3_115, %c20_116] : memref<2x4x4x64xf32, #tpu.memory_space<vmem>>, vector<2x4x1x4xf32>
    %106 = vector.shape_cast %105 : vector<2x4x1x4xf32> to vector<2x4x4xf32>
    %107 = vector.shape_cast %104 : vector<2x4x4xf32> to vector<2x4x1x4xf32>
    tpu.vector_store %arg3[%c0_113, %c0_114, %c3_115, %c20_116], %107 {strides = array<i32>} : memref<2x4x4x64xf32, #tpu.memory_space<vmem>>, vector<2x4x1x4xf32>,
    %c0_117 = arith.constant 0 : index
    %c1_118 = arith.constant 1 : index
    %c0_119 = arith.constant 0 : index
    %c2_120 = arith.constant 2 : index
    %c0_121 = arith.constant 0 : index
    %108 = vector.load %arg2[%c0_117, %c1_118, %c0_119, %c2_120, %c0_121] : memref<2x4x4x4x16xf32, #tpu.memory_space<vmem>>, vector<2x1x4x1x16xf32>
    %109 = vector.shape_cast %108 : vector<2x1x4x1x16xf32> to vector<2x4x16xf32>
    %110 = vector.extract_strided_slice %109 {offsets = [0, 0, 0], sizes = [2, 4, 4], strides = [1, 1, 1]} : vector<2x4x16xf32> to vector<2x4x4xf32>
    %c0_122 = arith.constant 0 : index
    %c0_123 = arith.constant 0 : index
    %c0_124 = arith.constant 0 : index
    %c24 = arith.constant 24 : index
    %111 = vector.load %arg3[%c0_122, %c0_123, %c0_124, %c24] : memref<2x4x4x64xf32, #tpu.memory_space<vmem>>, vector<2x4x1x4xf32>
    %112 = vector.shape_cast %111 : vector<2x4x1x4xf32> to vector<2x4x4xf32>
    %113 = vector.shape_cast %110 : vector<2x4x4xf32> to vector<2x4x1x4xf32>
    tpu.vector_store %arg3[%c0_122, %c0_123, %c0_124, %c24], %113 {strides = array<i32>} : memref<2x4x4x64xf32, #tpu.memory_space<vmem>>, vector<2x4x1x4xf32>,
    %114 = vector.extract_strided_slice %109 {offsets = [0, 0, 4], sizes = [2, 4, 4], strides = [1, 1, 1]} : vector<2x4x16xf32> to vector<2x4x4xf32>
    %c0_125 = arith.constant 0 : index
    %c0_126 = arith.constant 0 : index
    %c1_127 = arith.constant 1 : index
    %c24_128 = arith.constant 24 : index
    %115 = vector.load %arg3[%c0_125, %c0_126, %c1_127, %c24_128] : memref<2x4x4x64xf32, #tpu.memory_space<vmem>>, vector<2x4x1x4xf32>
    %116 = vector.shape_cast %115 : vector<2x4x1x4xf32> to vector<2x4x4xf32>
    %117 = vector.shape_cast %114 : vector<2x4x4xf32> to vector<2x4x1x4xf32>
    tpu.vector_store %arg3[%c0_125, %c0_126, %c1_127, %c24_128], %117 {strides = array<i32>} : memref<2x4x4x64xf32, #tpu.memory_space<vmem>>, vector<2x4x1x4xf32>,
    %118 = vector.extract_strided_slice %109 {offsets = [0, 0, 8], sizes = [2, 4, 4], strides = [1, 1, 1]} : vector<2x4x16xf32> to vector<2x4x4xf32>
    %c0_129 = arith.constant 0 : index
    %c0_130 = arith.constant 0 : index
    %c2_131 = arith.constant 2 : index
    %c24_132 = arith.constant 24 : index
    %119 = vector.load %arg3[%c0_129, %c0_130, %c2_131, %c24_132] : memref<2x4x4x64xf32, #tpu.memory_space<vmem>>, vector<2x4x1x4xf32>
    %120 = vector.shape_cast %119 : vector<2x4x1x4xf32> to vector<2x4x4xf32>
    %121 = vector.shape_cast %118 : vector<2x4x4xf32> to vector<2x4x1x4xf32>
    tpu.vector_store %arg3[%c0_129, %c0_130, %c2_131, %c24_132], %121 {strides = array<i32>} : memref<2x4x4x64xf32, #tpu.memory_space<vmem>>, vector<2x4x1x4xf32>,
    %122 = vector.extract_strided_slice %109 {offsets = [0, 0, 12], sizes = [2, 4, 4], strides = [1, 1, 1]} : vector<2x4x16xf32> to vector<2x4x4xf32>
    %c0_133 = arith.constant 0 : index
    %c0_134 = arith.constant 0 : index
    %c3_135 = arith.constant 3 : index
    %c24_136 = arith.constant 24 : index
    %123 = vector.load %arg3[%c0_133, %c0_134, %c3_135, %c24_136] : memref<2x4x4x64xf32, #tpu.memory_space<vmem>>, vector<2x4x1x4xf32>
    %124 = vector.shape_cast %123 : vector<2x4x1x4xf32> to vector<2x4x4xf32>
    %125 = vector.shape_cast %122 : vector<2x4x4xf32> to vector<2x4x1x4xf32>
    tpu.vector_store %arg3[%c0_133, %c0_134, %c3_135, %c24_136], %125 {strides = array<i32>} : memref<2x4x4x64xf32, #tpu.memory_space<vmem>>, vector<2x4x1x4xf32>,
    %c0_137 = arith.constant 0 : index
    %c1_138 = arith.constant 1 : index
    %c0_139 = arith.constant 0 : index
    %c3_140 = arith.constant 3 : index
    %c0_141 = arith.constant 0 : index
    %126 = vector.load %arg2[%c0_137, %c1_138, %c0_139, %c3_140, %c0_141] : memref<2x4x4x4x16xf32, #tpu.memory_space<vmem>>, vector<2x1x4x1x16xf32>
    %127 = vector.shape_cast %126 : vector<2x1x4x1x16xf32> to vector<2x4x16xf32>
    %128 = vector.extract_strided_slice %127 {offsets = [0, 0, 0], sizes = [2, 4, 4], strides = [1, 1, 1]} : vector<2x4x16xf32> to vector<2x4x4xf32>
    %c0_142 = arith.constant 0 : index
    %c0_143 = arith.constant 0 : index
    %c0_144 = arith.constant 0 : index
    %c28 = arith.constant 28 : index
    %129 = vector.load %arg3[%c0_142, %c0_143, %c0_144, %c28] : memref<2x4x4x64xf32, #tpu.memory_space<vmem>>, vector<2x4x1x4xf32>
    %130 = vector.shape_cast %129 : vector<2x4x1x4xf32> to vector<2x4x4xf32>
    %131 = vector.shape_cast %128 : vector<2x4x4xf32> to vector<2x4x1x4xf32>
    tpu.vector_store %arg3[%c0_142, %c0_143, %c0_144, %c28], %131 {strides = array<i32>} : memref<2x4x4x64xf32, #tpu.memory_space<vmem>>, vector<2x4x1x4xf32>,
    %132 = vector.extract_strided_slice %127 {offsets = [0, 0, 4], sizes = [2, 4, 4], strides = [1, 1, 1]} : vector<2x4x16xf32> to vector<2x4x4xf32>
    %c0_145 = arith.constant 0 : index
    %c0_146 = arith.constant 0 : index
    %c1_147 = arith.constant 1 : index
    %c28_148 = arith.constant 28 : index
    %133 = vector.load %arg3[%c0_145, %c0_146, %c1_147, %c28_148] : memref<2x4x4x64xf32, #tpu.memory_space<vmem>>, vector<2x4x1x4xf32>
    %134 = vector.shape_cast %133 : vector<2x4x1x4xf32> to vector<2x4x4xf32>
    %135 = vector.shape_cast %132 : vector<2x4x4xf32> to vector<2x4x1x4xf32>
    tpu.vector_store %arg3[%c0_145, %c0_146, %c1_147, %c28_148], %135 {strides = array<i32>} : memref<2x4x4x64xf32, #tpu.memory_space<vmem>>, vector<2x4x1x4xf32>,
    %136 = vector.extract_strided_slice %127 {offsets = [0, 0, 8], sizes = [2, 4, 4], strides = [1, 1, 1]} : vector<2x4x16xf32> to vector<2x4x4xf32>
    %c0_149 = arith.constant 0 : index
    %c0_150 = arith.constant 0 : index
    %c2_151 = arith.constant 2 : index
    %c28_152 = arith.constant 28 : index
    %137 = vector.load %arg3[%c0_149, %c0_150, %c2_151, %c28_152] : memref<2x4x4x64xf32, #tpu.memory_space<vmem>>, vector<2x4x1x4xf32>
    %138 = vector.shape_cast %137 : vector<2x4x1x4xf32> to vector<2x4x4xf32>
    %139 = vector.shape_cast %136 : vector<2x4x4xf32> to vector<2x4x1x4xf32>
    tpu.vector_store %arg3[%c0_149, %c0_150, %c2_151, %c28_152], %139 {strides = array<i32>} : memref<2x4x4x64xf32, #tpu.memory_space<vmem>>, vector<2x4x1x4xf32>,
    %140 = vector.extract_strided_slice %127 {offsets = [0, 0, 12], sizes = [2, 4, 4], strides = [1, 1, 1]} : vector<2x4x16xf32> to vector<2x4x4xf32>
    %c0_153 = arith.constant 0 : index
    %c0_154 = arith.constant 0 : index
    %c3_155 = arith.constant 3 : index
    %c28_156 = arith.constant 28 : index
    %141 = vector.load %arg3[%c0_153, %c0_154, %c3_155, %c28_156] : memref<2x4x4x64xf32, #tpu.memory_space<vmem>>, vector<2x4x1x4xf32>
    %142 = vector.shape_cast %141 : vector<2x4x1x4xf32> to vector<2x4x4xf32>
    %143 = vector.shape_cast %140 : vector<2x4x4xf32> to vector<2x4x1x4xf32>
    tpu.vector_store %arg3[%c0_153, %c0_154, %c3_155, %c28_156], %143 {strides = array<i32>} : memref<2x4x4x64xf32, #tpu.memory_space<vmem>>, vector<2x4x1x4xf32>,
    %c0_157 = arith.constant 0 : index
    %c2_158 = arith.constant 2 : index
    %c0_159 = arith.constant 0 : index
    %c0_160 = arith.constant 0 : index
    %c0_161 = arith.constant 0 : index
    %144 = vector.load %arg2[%c0_157, %c2_158, %c0_159, %c0_160, %c0_161] : memref<2x4x4x4x16xf32, #tpu.memory_space<vmem>>, vector<2x1x4x1x16xf32>
    %145 = vector.shape_cast %144 : vector<2x1x4x1x16xf32> to vector<2x4x16xf32>
    %146 = vector.extract_strided_slice %145 {offsets = [0, 0, 0], sizes = [2, 4, 4], strides = [1, 1, 1]} : vector<2x4x16xf32> to vector<2x4x4xf32>
    %c0_162 = arith.constant 0 : index
    %c0_163 = arith.constant 0 : index
    %c0_164 = arith.constant 0 : index
    %c32 = arith.constant 32 : index
    %147 = vector.load %arg3[%c0_162, %c0_163, %c0_164, %c32] : memref<2x4x4x64xf32, #tpu.memory_space<vmem>>, vector<2x4x1x4xf32>
    %148 = vector.shape_cast %147 : vector<2x4x1x4xf32> to vector<2x4x4xf32>
    %149 = vector.shape_cast %146 : vector<2x4x4xf32> to vector<2x4x1x4xf32>
    tpu.vector_store %arg3[%c0_162, %c0_163, %c0_164, %c32], %149 {strides = array<i32>} : memref<2x4x4x64xf32, #tpu.memory_space<vmem>>, vector<2x4x1x4xf32>,
    %150 = vector.extract_strided_slice %145 {offsets = [0, 0, 4], sizes = [2, 4, 4], strides = [1, 1, 1]} : vector<2x4x16xf32> to vector<2x4x4xf32>
    %c0_165 = arith.constant 0 : index
    %c0_166 = arith.constant 0 : index
    %c1_167 = arith.constant 1 : index
    %c32_168 = arith.constant 32 : index
    %151 = vector.load %arg3[%c0_165, %c0_166, %c1_167, %c32_168] : memref<2x4x4x64xf32, #tpu.memory_space<vmem>>, vector<2x4x1x4xf32>
    %152 = vector.shape_cast %151 : vector<2x4x1x4xf32> to vector<2x4x4xf32>
    %153 = vector.shape_cast %150 : vector<2x4x4xf32> to vector<2x4x1x4xf32>
    tpu.vector_store %arg3[%c0_165, %c0_166, %c1_167, %c32_168], %153 {strides = array<i32>} : memref<2x4x4x64xf32, #tpu.memory_space<vmem>>, vector<2x4x1x4xf32>,
    %154 = vector.extract_strided_slice %145 {offsets = [0, 0, 8], sizes = [2, 4, 4], strides = [1, 1, 1]} : vector<2x4x16xf32> to vector<2x4x4xf32>
    %c0_169 = arith.constant 0 : index
    %c0_170 = arith.constant 0 : index
    %c2_171 = arith.constant 2 : index
    %c32_172 = arith.constant 32 : index
    %155 = vector.load %arg3[%c0_169, %c0_170, %c2_171, %c32_172] : memref<2x4x4x64xf32, #tpu.memory_space<vmem>>, vector<2x4x1x4xf32>
    %156 = vector.shape_cast %155 : vector<2x4x1x4xf32> to vector<2x4x4xf32>
    %157 = vector.shape_cast %154 : vector<2x4x4xf32> to vector<2x4x1x4xf32>
    tpu.vector_store %arg3[%c0_169, %c0_170, %c2_171, %c32_172], %157 {strides = array<i32>} : memref<2x4x4x64xf32, #tpu.memory_space<vmem>>, vector<2x4x1x4xf32>,
    %158 = vector.extract_strided_slice %145 {offsets = [0, 0, 12], sizes = [2, 4, 4], strides = [1, 1, 1]} : vector<2x4x16xf32> to vector<2x4x4xf32>
    %c0_173 = arith.constant 0 : index
    %c0_174 = arith.constant 0 : index
    %c3_175 = arith.constant 3 : index
    %c32_176 = arith.constant 32 : index
    %159 = vector.load %arg3[%c0_173, %c0_174, %c3_175, %c32_176] : memref<2x4x4x64xf32, #tpu.memory_space<vmem>>, vector<2x4x1x4xf32>
    %160 = vector.shape_cast %159 : vector<2x4x1x4xf32> to vector<2x4x4xf32>
    %161 = vector.shape_cast %158 : vector<2x4x4xf32> to vector<2x4x1x4xf32>
    tpu.vector_store %arg3[%c0_173, %c0_174, %c3_175, %c32_176], %161 {strides = array<i32>} : memref<2x4x4x64xf32, #tpu.memory_space<vmem>>, vector<2x4x1x4xf32>,
    %c0_177 = arith.constant 0 : index
    %c2_178 = arith.constant 2 : index
    %c0_179 = arith.constant 0 : index
    %c1_180 = arith.constant 1 : index
    %c0_181 = arith.constant 0 : index
    %162 = vector.load %arg2[%c0_177, %c2_178, %c0_179, %c1_180, %c0_181] : memref<2x4x4x4x16xf32, #tpu.memory_space<vmem>>, vector<2x1x4x1x16xf32>
    %163 = vector.shape_cast %162 : vector<2x1x4x1x16xf32> to vector<2x4x16xf32>
    %164 = vector.extract_strided_slice %163 {offsets = [0, 0, 0], sizes = [2, 4, 4], strides = [1, 1, 1]} : vector<2x4x16xf32> to vector<2x4x4xf32>
    %c0_182 = arith.constant 0 : index
    %c0_183 = arith.constant 0 : index
    %c0_184 = arith.constant 0 : index
    %c36 = arith.constant 36 : index
    %165 = vector.load %arg3[%c0_182, %c0_183, %c0_184, %c36] : memref<2x4x4x64xf32, #tpu.memory_space<vmem>>, vector<2x4x1x4xf32>
    %166 = vector.shape_cast %165 : vector<2x4x1x4xf32> to vector<2x4x4xf32>
    %167 = vector.shape_cast %164 : vector<2x4x4xf32> to vector<2x4x1x4xf32>
    tpu.vector_store %arg3[%c0_182, %c0_183, %c0_184, %c36], %167 {strides = array<i32>} : memref<2x4x4x64xf32, #tpu.memory_space<vmem>>, vector<2x4x1x4xf32>,
    %168 = vector.extract_strided_slice %163 {offsets = [0, 0, 4], sizes = [2, 4, 4], strides = [1, 1, 1]} : vector<2x4x16xf32> to vector<2x4x4xf32>
    %c0_185 = arith.constant 0 : index
    %c0_186 = arith.constant 0 : index
    %c1_187 = arith.constant 1 : index
    %c36_188 = arith.constant 36 : index
    %169 = vector.load %arg3[%c0_185, %c0_186, %c1_187, %c36_188] : memref<2x4x4x64xf32, #tpu.memory_space<vmem>>, vector<2x4x1x4xf32>
    %170 = vector.shape_cast %169 : vector<2x4x1x4xf32> to vector<2x4x4xf32>
    %171 = vector.shape_cast %168 : vector<2x4x4xf32> to vector<2x4x1x4xf32>
    tpu.vector_store %arg3[%c0_185, %c0_186, %c1_187, %c36_188], %171 {strides = array<i32>} : memref<2x4x4x64xf32, #tpu.memory_space<vmem>>, vector<2x4x1x4xf32>,
    %172 = vector.extract_strided_slice %163 {offsets = [0, 0, 8], sizes = [2, 4, 4], strides = [1, 1, 1]} : vector<2x4x16xf32> to vector<2x4x4xf32>
    %c0_189 = arith.constant 0 : index
    %c0_190 = arith.constant 0 : index
    %c2_191 = arith.constant 2 : index
    %c36_192 = arith.constant 36 : index
    %173 = vector.load %arg3[%c0_189, %c0_190, %c2_191, %c36_192] : memref<2x4x4x64xf32, #tpu.memory_space<vmem>>, vector<2x4x1x4xf32>
    %174 = vector.shape_cast %173 : vector<2x4x1x4xf32> to vector<2x4x4xf32>
    %175 = vector.shape_cast %172 : vector<2x4x4xf32> to vector<2x4x1x4xf32>
    tpu.vector_store %arg3[%c0_189, %c0_190, %c2_191, %c36_192], %175 {strides = array<i32>} : memref<2x4x4x64xf32, #tpu.memory_space<vmem>>, vector<2x4x1x4xf32>,
    %176 = vector.extract_strided_slice %163 {offsets = [0, 0, 12], sizes = [2, 4, 4], strides = [1, 1, 1]} : vector<2x4x16xf32> to vector<2x4x4xf32>
    %c0_193 = arith.constant 0 : index
    %c0_194 = arith.constant 0 : index
    %c3_195 = arith.constant 3 : index
    %c36_196 = arith.constant 36 : index
    %177 = vector.load %arg3[%c0_193, %c0_194, %c3_195, %c36_196] : memref<2x4x4x64xf32, #tpu.memory_space<vmem>>, vector<2x4x1x4xf32>
    %178 = vector.shape_cast %177 : vector<2x4x1x4xf32> to vector<2x4x4xf32>
    %179 = vector.shape_cast %176 : vector<2x4x4xf32> to vector<2x4x1x4xf32>
    tpu.vector_store %arg3[%c0_193, %c0_194, %c3_195, %c36_196], %179 {strides = array<i32>} : memref<2x4x4x64xf32, #tpu.memory_space<vmem>>, vector<2x4x1x4xf32>,
    %c0_197 = arith.constant 0 : index
    %c2_198 = arith.constant 2 : index
    %c0_199 = arith.constant 0 : index
    %c2_200 = arith.constant 2 : index
    %c0_201 = arith.constant 0 : index
    %180 = vector.load %arg2[%c0_197, %c2_198, %c0_199, %c2_200, %c0_201] : memref<2x4x4x4x16xf32, #tpu.memory_space<vmem>>, vector<2x1x4x1x16xf32>
    %181 = vector.shape_cast %180 : vector<2x1x4x1x16xf32> to vector<2x4x16xf32>
    %182 = vector.extract_strided_slice %181 {offsets = [0, 0, 0], sizes = [2, 4, 4], strides = [1, 1, 1]} : vector<2x4x16xf32> to vector<2x4x4xf32>
    %c0_202 = arith.constant 0 : index
    %c0_203 = arith.constant 0 : index
    %c0_204 = arith.constant 0 : index
    %c40 = arith.constant 40 : index
    %183 = vector.load %arg3[%c0_202, %c0_203, %c0_204, %c40] : memref<2x4x4x64xf32, #tpu.memory_space<vmem>>, vector<2x4x1x4xf32>
    %184 = vector.shape_cast %183 : vector<2x4x1x4xf32> to vector<2x4x4xf32>
    %185 = vector.shape_cast %182 : vector<2x4x4xf32> to vector<2x4x1x4xf32>
    tpu.vector_store %arg3[%c0_202, %c0_203, %c0_204, %c40], %185 {strides = array<i32>} : memref<2x4x4x64xf32, #tpu.memory_space<vmem>>, vector<2x4x1x4xf32>,
    %186 = vector.extract_strided_slice %181 {offsets = [0, 0, 4], sizes = [2, 4, 4], strides = [1, 1, 1]} : vector<2x4x16xf32> to vector<2x4x4xf32>
    %c0_205 = arith.constant 0 : index
    %c0_206 = arith.constant 0 : index
    %c1_207 = arith.constant 1 : index
    %c40_208 = arith.constant 40 : index
    %187 = vector.load %arg3[%c0_205, %c0_206, %c1_207, %c40_208] : memref<2x4x4x64xf32, #tpu.memory_space<vmem>>, vector<2x4x1x4xf32>
    %188 = vector.shape_cast %187 : vector<2x4x1x4xf32> to vector<2x4x4xf32>
    %189 = vector.shape_cast %186 : vector<2x4x4xf32> to vector<2x4x1x4xf32>
    tpu.vector_store %arg3[%c0_205, %c0_206, %c1_207, %c40_208], %189 {strides = array<i32>} : memref<2x4x4x64xf32, #tpu.memory_space<vmem>>, vector<2x4x1x4xf32>,
    %190 = vector.extract_strided_slice %181 {offsets = [0, 0, 8], sizes = [2, 4, 4], strides = [1, 1, 1]} : vector<2x4x16xf32> to vector<2x4x4xf32>
    %c0_209 = arith.constant 0 : index
    %c0_210 = arith.constant 0 : index
    %c2_211 = arith.constant 2 : index
    %c40_212 = arith.constant 40 : index
    %191 = vector.load %arg3[%c0_209, %c0_210, %c2_211, %c40_212] : memref<2x4x4x64xf32, #tpu.memory_space<vmem>>, vector<2x4x1x4xf32>
    %192 = vector.shape_cast %191 : vector<2x4x1x4xf32> to vector<2x4x4xf32>
    %193 = vector.shape_cast %190 : vector<2x4x4xf32> to vector<2x4x1x4xf32>
    tpu.vector_store %arg3[%c0_209, %c0_210, %c2_211, %c40_212], %193 {strides = array<i32>} : memref<2x4x4x64xf32, #tpu.memory_space<vmem>>, vector<2x4x1x4xf32>,
    %194 = vector.extract_strided_slice %181 {offsets = [0, 0, 12], sizes = [2, 4, 4], strides = [1, 1, 1]} : vector<2x4x16xf32> to vector<2x4x4xf32>
    %c0_213 = arith.constant 0 : index
    %c0_214 = arith.constant 0 : index
    %c3_215 = arith.constant 3 : index
    %c40_216 = arith.constant 40 : index
    %195 = vector.load %arg3[%c0_213, %c0_214, %c3_215, %c40_216] : memref<2x4x4x64xf32, #tpu.memory_space<vmem>>, vector<2x4x1x4xf32>
    %196 = vector.shape_cast %195 : vector<2x4x1x4xf32> to vector<2x4x4xf32>
    %197 = vector.shape_cast %194 : vector<2x4x4xf32> to vector<2x4x1x4xf32>
    tpu.vector_store %arg3[%c0_213, %c0_214, %c3_215, %c40_216], %197 {strides = array<i32>} : memref<2x4x4x64xf32, #tpu.memory_space<vmem>>, vector<2x4x1x4xf32>,
    %c0_217 = arith.constant 0 : index
    %c2_218 = arith.constant 2 : index
    %c0_219 = arith.constant 0 : index
    %c3_220 = arith.constant 3 : index
    %c0_221 = arith.constant 0 : index
    %198 = vector.load %arg2[%c0_217, %c2_218, %c0_219, %c3_220, %c0_221] : memref<2x4x4x4x16xf32, #tpu.memory_space<vmem>>, vector<2x1x4x1x16xf32>
    %199 = vector.shape_cast %198 : vector<2x1x4x1x16xf32> to vector<2x4x16xf32>
    %200 = vector.extract_strided_slice %199 {offsets = [0, 0, 0], sizes = [2, 4, 4], strides = [1, 1, 1]} : vector<2x4x16xf32> to vector<2x4x4xf32>
    %c0_222 = arith.constant 0 : index
    %c0_223 = arith.constant 0 : index
    %c0_224 = arith.constant 0 : index
    %c44 = arith.constant 44 : index
    %201 = vector.load %arg3[%c0_222, %c0_223, %c0_224, %c44] : memref<2x4x4x64xf32, #tpu.memory_space<vmem>>, vector<2x4x1x4xf32>
    %202 = vector.shape_cast %201 : vector<2x4x1x4xf32> to vector<2x4x4xf32>
    %203 = vector.shape_cast %200 : vector<2x4x4xf32> to vector<2x4x1x4xf32>
    tpu.vector_store %arg3[%c0_222, %c0_223, %c0_224, %c44], %203 {strides = array<i32>} : memref<2x4x4x64xf32, #tpu.memory_space<vmem>>, vector<2x4x1x4xf32>,
    %204 = vector.extract_strided_slice %199 {offsets = [0, 0, 4], sizes = [2, 4, 4], strides = [1, 1, 1]} : vector<2x4x16xf32> to vector<2x4x4xf32>
    %c0_225 = arith.constant 0 : index
    %c0_226 = arith.constant 0 : index
    %c1_227 = arith.constant 1 : index
    %c44_228 = arith.constant 44 : index
    %205 = vector.load %arg3[%c0_225, %c0_226, %c1_227, %c44_228] : memref<2x4x4x64xf32, #tpu.memory_space<vmem>>, vector<2x4x1x4xf32>
    %206 = vector.shape_cast %205 : vector<2x4x1x4xf32> to vector<2x4x4xf32>
    %207 = vector.shape_cast %204 : vector<2x4x4xf32> to vector<2x4x1x4xf32>
    tpu.vector_store %arg3[%c0_225, %c0_226, %c1_227, %c44_228], %207 {strides = array<i32>} : memref<2x4x4x64xf32, #tpu.memory_space<vmem>>, vector<2x4x1x4xf32>,
    %208 = vector.extract_strided_slice %199 {offsets = [0, 0, 8], sizes = [2, 4, 4], strides = [1, 1, 1]} : vector<2x4x16xf32> to vector<2x4x4xf32>
    %c0_229 = arith.constant 0 : index
    %c0_230 = arith.constant 0 : index
    %c2_231 = arith.constant 2 : index
    %c44_232 = arith.constant 44 : index
    %209 = vector.load %arg3[%c0_229, %c0_230, %c2_231, %c44_232] : memref<2x4x4x64xf32, #tpu.memory_space<vmem>>, vector<2x4x1x4xf32>
    %210 = vector.shape_cast %209 : vector<2x4x1x4xf32> to vector<2x4x4xf32>
    %211 = vector.shape_cast %208 : vector<2x4x4xf32> to vector<2x4x1x4xf32>
    tpu.vector_store %arg3[%c0_229, %c0_230, %c2_231, %c44_232], %211 {strides = array<i32>} : memref<2x4x4x64xf32, #tpu.memory_space<vmem>>, vector<2x4x1x4xf32>,
    %212 = vector.extract_strided_slice %199 {offsets = [0, 0, 12], sizes = [2, 4, 4], strides = [1, 1, 1]} : vector<2x4x16xf32> to vector<2x4x4xf32>
    %c0_233 = arith.constant 0 : index
    %c0_234 = arith.constant 0 : index
    %c3_235 = arith.constant 3 : index
    %c44_236 = arith.constant 44 : index
    %213 = vector.load %arg3[%c0_233, %c0_234, %c3_235, %c44_236] : memref<2x4x4x64xf32, #tpu.memory_space<vmem>>, vector<2x4x1x4xf32>
    %214 = vector.shape_cast %213 : vector<2x4x1x4xf32> to vector<2x4x4xf32>
    %215 = vector.shape_cast %212 : vector<2x4x4xf32> to vector<2x4x1x4xf32>
    tpu.vector_store %arg3[%c0_233, %c0_234, %c3_235, %c44_236], %215 {strides = array<i32>} : memref<2x4x4x64xf32, #tpu.memory_space<vmem>>, vector<2x4x1x4xf32>,
    %c0_237 = arith.constant 0 : index
    %c3_238 = arith.constant 3 : index
    %c0_239 = arith.constant 0 : index
    %c0_240 = arith.constant 0 : index
    %c0_241 = arith.constant 0 : index
    %216 = vector.load %arg2[%c0_237, %c3_238, %c0_239, %c0_240, %c0_241] : memref<2x4x4x4x16xf32, #tpu.memory_space<vmem>>, vector<2x1x4x1x16xf32>
    %217 = vector.shape_cast %216 : vector<2x1x4x1x16xf32> to vector<2x4x16xf32>
    %218 = vector.extract_strided_slice %217 {offsets = [0, 0, 0], sizes = [2, 4, 4], strides = [1, 1, 1]} : vector<2x4x16xf32> to vector<2x4x4xf32>
    %c0_242 = arith.constant 0 : index
    %c0_243 = arith.constant 0 : index
    %c0_244 = arith.constant 0 : index
    %c48 = arith.constant 48 : index
    %219 = vector.load %arg3[%c0_242, %c0_243, %c0_244, %c48] : memref<2x4x4x64xf32, #tpu.memory_space<vmem>>, vector<2x4x1x4xf32>
    %220 = vector.shape_cast %219 : vector<2x4x1x4xf32> to vector<2x4x4xf32>
    %221 = vector.shape_cast %218 : vector<2x4x4xf32> to vector<2x4x1x4xf32>
    tpu.vector_store %arg3[%c0_242, %c0_243, %c0_244, %c48], %221 {strides = array<i32>} : memref<2x4x4x64xf32, #tpu.memory_space<vmem>>, vector<2x4x1x4xf32>,
    %222 = vector.extract_strided_slice %217 {offsets = [0, 0, 4], sizes = [2, 4, 4], strides = [1, 1, 1]} : vector<2x4x16xf32> to vector<2x4x4xf32>
    %c0_245 = arith.constant 0 : index
    %c0_246 = arith.constant 0 : index
    %c1_247 = arith.constant 1 : index
    %c48_248 = arith.constant 48 : index
    %223 = vector.load %arg3[%c0_245, %c0_246, %c1_247, %c48_248] : memref<2x4x4x64xf32, #tpu.memory_space<vmem>>, vector<2x4x1x4xf32>
    %224 = vector.shape_cast %223 : vector<2x4x1x4xf32> to vector<2x4x4xf32>
    %225 = vector.shape_cast %222 : vector<2x4x4xf32> to vector<2x4x1x4xf32>
    tpu.vector_store %arg3[%c0_245, %c0_246, %c1_247, %c48_248], %225 {strides = array<i32>} : memref<2x4x4x64xf32, #tpu.memory_space<vmem>>, vector<2x4x1x4xf32>,
    %226 = vector.extract_strided_slice %217 {offsets = [0, 0, 8], sizes = [2, 4, 4], strides = [1, 1, 1]} : vector<2x4x16xf32> to vector<2x4x4xf32>
    %c0_249 = arith.constant 0 : index
    %c0_250 = arith.constant 0 : index
    %c2_251 = arith.constant 2 : index
    %c48_252 = arith.constant 48 : index
    %227 = vector.load %arg3[%c0_249, %c0_250, %c2_251, %c48_252] : memref<2x4x4x64xf32, #tpu.memory_space<vmem>>, vector<2x4x1x4xf32>
    %228 = vector.shape_cast %227 : vector<2x4x1x4xf32> to vector<2x4x4xf32>
    %229 = vector.shape_cast %226 : vector<2x4x4xf32> to vector<2x4x1x4xf32>
    tpu.vector_store %arg3[%c0_249, %c0_250, %c2_251, %c48_252], %229 {strides = array<i32>} : memref<2x4x4x64xf32, #tpu.memory_space<vmem>>, vector<2x4x1x4xf32>,
    %230 = vector.extract_strided_slice %217 {offsets = [0, 0, 12], sizes = [2, 4, 4], strides = [1, 1, 1]} : vector<2x4x16xf32> to vector<2x4x4xf32>
    %c0_253 = arith.constant 0 : index
    %c0_254 = arith.constant 0 : index
    %c3_255 = arith.constant 3 : index
    %c48_256 = arith.constant 48 : index
    %231 = vector.load %arg3[%c0_253, %c0_254, %c3_255, %c48_256] : memref<2x4x4x64xf32, #tpu.memory_space<vmem>>, vector<2x4x1x4xf32>
    %232 = vector.shape_cast %231 : vector<2x4x1x4xf32> to vector<2x4x4xf32>
    %233 = vector.shape_cast %230 : vector<2x4x4xf32> to vector<2x4x1x4xf32>
    tpu.vector_store %arg3[%c0_253, %c0_254, %c3_255, %c48_256], %233 {strides = array<i32>} : memref<2x4x4x64xf32, #tpu.memory_space<vmem>>, vector<2x4x1x4xf32>,
    %c0_257 = arith.constant 0 : index
    %c3_258 = arith.constant 3 : index
    %c0_259 = arith.constant 0 : index
    %c1_260 = arith.constant 1 : index
    %c0_261 = arith.constant 0 : index
    %234 = vector.load %arg2[%c0_257, %c3_258, %c0_259, %c1_260, %c0_261] : memref<2x4x4x4x16xf32, #tpu.memory_space<vmem>>, vector<2x1x4x1x16xf32>
    %235 = vector.shape_cast %234 : vector<2x1x4x1x16xf32> to vector<2x4x16xf32>
    %236 = vector.extract_strided_slice %235 {offsets = [0, 0, 0], sizes = [2, 4, 4], strides = [1, 1, 1]} : vector<2x4x16xf32> to vector<2x4x4xf32>
    %c0_262 = arith.constant 0 : index
    %c0_263 = arith.constant 0 : index
    %c0_264 = arith.constant 0 : index
    %c52 = arith.constant 52 : index
    %237 = vector.load %arg3[%c0_262, %c0_263, %c0_264, %c52] : memref<2x4x4x64xf32, #tpu.memory_space<vmem>>, vector<2x4x1x4xf32>
    %238 = vector.shape_cast %237 : vector<2x4x1x4xf32> to vector<2x4x4xf32>
    %239 = vector.shape_cast %236 : vector<2x4x4xf32> to vector<2x4x1x4xf32>
    tpu.vector_store %arg3[%c0_262, %c0_263, %c0_264, %c52], %239 {strides = array<i32>} : memref<2x4x4x64xf32, #tpu.memory_space<vmem>>, vector<2x4x1x4xf32>,
    %240 = vector.extract_strided_slice %235 {offsets = [0, 0, 4], sizes = [2, 4, 4], strides = [1, 1, 1]} : vector<2x4x16xf32> to vector<2x4x4xf32>
    %c0_265 = arith.constant 0 : index
    %c0_266 = arith.constant 0 : index
    %c1_267 = arith.constant 1 : index
    %c52_268 = arith.constant 52 : index
    %241 = vector.load %arg3[%c0_265, %c0_266, %c1_267, %c52_268] : memref<2x4x4x64xf32, #tpu.memory_space<vmem>>, vector<2x4x1x4xf32>
    %242 = vector.shape_cast %241 : vector<2x4x1x4xf32> to vector<2x4x4xf32>
    %243 = vector.shape_cast %240 : vector<2x4x4xf32> to vector<2x4x1x4xf32>
    tpu.vector_store %arg3[%c0_265, %c0_266, %c1_267, %c52_268], %243 {strides = array<i32>} : memref<2x4x4x64xf32, #tpu.memory_space<vmem>>, vector<2x4x1x4xf32>,
    %244 = vector.extract_strided_slice %235 {offsets = [0, 0, 8], sizes = [2, 4, 4], strides = [1, 1, 1]} : vector<2x4x16xf32> to vector<2x4x4xf32>
    %c0_269 = arith.constant 0 : index
    %c0_270 = arith.constant 0 : index
    %c2_271 = arith.constant 2 : index
    %c52_272 = arith.constant 52 : index
    %245 = vector.load %arg3[%c0_269, %c0_270, %c2_271, %c52_272] : memref<2x4x4x64xf32, #tpu.memory_space<vmem>>, vector<2x4x1x4xf32>
    %246 = vector.shape_cast %245 : vector<2x4x1x4xf32> to vector<2x4x4xf32>
    %247 = vector.shape_cast %244 : vector<2x4x4xf32> to vector<2x4x1x4xf32>
    tpu.vector_store %arg3[%c0_269, %c0_270, %c2_271, %c52_272], %247 {strides = array<i32>} : memref<2x4x4x64xf32, #tpu.memory_space<vmem>>, vector<2x4x1x4xf32>,
    %248 = vector.extract_strided_slice %235 {offsets = [0, 0, 12], sizes = [2, 4, 4], strides = [1, 1, 1]} : vector<2x4x16xf32> to vector<2x4x4xf32>
    %c0_273 = arith.constant 0 : index
    %c0_274 = arith.constant 0 : index
    %c3_275 = arith.constant 3 : index
    %c52_276 = arith.constant 52 : index
    %249 = vector.load %arg3[%c0_273, %c0_274, %c3_275, %c52_276] : memref<2x4x4x64xf32, #tpu.memory_space<vmem>>, vector<2x4x1x4xf32>
    %250 = vector.shape_cast %249 : vector<2x4x1x4xf32> to vector<2x4x4xf32>
    %251 = vector.shape_cast %248 : vector<2x4x4xf32> to vector<2x4x1x4xf32>
    tpu.vector_store %arg3[%c0_273, %c0_274, %c3_275, %c52_276], %251 {strides = array<i32>} : memref<2x4x4x64xf32, #tpu.memory_space<vmem>>, vector<2x4x1x4xf32>,
    %c0_277 = arith.constant 0 : index
    %c3_278 = arith.constant 3 : index
    %c0_279 = arith.constant 0 : index
    %c2_280 = arith.constant 2 : index
    %c0_281 = arith.constant 0 : index
    %252 = vector.load %arg2[%c0_277, %c3_278, %c0_279, %c2_280, %c0_281] : memref<2x4x4x4x16xf32, #tpu.memory_space<vmem>>, vector<2x1x4x1x16xf32>
    %253 = vector.shape_cast %252 : vector<2x1x4x1x16xf32> to vector<2x4x16xf32>
    %254 = vector.extract_strided_slice %253 {offsets = [0, 0, 0], sizes = [2, 4, 4], strides = [1, 1, 1]} : vector<2x4x16xf32> to vector<2x4x4xf32>
    %c0_282 = arith.constant 0 : index
    %c0_283 = arith.constant 0 : index
    %c0_284 = arith.constant 0 : index
    %c56 = arith.constant 56 : index
    %255 = vector.load %arg3[%c0_282, %c0_283, %c0_284, %c56] : memref<2x4x4x64xf32, #tpu.memory_space<vmem>>, vector<2x4x1x4xf32>
    %256 = vector.shape_cast %255 : vector<2x4x1x4xf32> to vector<2x4x4xf32>
    %257 = vector.shape_cast %254 : vector<2x4x4xf32> to vector<2x4x1x4xf32>
    tpu.vector_store %arg3[%c0_282, %c0_283, %c0_284, %c56], %257 {strides = array<i32>} : memref<2x4x4x64xf32, #tpu.memory_space<vmem>>, vector<2x4x1x4xf32>,
    %258 = vector.extract_strided_slice %253 {offsets = [0, 0, 4], sizes = [2, 4, 4], strides = [1, 1, 1]} : vector<2x4x16xf32> to vector<2x4x4xf32>
    %c0_285 = arith.constant 0 : index
    %c0_286 = arith.constant 0 : index
    %c1_287 = arith.constant 1 : index
    %c56_288 = arith.constant 56 : index
    %259 = vector.load %arg3[%c0_285, %c0_286, %c1_287, %c56_288] : memref<2x4x4x64xf32, #tpu.memory_space<vmem>>, vector<2x4x1x4xf32>
    %260 = vector.shape_cast %259 : vector<2x4x1x4xf32> to vector<2x4x4xf32>
    %261 = vector.shape_cast %258 : vector<2x4x4xf32> to vector<2x4x1x4xf32>
    tpu.vector_store %arg3[%c0_285, %c0_286, %c1_287, %c56_288], %261 {strides = array<i32>} : memref<2x4x4x64xf32, #tpu.memory_space<vmem>>, vector<2x4x1x4xf32>,
    %262 = vector.extract_strided_slice %253 {offsets = [0, 0, 8], sizes = [2, 4, 4], strides = [1, 1, 1]} : vector<2x4x16xf32> to vector<2x4x4xf32>
    %c0_289 = arith.constant 0 : index
    %c0_290 = arith.constant 0 : index
    %c2_291 = arith.constant 2 : index
    %c56_292 = arith.constant 56 : index
    %263 = vector.load %arg3[%c0_289, %c0_290, %c2_291, %c56_292] : memref<2x4x4x64xf32, #tpu.memory_space<vmem>>, vector<2x4x1x4xf32>
    %264 = vector.shape_cast %263 : vector<2x4x1x4xf32> to vector<2x4x4xf32>
    %265 = vector.shape_cast %262 : vector<2x4x4xf32> to vector<2x4x1x4xf32>
    tpu.vector_store %arg3[%c0_289, %c0_290, %c2_291, %c56_292], %265 {strides = array<i32>} : memref<2x4x4x64xf32, #tpu.memory_space<vmem>>, vector<2x4x1x4xf32>,
    %266 = vector.extract_strided_slice %253 {offsets = [0, 0, 12], sizes = [2, 4, 4], strides = [1, 1, 1]} : vector<2x4x16xf32> to vector<2x4x4xf32>
    %c0_293 = arith.constant 0 : index
    %c0_294 = arith.constant 0 : index
    %c3_295 = arith.constant 3 : index
    %c56_296 = arith.constant 56 : index
    %267 = vector.load %arg3[%c0_293, %c0_294, %c3_295, %c56_296] : memref<2x4x4x64xf32, #tpu.memory_space<vmem>>, vector<2x4x1x4xf32>
    %268 = vector.shape_cast %267 : vector<2x4x1x4xf32> to vector<2x4x4xf32>
    %269 = vector.shape_cast %266 : vector<2x4x4xf32> to vector<2x4x1x4xf32>
    tpu.vector_store %arg3[%c0_293, %c0_294, %c3_295, %c56_296], %269 {strides = array<i32>} : memref<2x4x4x64xf32, #tpu.memory_space<vmem>>, vector<2x4x1x4xf32>,
    %c0_297 = arith.constant 0 : index
    %c3_298 = arith.constant 3 : index
    %c0_299 = arith.constant 0 : index
    %c3_300 = arith.constant 3 : index
    %c0_301 = arith.constant 0 : index
    %270 = vector.load %arg2[%c0_297, %c3_298, %c0_299, %c3_300, %c0_301] : memref<2x4x4x4x16xf32, #tpu.memory_space<vmem>>, vector<2x1x4x1x16xf32>
    %271 = vector.shape_cast %270 : vector<2x1x4x1x16xf32> to vector<2x4x16xf32>
    %272 = vector.extract_strided_slice %271 {offsets = [0, 0, 0], sizes = [2, 4, 4], strides = [1, 1, 1]} : vector<2x4x16xf32> to vector<2x4x4xf32>
    %c0_302 = arith.constant 0 : index
    %c0_303 = arith.constant 0 : index
    %c0_304 = arith.constant 0 : index
    %c60 = arith.constant 60 : index
    %273 = vector.load %arg3[%c0_302, %c0_303, %c0_304, %c60] : memref<2x4x4x64xf32, #tpu.memory_space<vmem>>, vector<2x4x1x4xf32>
    %274 = vector.shape_cast %273 : vector<2x4x1x4xf32> to vector<2x4x4xf32>
    %275 = vector.shape_cast %272 : vector<2x4x4xf32> to vector<2x4x1x4xf32>
    tpu.vector_store %arg3[%c0_302, %c0_303, %c0_304, %c60], %275 {strides = array<i32>} : memref<2x4x4x64xf32, #tpu.memory_space<vmem>>, vector<2x4x1x4xf32>,
    %276 = vector.extract_strided_slice %271 {offsets = [0, 0, 4], sizes = [2, 4, 4], strides = [1, 1, 1]} : vector<2x4x16xf32> to vector<2x4x4xf32>
    %c0_305 = arith.constant 0 : index
    %c0_306 = arith.constant 0 : index
    %c1_307 = arith.constant 1 : index
    %c60_308 = arith.constant 60 : index
    %277 = vector.load %arg3[%c0_305, %c0_306, %c1_307, %c60_308] : memref<2x4x4x64xf32, #tpu.memory_space<vmem>>, vector<2x4x1x4xf32>
    %278 = vector.shape_cast %277 : vector<2x4x1x4xf32> to vector<2x4x4xf32>
    %279 = vector.shape_cast %276 : vector<2x4x4xf32> to vector<2x4x1x4xf32>
    tpu.vector_store %arg3[%c0_305, %c0_306, %c1_307, %c60_308], %279 {strides = array<i32>} : memref<2x4x4x64xf32, #tpu.memory_space<vmem>>, vector<2x4x1x4xf32>,
    %280 = vector.extract_strided_slice %271 {offsets = [0, 0, 8], sizes = [2, 4, 4], strides = [1, 1, 1]} : vector<2x4x16xf32> to vector<2x4x4xf32>
    %c0_309 = arith.constant 0 : index
    %c0_310 = arith.constant 0 : index
    %c2_311 = arith.constant 2 : index
    %c60_312 = arith.constant 60 : index
    %281 = vector.load %arg3[%c0_309, %c0_310, %c2_311, %c60_312] : memref<2x4x4x64xf32, #tpu.memory_space<vmem>>, vector<2x4x1x4xf32>
    %282 = vector.shape_cast %281 : vector<2x4x1x4xf32> to vector<2x4x4xf32>
    %283 = vector.shape_cast %280 : vector<2x4x4xf32> to vector<2x4x1x4xf32>
    tpu.vector_store %arg3[%c0_309, %c0_310, %c2_311, %c60_312], %283 {strides = array<i32>} : memref<2x4x4x64xf32, #tpu.memory_space<vmem>>, vector<2x4x1x4xf32>,
    %284 = vector.extract_strided_slice %271 {offsets = [0, 0, 12], sizes = [2, 4, 4], strides = [1, 1, 1]} : vector<2x4x16xf32> to vector<2x4x4xf32>
    %c0_313 = arith.constant 0 : index
    %c0_314 = arith.constant 0 : index
    %c3_315 = arith.constant 3 : index
    %c60_316 = arith.constant 60 : index
    %285 = vector.load %arg3[%c0_313, %c0_314, %c3_315, %c60_316] : memref<2x4x4x64xf32, #tpu.memory_space<vmem>>, vector<2x4x1x4xf32>
    %286 = vector.shape_cast %285 : vector<2x4x1x4xf32> to vector<2x4x4xf32>
    %287 = vector.shape_cast %284 : vector<2x4x4xf32> to vector<2x4x1x4xf32>
    tpu.vector_store %arg3[%c0_313, %c0_314, %c3_315, %c60_316], %287 {strides = array<i32>} : memref<2x4x4x64xf32, #tpu.memory_space<vmem>>, vector<2x4x1x4xf32>,
    return
  }
  func.func @transform_0(%arg0: i32, %arg1: i32) -> (i32, i32, i32, i32, i32) {
    %c0_i32 = arith.constant 0 : i32
    %c0_i32_0 = arith.constant 0 : i32
    %c0_i32_1 = arith.constant 0 : i32
    %c0_i32_2 = arith.constant 0 : i32
    return %arg0, %c0_i32, %arg1, %c0_i32_0, %c0_i32_1 : i32, i32, i32, i32, i32
  }
  func.func @transform_1(%arg0: i32, %arg1: i32) -> (i32, i32, i32, i32) {
    %c0_i32 = arith.constant 0 : i32
    %c0_i32_0 = arith.constant 0 : i32
    %c0_i32_1 = arith.constant 0 : i32
    return %arg0, %arg1, %c0_i32, %c0_i32_0 : i32, i32, i32, i32
  }
}

</mosaic_0001>

<bundles_post_ra>
// kernel: tpu_custom_call.1
= control target key start
LH: loop header
LB: loop body
LE: loop exit
PB: predicated region body
PF: predicated region fallthrough
CT: control target
= control target key end

     0   :  { %6 = vsyncpa [#allocation3], 0  ;;  %s4075_s0 = inlined_call_operand.hbm [shape: f32[2,4,4,4,16], index: 0, kind: input, shape index: {}]   ;;  %s4076_s1 = inlined_call_operand.hbm [shape: f32[2,4,4,64], index: 1, kind: output, shape index: {}]  }
   0x1   :  { %7 = vsyncpa [#allocation4], 0  ;;  %s2336_s6 = smov [#allocation2]   ;;  %s2288_s10 = scalar_lea.hbm %s4075_s0, 2048 }
   0x2   :  { %s13_s7 = sshll.u32 %s2336_s6, 4  ;;  %p2289_p0 = scmp.ne.s32.totalorder %s4075_s0, %s2288_s10  ;;  %s14_s7 = int_to_ptr.vmem [resolvable:$true] %s13_s7 }
   0x3   :  { %p2292_p1 = scmp.lt.u32.totalorder %s2288_s10, %s4075_s0 }
   0x5   :  { %p2294_p2 = pnand %p2292_p1, %p2289_p0 }
   0x7   :  { %2297 = shalt.err (!%p2294_p2)
}
   0x8   :  { %s2298_s15 = scalar_lea.vmem %s14_s7, 2048  ;;  %p2303_p4 = scmp.lt.s32.totalorder %s14_s7, %s14_s7 }
   0x9   :  { %p2299_p3 = scmp.ne.s32.totalorder %s14_s7, %s2298_s15  ;;  %p2304_p5 = scmp.lt.s32.totalorder %s2298_s15, %s2298_s15 }
   0xb   :  { %p2305_p6 = por %p2304_p5, %p2303_p4 }
   0xd   :  { %p2306_p7 = pnand %p2305_p6, %p2299_p3 }
   0xf   :  { %2309 = shalt.err (!%p2306_p7)
}
  0x10   :  { %s2337_s16 = smov 64   ;;  %s2338_s17 = smov 4  }
  0x11   :  { %19 = dma.hbm_to_vmem [thread:$0]  %s4075_s0, 2048, %s14_s7, [#allocation3], %s2337_s16, %s2337_s16, %s2338_s17  }
  0x12   :  { %2332 = dma.done.wait [#allocation3], 2048  }
  0x13   :  { %2333 = vsyncadd [#allocation3], 4294965248  ;;  %vm31_vm0 = vcmask 24576   ;;  %v25_v0 = vld [vmem:[#allocation2 + $0x8] sm:$0x1]  ;;  %s2339_s20 = smov 124  }
  0x14   :  { %v23_v1 = vld [vmem:[#allocation2] sm:$0x1]  ;;  %v26_v2 = vld [vmem:[#allocation2 + $0xc] sm:$0x1]  ;;  %52 = vrot.lane.b32.xlu1 %v25_v0, %s2339_s20  ;;  %v24_v3 = vld [vmem:[#allocation2 + $0x4] sm:$0x1] }
  0x15   :  { %48 = vrot.lane.b32.xlu0 %v23_v1, %s2339_s20  ;;  %v28_v4 = vld [vmem:[#allocation2 + $0x44] sm:$0x1]  ;;  %v27_v5 = vld [vmem:[#allocation2 + $0x40] sm:$0x1]  ;;  %32 = vst.msk [vmem:[#allocation5] sm:$0x1] %vm31_vm0, %v23_v1 }
  0x16   :  { %34 = vst.msk [vmem:[#allocation5 + $0x8] sm:$0x1] %vm31_vm0, %v25_v0  ;;  %35 = vst.msk [vmem:[#allocation5 + $0xc] sm:$0x1] %vm31_vm0, %v26_v2  ;;  %v30_v6 = vld [vmem:[#allocation2 + $0x4c] sm:$0x1] }
  0x17   :  { %v29_v7 = vld [vmem:[#allocation2 + $0x48] sm:$0x1]  ;;  %33 = vst.msk [vmem:[#allocation5 + $0x4] sm:$0x1] %vm31_vm0, %v24_v3  ;;  %36 = vst.msk [vmem:[#allocation5 + $0x10] sm:$0x1] %vm31_vm0, %v27_v5 }
  0x18   :  { %37 = vst.msk [vmem:[#allocation5 + $0x14] sm:$0x1] %vm31_vm0, %v28_v4  ;;  %38 = vst.msk [vmem:[#allocation5 + $0x18] sm:$0x1] %vm31_vm0, %v29_v7  ;;  %54 = vrot.lane.b32.xlu1 %v26_v2, %s2339_s20  ;;  %s2340_s0 = smov 120   ;;  %s2341_s21 = smov 116  }
  0x19   :  { %39 = vst.msk [vmem:[#allocation5 + $0x1c] sm:$0x1] %vm31_vm0, %v30_v6  ;;  %50 = vrot.lane.b32.xlu0 %v24_v3, %s2339_s20  ;;  %v2406_v8 = vld [vmem:[#allocation2 + $0x5] sm:$0x1]  ;;  %v144_v9 = vld [vmem:[#allocation2 + $0x1] sm:$0x1] }
  0x1a   :  { %v147_v10 = vld [vmem:[#allocation2 + $0xd] sm:$0x1]  ;;  %v146_v11 = vld [vmem:[#allocation2 + $0x9] sm:$0x1]  ;;  %v2413_v12 = vld [vmem:[#allocation2 + $0x45] sm:$0x1] }
  0x1b   :  { %v2415_v13 = vld [vmem:[#allocation2 + $0x41] sm:$0x1]  ;;  %v2421_v14 = vld [vmem:[#allocation2 + $0x4d] sm:$0x1]  ;;  %v2423_v15 = vld [vmem:[#allocation2 + $0x49] sm:$0x1] }
  0x1c   :  { %58 = vrot.lane.b32.xlu1 %v28_v4, %s2339_s20  ;;  %v2455_v16 = vld [vmem:[#allocation2 + $0x6] sm:$0x1]  ;;  %v2457_v17 = vld [vmem:[#allocation2 + $0x2] sm:$0x1]  ;;  %s2342_s22 = smov 8   ;;  %vm184_vm1 = vcmask 57376  }
  0x1d   :  { %56 = vrot.lane.b32.xlu0 %v27_v5, %s2339_s20  ;;  %v2463_v18 = vld [vmem:[#allocation2 + $0xe] sm:$0x1]  ;;  %v2465_v19 = vld [vmem:[#allocation2 + $0xa] sm:$0x1]  ;;  %v2471_v20 = vld [vmem:[#allocation2 + $0x46] sm:$0x1] }
  0x1e   :  { %v2473_v21 = vld [vmem:[#allocation2 + $0x42] sm:$0x1]  ;;  %v2479_v22 = vld [vmem:[#allocation2 + $0x4e] sm:$0x1]  ;;  %v2481_v23 = vld [vmem:[#allocation2 + $0x4a] sm:$0x1] }
  0x1f   :  { %v2546_v38 = vld [vmem:[#allocation2 + $0x7] sm:$0x1]  ;;  %v2548_v39 = vld [vmem:[#allocation2 + $0x3] sm:$0x1]  ;;  %s2343_s23 = smov 12   ;;  %vm305_vm2 = vcmask 90176  }
  0x20   :  { %62 = vrot.lane.b32.xlu1 %v30_v6, %s2339_s20  ;;  %v2556_v42 = vld [vmem:[#allocation2 + $0xf] sm:$0x1]  ;;  %v2558_v43 = vld [vmem:[#allocation2 + $0xb] sm:$0x1]  ;;  %v2566_v46 = vld [vmem:[#allocation2 + $0x47] sm:$0x1] }
  0x21   :  { %60 = vrot.lane.b32.xlu0 %v29_v7, %s2339_s20  ;;  %v2568_v47 = vld [vmem:[#allocation2 + $0x43] sm:$0x1]  ;;  %v2576_v50 = vld [vmem:[#allocation2 + $0x4f] sm:$0x1]  ;;  %v2578_v51 = vld [vmem:[#allocation2 + $0x4b] sm:$0x1] }
  0x22   :  { %s2344_s24 = smov 16   ;;  %vm426_vm3 = vcmask 122976   ;;  %s2345_s25 = smov 20   ;;  %vm548_vm4 = vcmask 155776   ;;  %vm693_vm5 = vcmask 188576   ;;  %vm838_vm6 = vcmask 221376  }
  0x23   :  { %s2346_s26 = smov 24   ;;  %s2347_s27 = smov 28   ;;  %vm983_vm7 = vcmask 254176   ;;  %vm1129_vm8 = vcmask 286976   ;;  %vm1274_vm9 = vcmask 319776   ;;  %vm1419_vm10 = vcmask 352576  }
  0x24   :  { %82 = vrot.lane.b32.xlu1 %v24_v3, %s2340_s0  ;;  %s2348_s28 = smov 32   ;;  %s2349_s29 = smov 36   ;;  %vm1564_vm11 = vcmask 385376   ;;  %vm1710_vm12 = vcmask 418176   ;;  %vm1855_vm13 = vcmask 450976   ;;  %vm2000_vm14 = vcmask 483776  }
  0x25   :  { %80 = vrot.lane.b32.xlu0 %v23_v1, %s2340_s0  ;;  %s2350_s30 = smov 40   ;;  %s2351_s2 = smov 44   ;;  %vm2145_vm15 = vcmask 516576  }
  0x26   :  { %s2352_s3 = smov 48   ;;  %s2353_s4 = smov 52  }
  0x27   :  { %s2354_s5 = smov 56   ;;  %s2355_s6 = smov 60  }
  0x28   :  { %86 = vrot.lane.b32.xlu1 %v26_v2, %s2340_s0  ;;  %s2356_s7 = smov [#allocation5]  }
  0x29   :  { %84 = vrot.lane.b32.xlu0 %v25_v0, %s2340_s0  ;;  %s2255_s8 = sshll.u32 %s2356_s7, 4  ;;  %s2256_s8 = int_to_ptr.vmem [resolvable:$true] %s2255_s8 }
  0x2a   :  { %s2310_s9 = scalar_lea.vmem %s2256_s8, 512  ;;  %p2315_p9 = scmp.lt.s32.totalorder %s2256_s8, %s2256_s8 }
  0x2b   :  { %p2311_p8 = scmp.ne.s32.totalorder %s2256_s8, %s2310_s9  ;;  %p2316_p10 = scmp.lt.s32.totalorder %s2310_s9, %s2310_s9 }
  0x2c   :  { %90 = vrot.lane.b32.xlu1 %v28_v4, %s2340_s0 }
  0x2d   :  { %88 = vrot.lane.b32.xlu0 %v27_v5, %s2340_s0  ;;  %p2317_p11 = por %p2316_p10, %p2315_p9 }
  0x2f   :  { %p2318_p12 = pnand %p2317_p11, %p2311_p8 }
  0x30   :  { %94 = vrot.lane.b32.xlu1 %v30_v6, %s2340_s0 }
  0x31   :  { %92 = vrot.lane.b32.xlu0 %v29_v7, %s2340_s0 }
  0x34   :  { %114 = vrot.lane.b32.xlu1 %v24_v3, %s2341_s21 }
  0x35   :  { %112 = vrot.lane.b32.xlu0 %v23_v1, %s2341_s21 }
  0x38   :  { %118 = vrot.lane.b32.xlu1 %v26_v2, %s2341_s21 }
  0x39   :  { %116 = vrot.lane.b32.xlu0 %v25_v0, %s2341_s21 }
  0x3c   :  { %122 = vrot.lane.b32.xlu1 %v28_v4, %s2341_s21 }
  0x3d   :  { %120 = vrot.lane.b32.xlu0 %v27_v5, %s2341_s21 }
  0x40   :  { %126 = vrot.lane.b32.xlu1 %v30_v6, %s2341_s21  ;;  %v2646_v6 = vld [vmem:[#allocation2 + $0x14] sm:$0x1] }
  0x41   :  { %124 = vrot.lane.b32.xlu0 %v29_v7, %s2341_s21  ;;  %v2648_v7 = vld [vmem:[#allocation2 + $0x10] sm:$0x1] }
  0x44   :  { %162 = vrot.lane.b32.xlu1 %v2406_v8, %s2338_s17 }
  0x45   :  { %160 = vrot.lane.b32.xlu0 %v144_v9, %s2338_s17 }
  0x48   :  { %166 = vrot.lane.b32.xlu1 %v147_v10, %s2338_s17 }
  0x49   :  { %164 = vrot.lane.b32.xlu0 %v146_v11, %s2338_s17 }
  0x4c   :  { %170 = vrot.lane.b32.xlu1 %v2413_v12, %s2338_s17 }
  0x4d   :  { %168 = vrot.lane.b32.xlu0 %v2415_v13, %s2338_s17 }
  0x50   :  { %174 = vrot.lane.b32.xlu1 %v2421_v14, %s2338_s17 }
  0x51   :  { %172 = vrot.lane.b32.xlu0 %v2423_v15, %s2338_s17 }
  0x54   :  { %203 = vrot.lane.b32.xlu1 %v2406_v8, %s2339_s20 }
  0x55   :  { %201 = vrot.lane.b32.xlu0 %v144_v9, %s2339_s20 }
  0x58   :  { %207 = vrot.lane.b32.xlu1 %v147_v10, %s2339_s20 }
  0x59   :  { %205 = vrot.lane.b32.xlu0 %v146_v11, %s2339_s20 }
  0x5c   :  { %211 = vrot.lane.b32.xlu1 %v2413_v12, %s2339_s20 }
  0x5d   :  { %209 = vrot.lane.b32.xlu0 %v2415_v13, %s2339_s20 }
  0x60   :  { %215 = vrot.lane.b32.xlu1 %v2421_v14, %s2339_s20 }
  0x61   :  { %213 = vrot.lane.b32.xlu0 %v2423_v15, %s2339_s20 }
  0x64   :  { %235 = vrot.lane.b32.xlu1 %v2406_v8, %s2340_s0 }
  0x65   :  { %233 = vrot.lane.b32.xlu0 %v144_v9, %s2340_s0 }
  0x68   :  { %239 = vrot.lane.b32.xlu1 %v147_v10, %s2340_s0 }
  0x69   :  { %237 = vrot.lane.b32.xlu0 %v146_v11, %s2340_s0 }
  0x6c   :  { %243 = vrot.lane.b32.xlu1 %v2413_v12, %s2340_s0 }
  0x6d   :  { %241 = vrot.lane.b32.xlu0 %v2415_v13, %s2340_s0 }
  0x70   :  { %247 = vrot.lane.b32.xlu1 %v2421_v14, %s2340_s0 }
  0x71   :  { %245 = vrot.lane.b32.xlu0 %v2423_v15, %s2340_s0 }
  0x74   :  { %283 = vrot.lane.b32.xlu1 %v2455_v16, %s2342_s22 }
  0x75   :  { %281 = vrot.lane.b32.xlu0 %v2457_v17, %s2342_s22 }
  0x78   :  { %287 = vrot.lane.b32.xlu1 %v2463_v18, %s2342_s22 }
  0x79   :  { %285 = vrot.lane.b32.xlu0 %v2465_v19, %s2342_s22 }
  0x7c   :  { %291 = vrot.lane.b32.xlu1 %v2471_v20, %s2342_s22 }
  0x7d   :  { %289 = vrot.lane.b32.xlu0 %v2473_v21, %s2342_s22 }
  0x80   :  { %295 = vrot.lane.b32.xlu1 %v2479_v22, %s2342_s22 }
  0x81   :  { %293 = vrot.lane.b32.xlu0 %v2481_v23, %s2342_s22 }
  0x84   :  { %316 = vrot.lane.b32.xlu1 %v2455_v16, %s2338_s17 }
  0x85   :  { %314 = vrot.lane.b32.xlu0 %v2457_v17, %s2338_s17 }
  0x86   :  { %v53_v24 = vpop.permute.xlu1 %52 }
  0x87   :  { %v49_v25 = vpop.permute.xlu0 %48  ;;  %74 = vst.msk [vmem:[#allocation5 + $0x9] sm:$0x1] %vm31_vm0, %v53_v24 }
  0x88   :  { %72 = vst.msk [vmem:[#allocation5 + $0x1] sm:$0x1] %vm31_vm0, %v49_v25  ;;  %320 = vrot.lane.b32.xlu1 %v2463_v18, %s2338_s17 }
  0x89   :  { %195 = vst.msk [vmem:[#allocation5 + $0x9] sm:$0x1] %vm184_vm1, %v146_v11  ;;  %193 = vst.msk [vmem:[#allocation5 + $0x1] sm:$0x1] %vm184_vm1, %v144_v9  ;;  %318 = vrot.lane.b32.xlu0 %v2465_v19, %s2338_s17  ;;  %v2662_v11 = vld [vmem:[#allocation2 + $0x18] sm:$0x1] }
  0x8a   :  { %v55_v26 = vpop.permute.xlu1 %54 }
  0x8b   :  { %v51_v27 = vpop.permute.xlu0 %50  ;;  %75 = vst.msk [vmem:[#allocation5 + $0xd] sm:$0x1] %vm31_vm0, %v55_v26 }
  0x8c   :  { %73 = vst.msk [vmem:[#allocation5 + $0x5] sm:$0x1] %vm31_vm0, %v51_v27  ;;  %324 = vrot.lane.b32.xlu1 %v2471_v20, %s2338_s17 }
  0x8d   :  { %196 = vst.msk [vmem:[#allocation5 + $0xd] sm:$0x1] %vm184_vm1, %v147_v10  ;;  %194 = vst.msk [vmem:[#allocation5 + $0x5] sm:$0x1] %vm184_vm1, %v2406_v8  ;;  %322 = vrot.lane.b32.xlu0 %v2473_v21, %s2338_s17  ;;  %v2660_v10 = vld [vmem:[#allocation2 + $0x1c] sm:$0x1] }
  0x8e   :  { %v59_v28 = vpop.permute.xlu1 %58 }
  0x8f   :  { %v57_v29 = vpop.permute.xlu0 %56  ;;  %77 = vst.msk [vmem:[#allocation5 + $0x15] sm:$0x1] %vm31_vm0, %v59_v28 }
  0x90   :  { %76 = vst.msk [vmem:[#allocation5 + $0x11] sm:$0x1] %vm31_vm0, %v57_v29  ;;  %328 = vrot.lane.b32.xlu1 %v2479_v22, %s2338_s17 }
  0x91   :  { %198 = vst.msk [vmem:[#allocation5 + $0x15] sm:$0x1] %vm184_vm1, %v2413_v12  ;;  %197 = vst.msk [vmem:[#allocation5 + $0x11] sm:$0x1] %vm184_vm1, %v2415_v13  ;;  %326 = vrot.lane.b32.xlu0 %v2481_v23, %s2338_s17 }
  0x92   :  { %v63_v30 = vpop.permute.xlu1 %62 }
  0x93   :  { %v61_v31 = vpop.permute.xlu0 %60  ;;  %79 = vst.msk [vmem:[#allocation5 + $0x1d] sm:$0x1] %vm31_vm0, %v63_v30 }
  0x94   :  { %78 = vst.msk [vmem:[#allocation5 + $0x19] sm:$0x1] %vm31_vm0, %v61_v31  ;;  %356 = vrot.lane.b32.xlu1 %v2455_v16, %s2339_s20 }
  0x95   :  { %200 = vst.msk [vmem:[#allocation5 + $0x1d] sm:$0x1] %vm184_vm1, %v2421_v14  ;;  %199 = vst.msk [vmem:[#allocation5 + $0x19] sm:$0x1] %vm184_vm1, %v2423_v15  ;;  %354 = vrot.lane.b32.xlu0 %v2457_v17, %s2339_s20  ;;  %v2670_v14 = vld [vmem:[#allocation2 + $0x54] sm:$0x1] }
  0x96   :  { %v83_v32 = vpop.permute.xlu1 %82  ;;  %v2672_v15 = vld [vmem:[#allocation2 + $0x50] sm:$0x1] }
  0x97   :  { %v81_v33 = vpop.permute.xlu0 %80  ;;  %105 = vst.msk [vmem:[#allocation5 + $0x6] sm:$0x1] %vm31_vm0, %v83_v32 }
  0x98   :  { %104 = vst.msk [vmem:[#allocation5 + $0x2] sm:$0x1] %vm31_vm0, %v81_v33  ;;  %360 = vrot.lane.b32.xlu1 %v2463_v18, %s2339_s20 }
  0x99   :  { %358 = vrot.lane.b32.xlu0 %v2465_v19, %s2339_s20 }
  0x9a   :  { %v87_v34 = vpop.permute.xlu1 %86 }
  0x9b   :  { %v85_v35 = vpop.permute.xlu0 %84  ;;  %107 = vst.msk [vmem:[#allocation5 + $0xe] sm:$0x1] %vm31_vm0, %v87_v34 }
  0x9c   :  { %106 = vst.msk [vmem:[#allocation5 + $0xa] sm:$0x1] %vm31_vm0, %v85_v35  ;;  %364 = vrot.lane.b32.xlu1 %v2471_v20, %s2339_s20 }
  0x9d   :  { %362 = vrot.lane.b32.xlu0 %v2473_v21, %s2339_s20 }
  0x9e   :  { %v91_v36 = vpop.permute.xlu1 %90 }
  0x9f   :  { %v89_v37 = vpop.permute.xlu0 %88  ;;  %109 = vst.msk [vmem:[#allocation5 + $0x16] sm:$0x1] %vm31_vm0, %v91_v36 }
  0xa0   :  { %108 = vst.msk [vmem:[#allocation5 + $0x12] sm:$0x1] %vm31_vm0, %v89_v37  ;;  %368 = vrot.lane.b32.xlu1 %v2479_v22, %s2339_s20 }
  0xa1   :  { %366 = vrot.lane.b32.xlu0 %v2481_v23, %s2339_s20 }
  0xa2   :  { %v95_v40 = vpop.permute.xlu1 %94 }
  0xa3   :  { %v93_v41 = vpop.permute.xlu0 %92  ;;  %111 = vst.msk [vmem:[#allocation5 + $0x1e] sm:$0x1] %vm31_vm0, %v95_v40 }
  0xa4   :  { %110 = vst.msk [vmem:[#allocation5 + $0x1a] sm:$0x1] %vm31_vm0, %v93_v41  ;;  %404 = vrot.lane.b32.xlu1 %v2546_v38, %s2343_s23 }
  0xa5   :  { %402 = vrot.lane.b32.xlu0 %v2548_v39, %s2343_s23 }
  0xa6   :  { %v115_v44 = vpop.permute.xlu1 %114 }
  0xa7   :  { %v113_v45 = vpop.permute.xlu0 %112  ;;  %137 = vst.msk [vmem:[#allocation5 + $0x7] sm:$0x1] %vm31_vm0, %v115_v44 }
  0xa8   :  { %136 = vst.msk [vmem:[#allocation5 + $0x3] sm:$0x1] %vm31_vm0, %v113_v45  ;;  %408 = vrot.lane.b32.xlu1 %v2556_v42, %s2343_s23 }
  0xa9   :  { %406 = vrot.lane.b32.xlu0 %v2558_v43, %s2343_s23 }
  0xaa   :  { %v119_v48 = vpop.permute.xlu1 %118 }
  0xab   :  { %v117_v49 = vpop.permute.xlu0 %116  ;;  %139 = vst.msk [vmem:[#allocation5 + $0xf] sm:$0x1] %vm31_vm0, %v119_v48 }
  0xac   :  { %138 = vst.msk [vmem:[#allocation5 + $0xb] sm:$0x1] %vm31_vm0, %v117_v49  ;;  %412 = vrot.lane.b32.xlu1 %v2566_v46, %s2343_s23 }
  0xad   :  { %410 = vrot.lane.b32.xlu0 %v2568_v47, %s2343_s23 }
  0xae   :  { %v123_v52 = vpop.permute.xlu1 %122 }
  0xaf   :  { %v121_v53 = vpop.permute.xlu0 %120  ;;  %141 = vst.msk [vmem:[#allocation5 + $0x17] sm:$0x1] %vm31_vm0, %v123_v52 }
  0xb0   :  { %140 = vst.msk [vmem:[#allocation5 + $0x13] sm:$0x1] %vm31_vm0, %v121_v53  ;;  %416 = vrot.lane.b32.xlu1 %v2576_v50, %s2343_s23 }
  0xb1   :  { %414 = vrot.lane.b32.xlu0 %v2578_v51, %s2343_s23 }
  0xb2   :  { %v127_v54 = vpop.permute.xlu1 %126 }
  0xb3   :  { %v125_v55 = vpop.permute.xlu0 %124  ;;  %143 = vst.msk [vmem:[#allocation5 + $0x1f] sm:$0x1] %vm31_vm0, %v127_v54 }
  0xb4   :  { %142 = vst.msk [vmem:[#allocation5 + $0x1b] sm:$0x1] %vm31_vm0, %v125_v55  ;;  %437 = vrot.lane.b32.xlu1 %v2546_v38, %s2342_s22 }
  0xb5   :  { %435 = vrot.lane.b32.xlu0 %v2548_v39, %s2342_s22 }
  0xb6   :  { %v163_v56 = vpop.permute.xlu1 %162 }
  0xb7   :  { %v161_v57 = vpop.permute.xlu0 %160  ;;  %186 = vst.msk [vmem:[#allocation5 + $0x4] sm:$0x1] %vm184_vm1, %v163_v56  ;;  %v2800_v56 = vld [vmem:[#allocation2 + $0x51] sm:$0x1] }
  0xb8   :  { %185 = vst.msk [vmem:[#allocation5] sm:$0x1] %vm184_vm1, %v161_v57  ;;  %441 = vrot.lane.b32.xlu1 %v2556_v42, %s2342_s22 }
  0xb9   :  { %439 = vrot.lane.b32.xlu0 %v2558_v43, %s2342_s22 }
  0xba   :  { %v167_v58 = vpop.permute.xlu1 %166 }
  0xbb   :  { %v165_v59 = vpop.permute.xlu0 %164  ;;  %188 = vst.msk [vmem:[#allocation5 + $0xc] sm:$0x1] %vm184_vm1, %v167_v58  ;;  %v2808_v58 = vld [vmem:[#allocation2 + $0x5d] sm:$0x1] }
  0xbc   :  { %187 = vst.msk [vmem:[#allocation5 + $0x8] sm:$0x1] %vm184_vm1, %v165_v59  ;;  %445 = vrot.lane.b32.xlu1 %v2566_v46, %s2342_s22  ;;  %v2810_v59 = vld [vmem:[#allocation2 + $0x59] sm:$0x1] }
  0xbd   :  { %443 = vrot.lane.b32.xlu0 %v2568_v47, %s2342_s22 }
  0xbe   :  { %v171_v60 = vpop.permute.xlu1 %170 }
  0xbf   :  { %v169_v61 = vpop.permute.xlu0 %168  ;;  %190 = vst.msk [vmem:[#allocation5 + $0x14] sm:$0x1] %vm184_vm1, %v171_v60 }
  0xc0   :  { %189 = vst.msk [vmem:[#allocation5 + $0x10] sm:$0x1] %vm184_vm1, %v169_v61  ;;  %449 = vrot.lane.b32.xlu1 %v2576_v50, %s2342_s22 }
  0xc1   :  { %447 = vrot.lane.b32.xlu0 %v2578_v51, %s2342_s22 }
  0xc2   :  { %v175_v62 = vpop.permute.xlu1 %174 }
  0xc3   :  { %v173_v63 = vpop.permute.xlu0 %172  ;;  %192 = vst.msk [vmem:[#allocation5 + $0x1c] sm:$0x1] %vm184_vm1, %v175_v62 }
  0xc4   :  { %191 = vst.msk [vmem:[#allocation5 + $0x18] sm:$0x1] %vm184_vm1, %v173_v63  ;;  %469 = vrot.lane.b32.xlu1 %v2546_v38, %s2338_s17 }
  0xc5   :  { %467 = vrot.lane.b32.xlu0 %v2548_v39, %s2338_s17 }
  0xc6   :  { %v204_v0 = vpop.permute.xlu1 %203 }
  0xc7   :  { %v202_v1 = vpop.permute.xlu0 %201  ;;  %226 = vst.msk [vmem:[#allocation5 + $0x6] sm:$0x1] %vm184_vm1, %v204_v0 }
  0xc8   :  { %225 = vst.msk [vmem:[#allocation5 + $0x2] sm:$0x1] %vm184_vm1, %v202_v1  ;;  %473 = vrot.lane.b32.xlu1 %v2556_v42, %s2338_s17 }
  0xc9   :  { %471 = vrot.lane.b32.xlu0 %v2558_v43, %s2338_s17  ;;  %346 = vst.msk [vmem:[#allocation5 + $0x2] sm:$0x1] %vm305_vm2, %v2457_v17  ;;  %347 = vst.msk [vmem:[#allocation5 + $0x6] sm:$0x1] %vm305_vm2, %v2455_v16 }
  0xca   :  { %v208_v2 = vpop.permute.xlu1 %207 }
  0xcb   :  { %v206_v3 = vpop.permute.xlu0 %205  ;;  %228 = vst.msk [vmem:[#allocation5 + $0xe] sm:$0x1] %vm184_vm1, %v208_v2 }
  0xcc   :  { %227 = vst.msk [vmem:[#allocation5 + $0xa] sm:$0x1] %vm184_vm1, %v206_v3  ;;  %477 = vrot.lane.b32.xlu1 %v2566_v46, %s2338_s17 }
  0xcd   :  { %475 = vrot.lane.b32.xlu0 %v2568_v47, %s2338_s17  ;;  %348 = vst.msk [vmem:[#allocation5 + $0xa] sm:$0x1] %vm305_vm2, %v2465_v19  ;;  %349 = vst.msk [vmem:[#allocation5 + $0xe] sm:$0x1] %vm305_vm2, %v2463_v18  ;;  %v2680_v18 = vld [vmem:[#allocation2 + $0x5c] sm:$0x1] }
  0xce   :  { %v212_v4 = vpop.permute.xlu1 %211  ;;  %v2682_v19 = vld [vmem:[#allocation2 + $0x58] sm:$0x1] }
  0xcf   :  { %v210_v5 = vpop.permute.xlu0 %209  ;;  %230 = vst.msk [vmem:[#allocation5 + $0x16] sm:$0x1] %vm184_vm1, %v212_v4 }
  0xd0   :  { %229 = vst.msk [vmem:[#allocation5 + $0x12] sm:$0x1] %vm184_vm1, %v210_v5  ;;  %481 = vrot.lane.b32.xlu1 %v2576_v50, %s2338_s17 }
  0xd1   :  { %479 = vrot.lane.b32.xlu0 %v2578_v51, %s2338_s17  ;;  %350 = vst.msk [vmem:[#allocation5 + $0x12] sm:$0x1] %vm305_vm2, %v2473_v21  ;;  %351 = vst.msk [vmem:[#allocation5 + $0x16] sm:$0x1] %vm305_vm2, %v2471_v20 }
  0xd2   :  { %v216_v8 = vpop.permute.xlu1 %215 }
  0xd3   :  { %v214_v9 = vpop.permute.xlu0 %213  ;;  %232 = vst.msk [vmem:[#allocation5 + $0x1e] sm:$0x1] %vm184_vm1, %v216_v8 }
  0xd4   :  { %231 = vst.msk [vmem:[#allocation5 + $0x1a] sm:$0x1] %vm184_vm1, %v214_v9  ;;  %526 = vrot.lane.b32.xlu1 %v2646_v6, %s2344_s24 }
  0xd5   :  { %524 = vrot.lane.b32.xlu0 %v2648_v7, %s2344_s24  ;;  %352 = vst.msk [vmem:[#allocation5 + $0x1a] sm:$0x1] %vm305_vm2, %v2481_v23  ;;  %353 = vst.msk [vmem:[#allocation5 + $0x1e] sm:$0x1] %vm305_vm2, %v2479_v22 }
  0xd6   :  { %v236_v12 = vpop.permute.xlu1 %235 }
  0xd7   :  { %v234_v13 = vpop.permute.xlu0 %233  ;;  %258 = vst.msk [vmem:[#allocation5 + $0x7] sm:$0x1] %vm184_vm1, %v236_v12 }
  0xd8   :  { %257 = vst.msk [vmem:[#allocation5 + $0x3] sm:$0x1] %vm184_vm1, %v234_v13  ;;  %530 = vrot.lane.b32.xlu1 %v2660_v10, %s2344_s24 }
  0xd9   :  { %528 = vrot.lane.b32.xlu0 %v2662_v11, %s2344_s24 }
  0xda   :  { %v240_v16 = vpop.permute.xlu1 %239 }
  0xdb   :  { %v238_v17 = vpop.permute.xlu0 %237  ;;  %260 = vst.msk [vmem:[#allocation5 + $0xf] sm:$0x1] %vm184_vm1, %v240_v16 }
  0xdc   :  { %259 = vst.msk [vmem:[#allocation5 + $0xb] sm:$0x1] %vm184_vm1, %v238_v17  ;;  %534 = vrot.lane.b32.xlu1 %v2670_v14, %s2344_s24 }
  0xdd   :  { %532 = vrot.lane.b32.xlu0 %v2672_v15, %s2344_s24 }
  0xde   :  { %v244_v20 = vpop.permute.xlu1 %243 }
  0xdf   :  { %v242_v21 = vpop.permute.xlu0 %241  ;;  %262 = vst.msk [vmem:[#allocation5 + $0x17] sm:$0x1] %vm184_vm1, %v244_v20 }
  0xe0   :  { %261 = vst.msk [vmem:[#allocation5 + $0x13] sm:$0x1] %vm184_vm1, %v242_v21  ;;  %538 = vrot.lane.b32.xlu1 %v2680_v18, %s2344_s24 }
  0xe1   :  { %536 = vrot.lane.b32.xlu0 %v2682_v19, %s2344_s24 }
  0xe2   :  { %v248_v22 = vpop.permute.xlu1 %247 }
  0xe3   :  { %v246_v23 = vpop.permute.xlu0 %245  ;;  %264 = vst.msk [vmem:[#allocation5 + $0x1f] sm:$0x1] %vm184_vm1, %v248_v22  ;;  %v2890_v22 = vld [vmem:[#allocation2 + $0x16] sm:$0x1] }
  0xe4   :  { %263 = vst.msk [vmem:[#allocation5 + $0x1b] sm:$0x1] %vm184_vm1, %v246_v23  ;;  %559 = vrot.lane.b32.xlu1 %v2646_v6, %s2343_s23  ;;  %v2892_v23 = vld [vmem:[#allocation2 + $0x12] sm:$0x1] }
  0xe5   :  { %557 = vrot.lane.b32.xlu0 %v2648_v7, %s2343_s23 }
  0xe6   :  { %v284_v24 = vpop.permute.xlu1 %283 }
  0xe7   :  { %v282_v25 = vpop.permute.xlu0 %281  ;;  %307 = vst.msk [vmem:[#allocation5 + $0x4] sm:$0x1] %vm305_vm2, %v284_v24 }
  0xe8   :  { %306 = vst.msk [vmem:[#allocation5] sm:$0x1] %vm305_vm2, %v282_v25  ;;  %563 = vrot.lane.b32.xlu1 %v2660_v10, %s2343_s23 }
  0xe9   :  { %561 = vrot.lane.b32.xlu0 %v2662_v11, %s2343_s23 }
  0xea   :  { %v288_v26 = vpop.permute.xlu1 %287 }
  0xeb   :  { %v286_v27 = vpop.permute.xlu0 %285  ;;  %309 = vst.msk [vmem:[#allocation5 + $0xc] sm:$0x1] %vm305_vm2, %v288_v26  ;;  %v2900_v26 = vld [vmem:[#allocation2 + $0x1e] sm:$0x1] }
  0xec   :  { %308 = vst.msk [vmem:[#allocation5 + $0x8] sm:$0x1] %vm305_vm2, %v286_v27  ;;  %567 = vrot.lane.b32.xlu1 %v2670_v14, %s2343_s23  ;;  %v2902_v27 = vld [vmem:[#allocation2 + $0x1a] sm:$0x1] }
  0xed   :  { %565 = vrot.lane.b32.xlu0 %v2672_v15, %s2343_s23 }
  0xee   :  { %v292_v28 = vpop.permute.xlu1 %291 }
  0xef   :  { %v290_v29 = vpop.permute.xlu0 %289  ;;  %311 = vst.msk [vmem:[#allocation5 + $0x14] sm:$0x1] %vm305_vm2, %v292_v28 }
  0xf0   :  { %310 = vst.msk [vmem:[#allocation5 + $0x10] sm:$0x1] %vm305_vm2, %v290_v29  ;;  %571 = vrot.lane.b32.xlu1 %v2680_v18, %s2343_s23 }
  0xf1   :  { %569 = vrot.lane.b32.xlu0 %v2682_v19, %s2343_s23 }
  0xf2   :  { %v296_v30 = vpop.permute.xlu1 %295 }
  0xf3   :  { %v294_v31 = vpop.permute.xlu0 %293  ;;  %313 = vst.msk [vmem:[#allocation5 + $0x1c] sm:$0x1] %vm305_vm2, %v296_v30  ;;  %v2910_v30 = vld [vmem:[#allocation2 + $0x56] sm:$0x1] }
  0xf4   :  { %312 = vst.msk [vmem:[#allocation5 + $0x18] sm:$0x1] %vm305_vm2, %v294_v31  ;;  %591 = vrot.lane.b32.xlu1 %v2646_v6, %s2342_s22  ;;  %v2912_v31 = vld [vmem:[#allocation2 + $0x52] sm:$0x1] }
  0xf5   :  { %589 = vrot.lane.b32.xlu0 %v2648_v7, %s2342_s22 }
  0xf6   :  { %v317_v32 = vpop.permute.xlu1 %316 }
  0xf7   :  { %v315_v33 = vpop.permute.xlu0 %314  ;;  %339 = vst.msk [vmem:[#allocation5 + $0x5] sm:$0x1] %vm305_vm2, %v317_v32 }
  0xf8   :  { %338 = vst.msk [vmem:[#allocation5 + $0x1] sm:$0x1] %vm305_vm2, %v315_v33  ;;  %595 = vrot.lane.b32.xlu1 %v2660_v10, %s2342_s22 }
  0xf9   :  { %593 = vrot.lane.b32.xlu0 %v2662_v11, %s2342_s22 }
  0xfa   :  { %v321_v34 = vpop.permute.xlu1 %320 }
  0xfb   :  { %v319_v35 = vpop.permute.xlu0 %318  ;;  %341 = vst.msk [vmem:[#allocation5 + $0xd] sm:$0x1] %vm305_vm2, %v321_v34  ;;  %v2920_v34 = vld [vmem:[#allocation2 + $0x5e] sm:$0x1] }
  0xfc   :  { %340 = vst.msk [vmem:[#allocation5 + $0x9] sm:$0x1] %vm305_vm2, %v319_v35  ;;  %599 = vrot.lane.b32.xlu1 %v2670_v14, %s2342_s22  ;;  %v2922_v35 = vld [vmem:[#allocation2 + $0x5a] sm:$0x1] }
  0xfd   :  { %597 = vrot.lane.b32.xlu0 %v2672_v15, %s2342_s22 }
  0xfe   :  { %v325_v36 = vpop.permute.xlu1 %324 }
  0xff   :  { %v323_v37 = vpop.permute.xlu0 %322  ;;  %343 = vst.msk [vmem:[#allocation5 + $0x15] sm:$0x1] %vm305_vm2, %v325_v36 }
 0x100   :  { %342 = vst.msk [vmem:[#allocation5 + $0x11] sm:$0x1] %vm305_vm2, %v323_v37  ;;  %603 = vrot.lane.b32.xlu1 %v2680_v18, %s2342_s22 }
 0x101   :  { %601 = vrot.lane.b32.xlu0 %v2682_v19, %s2342_s22 }
 0x102   :  { %v329_v40 = vpop.permute.xlu1 %328 }
 0x103   :  { %v327_v41 = vpop.permute.xlu0 %326  ;;  %345 = vst.msk [vmem:[#allocation5 + $0x1d] sm:$0x1] %vm305_vm2, %v329_v40 }
 0x104   :  { %344 = vst.msk [vmem:[#allocation5 + $0x19] sm:$0x1] %vm305_vm2, %v327_v41  ;;  %623 = vrot.lane.b32.xlu1 %v2646_v6, %s2338_s17 }
 0x105   :  { %621 = vrot.lane.b32.xlu0 %v2648_v7, %s2338_s17 }
 0x106   :  { %v357_v44 = vpop.permute.xlu1 %356 }
 0x107   :  { %v355_v45 = vpop.permute.xlu0 %354  ;;  %379 = vst.msk [vmem:[#allocation5 + $0x7] sm:$0x1] %vm305_vm2, %v357_v44 }
 0x108   :  { %378 = vst.msk [vmem:[#allocation5 + $0x3] sm:$0x1] %vm305_vm2, %v355_v45  ;;  %627 = vrot.lane.b32.xlu1 %v2660_v10, %s2338_s17 }
 0x109   :  { %625 = vrot.lane.b32.xlu0 %v2662_v11, %s2338_s17  ;;  %499 = vst.msk [vmem:[#allocation5 + $0x3] sm:$0x1] %vm426_vm3, %v2548_v39  ;;  %500 = vst.msk [vmem:[#allocation5 + $0x7] sm:$0x1] %vm426_vm3, %v2546_v38 }
 0x10a   :  { %v361_v48 = vpop.permute.xlu1 %360 }
 0x10b   :  { %v359_v49 = vpop.permute.xlu0 %358  ;;  %381 = vst.msk [vmem:[#allocation5 + $0xf] sm:$0x1] %vm305_vm2, %v361_v48 }
 0x10c   :  { %380 = vst.msk [vmem:[#allocation5 + $0xb] sm:$0x1] %vm305_vm2, %v359_v49  ;;  %631 = vrot.lane.b32.xlu1 %v2670_v14, %s2338_s17 }
 0x10d   :  { %629 = vrot.lane.b32.xlu0 %v2672_v15, %s2338_s17  ;;  %501 = vst.msk [vmem:[#allocation5 + $0xb] sm:$0x1] %vm426_vm3, %v2558_v43  ;;  %502 = vst.msk [vmem:[#allocation5 + $0xf] sm:$0x1] %vm426_vm3, %v2556_v42  ;;  %v2774_v43 = vld [vmem:[#allocation2 + $0x15] sm:$0x1] }
 0x10e   :  { %v365_v39 = vpop.permute.xlu1 %364  ;;  %v2776_v42 = vld [vmem:[#allocation2 + $0x11] sm:$0x1] }
 0x10f   :  { %v363_v38 = vpop.permute.xlu0 %362  ;;  %383 = vst.msk [vmem:[#allocation5 + $0x17] sm:$0x1] %vm305_vm2, %v365_v39 }
 0x110   :  { %382 = vst.msk [vmem:[#allocation5 + $0x13] sm:$0x1] %vm305_vm2, %v363_v38  ;;  %635 = vrot.lane.b32.xlu1 %v2680_v18, %s2338_s17 }
 0x111   :  { %633 = vrot.lane.b32.xlu0 %v2682_v19, %s2338_s17  ;;  %503 = vst.msk [vmem:[#allocation5 + $0x13] sm:$0x1] %vm426_vm3, %v2568_v47  ;;  %504 = vst.msk [vmem:[#allocation5 + $0x17] sm:$0x1] %vm426_vm3, %v2566_v46  ;;  %v2788_v46 = vld [vmem:[#allocation2 + $0x1d] sm:$0x1] }
 0x112   :  { %v369_v52 = vpop.permute.xlu1 %368  ;;  %v2790_v47 = vld [vmem:[#allocation2 + $0x19] sm:$0x1] }
 0x113   :  { %v367_v53 = vpop.permute.xlu0 %366  ;;  %385 = vst.msk [vmem:[#allocation5 + $0x1f] sm:$0x1] %vm305_vm2, %v369_v52 }
 0x114   :  { %384 = vst.msk [vmem:[#allocation5 + $0x1b] sm:$0x1] %vm305_vm2, %v367_v53  ;;  %671 = vrot.lane.b32.xlu1 %v2774_v43, %s2345_s25 }
 0x115   :  { %669 = vrot.lane.b32.xlu0 %v2776_v42, %s2345_s25  ;;  %505 = vst.msk [vmem:[#allocation5 + $0x1b] sm:$0x1] %vm426_vm3, %v2578_v51  ;;  %506 = vst.msk [vmem:[#allocation5 + $0x1f] sm:$0x1] %vm426_vm3, %v2576_v50  ;;  %v2798_v51 = vld [vmem:[#allocation2 + $0x55] sm:$0x1] }
 0x116   :  { %v405_v54 = vpop.permute.xlu1 %404 }
 0x117   :  { %v403_v55 = vpop.permute.xlu0 %402  ;;  %428 = vst.msk [vmem:[#allocation5 + $0x4] sm:$0x1] %vm426_vm3, %v405_v54 }
 0x118   :  { %427 = vst.msk [vmem:[#allocation5] sm:$0x1] %vm426_vm3, %v403_v55  ;;  %675 = vrot.lane.b32.xlu1 %v2788_v46, %s2345_s25 }
 0x119   :  { %673 = vrot.lane.b32.xlu0 %v2790_v47, %s2345_s25 }
 0x11a   :  { %v409_v50 = vpop.permute.xlu1 %408 }
 0x11b   :  { %v407_v57 = vpop.permute.xlu0 %406  ;;  %430 = vst.msk [vmem:[#allocation5 + $0xc] sm:$0x1] %vm426_vm3, %v409_v50 }
 0x11c   :  { %429 = vst.msk [vmem:[#allocation5 + $0x8] sm:$0x1] %vm426_vm3, %v407_v57  ;;  %679 = vrot.lane.b32.xlu1 %v2798_v51, %s2345_s25 }
 0x11d   :  { %677 = vrot.lane.b32.xlu0 %v2800_v56, %s2345_s25 }
 0x11e   :  { %v413_v60 = vpop.permute.xlu1 %412 }
 0x11f   :  { %v411_v61 = vpop.permute.xlu0 %410  ;;  %432 = vst.msk [vmem:[#allocation5 + $0x14] sm:$0x1] %vm426_vm3, %v413_v60 }
 0x120   :  { %431 = vst.msk [vmem:[#allocation5 + $0x10] sm:$0x1] %vm426_vm3, %v411_v61  ;;  %683 = vrot.lane.b32.xlu1 %v2808_v58, %s2345_s25 }
 0x121   :  { %681 = vrot.lane.b32.xlu0 %v2810_v59, %s2345_s25 }
 0x122   :  { %v417_v62 = vpop.permute.xlu1 %416 }
 0x123   :  { %v415_v63 = vpop.permute.xlu0 %414  ;;  %434 = vst.msk [vmem:[#allocation5 + $0x1c] sm:$0x1] %vm426_vm3, %v417_v62  ;;  %v3002_v62 = vld [vmem:[#allocation2 + $0x17] sm:$0x1] }
 0x124   :  { %433 = vst.msk [vmem:[#allocation5 + $0x18] sm:$0x1] %vm426_vm3, %v415_v63  ;;  %704 = vrot.lane.b32.xlu1 %v2774_v43, %s2344_s24  ;;  %v3004_v63 = vld [vmem:[#allocation2 + $0x13] sm:$0x1] }
 0x125   :  { %702 = vrot.lane.b32.xlu0 %v2776_v42, %s2344_s24 }
 0x126   :  { %v438_v0 = vpop.permute.xlu1 %437 }
 0x127   :  { %v436_v1 = vpop.permute.xlu0 %435  ;;  %460 = vst.msk [vmem:[#allocation5 + $0x5] sm:$0x1] %vm426_vm3, %v438_v0 }
 0x128   :  { %459 = vst.msk [vmem:[#allocation5 + $0x1] sm:$0x1] %vm426_vm3, %v436_v1  ;;  %708 = vrot.lane.b32.xlu1 %v2788_v46, %s2344_s24 }
 0x129   :  { %706 = vrot.lane.b32.xlu0 %v2790_v47, %s2344_s24 }
 0x12a   :  { %v442_v2 = vpop.permute.xlu1 %441 }
 0x12b   :  { %v440_v3 = vpop.permute.xlu0 %439  ;;  %462 = vst.msk [vmem:[#allocation5 + $0xd] sm:$0x1] %vm426_vm3, %v442_v2  ;;  %v3012_v2 = vld [vmem:[#allocation2 + $0x1f] sm:$0x1] }
 0x12c   :  { %461 = vst.msk [vmem:[#allocation5 + $0x9] sm:$0x1] %vm426_vm3, %v440_v3  ;;  %712 = vrot.lane.b32.xlu1 %v2798_v51, %s2344_s24  ;;  %v3014_v3 = vld [vmem:[#allocation2 + $0x1b] sm:$0x1] }
 0x12d   :  { %710 = vrot.lane.b32.xlu0 %v2800_v56, %s2344_s24 }
 0x12e   :  { %v446_v4 = vpop.permute.xlu1 %445 }
 0x12f   :  { %v444_v5 = vpop.permute.xlu0 %443  ;;  %464 = vst.msk [vmem:[#allocation5 + $0x15] sm:$0x1] %vm426_vm3, %v446_v4 }
 0x130   :  { %463 = vst.msk [vmem:[#allocation5 + $0x11] sm:$0x1] %vm426_vm3, %v444_v5  ;;  %716 = vrot.lane.b32.xlu1 %v2808_v58, %s2344_s24 }
 0x131   :  { %714 = vrot.lane.b32.xlu0 %v2810_v59, %s2344_s24 }
 0x132   :  { %v450_v6 = vpop.permute.xlu1 %449 }
 0x133   :  { %v448_v7 = vpop.permute.xlu0 %447  ;;  %466 = vst.msk [vmem:[#allocation5 + $0x1d] sm:$0x1] %vm426_vm3, %v450_v6  ;;  %v3022_v6 = vld [vmem:[#allocation2 + $0x57] sm:$0x1] }
 0x134   :  { %465 = vst.msk [vmem:[#allocation5 + $0x19] sm:$0x1] %vm426_vm3, %v448_v7  ;;  %736 = vrot.lane.b32.xlu1 %v2774_v43, %s2343_s23  ;;  %v3024_v7 = vld [vmem:[#allocation2 + $0x53] sm:$0x1] }
 0x135   :  { %734 = vrot.lane.b32.xlu0 %v2776_v42, %s2343_s23 }
 0x136   :  { %v470_v8 = vpop.permute.xlu1 %469 }
 0x137   :  { %v468_v9 = vpop.permute.xlu0 %467  ;;  %492 = vst.msk [vmem:[#allocation5 + $0x6] sm:$0x1] %vm426_vm3, %v470_v8 }
 0x138   :  { %491 = vst.msk [vmem:[#allocation5 + $0x2] sm:$0x1] %vm426_vm3, %v468_v9  ;;  %740 = vrot.lane.b32.xlu1 %v2788_v46, %s2343_s23 }
 0x139   :  { %738 = vrot.lane.b32.xlu0 %v2790_v47, %s2343_s23 }
 0x13a   :  { %v474_v10 = vpop.permute.xlu1 %473 }
 0x13b   :  { %v472_v11 = vpop.permute.xlu0 %471  ;;  %494 = vst.msk [vmem:[#allocation5 + $0xe] sm:$0x1] %vm426_vm3, %v474_v10  ;;  %v3032_v10 = vld [vmem:[#allocation2 + $0x5f] sm:$0x1] }
 0x13c   :  { %493 = vst.msk [vmem:[#allocation5 + $0xa] sm:$0x1] %vm426_vm3, %v472_v11  ;;  %744 = vrot.lane.b32.xlu1 %v2798_v51, %s2343_s23  ;;  %v3034_v11 = vld [vmem:[#allocation2 + $0x5b] sm:$0x1] }
 0x13d   :  { %742 = vrot.lane.b32.xlu0 %v2800_v56, %s2343_s23 }
 0x13e   :  { %v478_v12 = vpop.permute.xlu1 %477 }
 0x13f   :  { %v476_v13 = vpop.permute.xlu0 %475  ;;  %496 = vst.msk [vmem:[#allocation5 + $0x16] sm:$0x1] %vm426_vm3, %v478_v12 }
 0x140   :  { %495 = vst.msk [vmem:[#allocation5 + $0x12] sm:$0x1] %vm426_vm3, %v476_v13  ;;  %748 = vrot.lane.b32.xlu1 %v2808_v58, %s2343_s23 }
 0x141   :  { %746 = vrot.lane.b32.xlu0 %v2810_v59, %s2343_s23 }
 0x142   :  { %v482_v14 = vpop.permute.xlu1 %481 }
 0x143   :  { %v480_v15 = vpop.permute.xlu0 %479  ;;  %498 = vst.msk [vmem:[#allocation5 + $0x1e] sm:$0x1] %vm426_vm3, %v482_v14 }
 0x144   :  { %497 = vst.msk [vmem:[#allocation5 + $0x1a] sm:$0x1] %vm426_vm3, %v480_v15  ;;  %768 = vrot.lane.b32.xlu1 %v2774_v43, %s2342_s22 }
 0x145   :  { %766 = vrot.lane.b32.xlu0 %v2776_v42, %s2342_s22 }
 0x146   :  { %v527_v16 = vpop.permute.xlu1 %526 }
 0x147   :  { %v525_v17 = vpop.permute.xlu0 %524  ;;  %550 = vst.msk [vmem:[#allocation5 + $0x4] sm:$0x1] %vm548_vm4, %v527_v16 }
 0x148   :  { %549 = vst.msk [vmem:[#allocation5] sm:$0x1] %vm548_vm4, %v525_v17  ;;  %772 = vrot.lane.b32.xlu1 %v2788_v46, %s2342_s22 }
 0x149   :  { %770 = vrot.lane.b32.xlu0 %v2790_v47, %s2342_s22 }
 0x14a   :  { %v531_v18 = vpop.permute.xlu1 %530 }
 0x14b   :  { %v529_v19 = vpop.permute.xlu0 %528  ;;  %552 = vst.msk [vmem:[#allocation5 + $0xc] sm:$0x1] %vm548_vm4, %v531_v18 }
 0x14c   :  { %551 = vst.msk [vmem:[#allocation5 + $0x8] sm:$0x1] %vm548_vm4, %v529_v19  ;;  %776 = vrot.lane.b32.xlu1 %v2798_v51, %s2342_s22 }
 0x14d   :  { %774 = vrot.lane.b32.xlu0 %v2800_v56, %s2342_s22 }
 0x14e   :  { %v535_v20 = vpop.permute.xlu1 %534 }
 0x14f   :  { %v533_v21 = vpop.permute.xlu0 %532  ;;  %554 = vst.msk [vmem:[#allocation5 + $0x14] sm:$0x1] %vm548_vm4, %v535_v20 }
 0x150   :  { %553 = vst.msk [vmem:[#allocation5 + $0x10] sm:$0x1] %vm548_vm4, %v533_v21  ;;  %780 = vrot.lane.b32.xlu1 %v2808_v58, %s2342_s22 }
 0x151   :  { %778 = vrot.lane.b32.xlu0 %v2810_v59, %s2342_s22 }
 0x152   :  { %v539_v24 = vpop.permute.xlu1 %538 }
 0x153   :  { %v537_v25 = vpop.permute.xlu0 %536  ;;  %556 = vst.msk [vmem:[#allocation5 + $0x1c] sm:$0x1] %vm548_vm4, %v539_v24 }
 0x154   :  { %555 = vst.msk [vmem:[#allocation5 + $0x18] sm:$0x1] %vm548_vm4, %v537_v25  ;;  %816 = vrot.lane.b32.xlu1 %v2890_v22, %s2346_s26 }
 0x155   :  { %814 = vrot.lane.b32.xlu0 %v2892_v23, %s2346_s26 }
 0x156   :  { %v560_v28 = vpop.permute.xlu1 %559 }
 0x157   :  { %v558_v29 = vpop.permute.xlu0 %557  ;;  %582 = vst.msk [vmem:[#allocation5 + $0x5] sm:$0x1] %vm548_vm4, %v560_v28 }
 0x158   :  { %581 = vst.msk [vmem:[#allocation5 + $0x1] sm:$0x1] %vm548_vm4, %v558_v29  ;;  %820 = vrot.lane.b32.xlu1 %v2900_v26, %s2346_s26 }
 0x159   :  { %818 = vrot.lane.b32.xlu0 %v2902_v27, %s2346_s26 }
 0x15a   :  { %v564_v32 = vpop.permute.xlu1 %563 }
 0x15b   :  { %v562_v33 = vpop.permute.xlu0 %561  ;;  %584 = vst.msk [vmem:[#allocation5 + $0xd] sm:$0x1] %vm548_vm4, %v564_v32 }
 0x15c   :  { %583 = vst.msk [vmem:[#allocation5 + $0x9] sm:$0x1] %vm548_vm4, %v562_v33  ;;  %824 = vrot.lane.b32.xlu1 %v2910_v30, %s2346_s26 }
 0x15d   :  { %822 = vrot.lane.b32.xlu0 %v2912_v31, %s2346_s26 }
 0x15e   :  { %v568_v36 = vpop.permute.xlu1 %567 }
 0x15f   :  { %v566_v37 = vpop.permute.xlu0 %565  ;;  %586 = vst.msk [vmem:[#allocation5 + $0x15] sm:$0x1] %vm548_vm4, %v568_v36 }
 0x160   :  { %585 = vst.msk [vmem:[#allocation5 + $0x11] sm:$0x1] %vm548_vm4, %v566_v37  ;;  %828 = vrot.lane.b32.xlu1 %v2920_v34, %s2346_s26 }
 0x161   :  { %826 = vrot.lane.b32.xlu0 %v2922_v35, %s2346_s26 }
 0x162   :  { %v572_v40 = vpop.permute.xlu1 %571 }
 0x163   :  { %v570_v41 = vpop.permute.xlu0 %569  ;;  %588 = vst.msk [vmem:[#allocation5 + $0x1d] sm:$0x1] %vm548_vm4, %v572_v40  ;;  %v3114_v40 = vld [vmem:[#allocation2 + $0x24] sm:$0x1] }
 0x164   :  { %587 = vst.msk [vmem:[#allocation5 + $0x19] sm:$0x1] %vm548_vm4, %v570_v41  ;;  %849 = vrot.lane.b32.xlu1 %v2890_v22, %s2345_s25  ;;  %v3116_v41 = vld [vmem:[#allocation2 + $0x20] sm:$0x1] }
 0x165   :  { %847 = vrot.lane.b32.xlu0 %v2892_v23, %s2345_s25 }
 0x166   :  { %v592_v44 = vpop.permute.xlu1 %591 }
 0x167   :  { %v590_v45 = vpop.permute.xlu0 %589  ;;  %614 = vst.msk [vmem:[#allocation5 + $0x6] sm:$0x1] %vm548_vm4, %v592_v44 }
 0x168   :  { %613 = vst.msk [vmem:[#allocation5 + $0x2] sm:$0x1] %vm548_vm4, %v590_v45  ;;  %853 = vrot.lane.b32.xlu1 %v2900_v26, %s2345_s25 }
 0x169   :  { %851 = vrot.lane.b32.xlu0 %v2902_v27, %s2345_s25 }
 0x16a   :  { %v596_v48 = vpop.permute.xlu1 %595 }
 0x16b   :  { %v594_v49 = vpop.permute.xlu0 %593  ;;  %616 = vst.msk [vmem:[#allocation5 + $0xe] sm:$0x1] %vm548_vm4, %v596_v48  ;;  %v3124_v48 = vld [vmem:[#allocation2 + $0x2c] sm:$0x1] }
 0x16c   :  { %615 = vst.msk [vmem:[#allocation5 + $0xa] sm:$0x1] %vm548_vm4, %v594_v49  ;;  %857 = vrot.lane.b32.xlu1 %v2910_v30, %s2345_s25  ;;  %v3126_v49 = vld [vmem:[#allocation2 + $0x28] sm:$0x1] }
 0x16d   :  { %855 = vrot.lane.b32.xlu0 %v2912_v31, %s2345_s25 }
 0x16e   :  { %v600_v39 = vpop.permute.xlu1 %599 }
 0x16f   :  { %v598_v38 = vpop.permute.xlu0 %597  ;;  %618 = vst.msk [vmem:[#allocation5 + $0x16] sm:$0x1] %vm548_vm4, %v600_v39 }
 0x170   :  { %617 = vst.msk [vmem:[#allocation5 + $0x12] sm:$0x1] %vm548_vm4, %v598_v38  ;;  %861 = vrot.lane.b32.xlu1 %v2920_v34, %s2345_s25 }
 0x171   :  { %859 = vrot.lane.b32.xlu0 %v2922_v35, %s2345_s25 }
 0x172   :  { %v604_v43 = vpop.permute.xlu1 %603 }
 0x173   :  { %v602_v42 = vpop.permute.xlu0 %601  ;;  %620 = vst.msk [vmem:[#allocation5 + $0x1e] sm:$0x1] %vm548_vm4, %v604_v43  ;;  %v3134_v43 = vld [vmem:[#allocation2 + $0x64] sm:$0x1] }
 0x174   :  { %619 = vst.msk [vmem:[#allocation5 + $0x1a] sm:$0x1] %vm548_vm4, %v602_v42  ;;  %881 = vrot.lane.b32.xlu1 %v2890_v22, %s2344_s24  ;;  %v3136_v42 = vld [vmem:[#allocation2 + $0x60] sm:$0x1] }
 0x175   :  { %879 = vrot.lane.b32.xlu0 %v2892_v23, %s2344_s24 }
 0x176   :  { %v624_v52 = vpop.permute.xlu1 %623 }
 0x177   :  { %v622_v53 = vpop.permute.xlu0 %621  ;;  %646 = vst.msk [vmem:[#allocation5 + $0x7] sm:$0x1] %vm548_vm4, %v624_v52 }
 0x178   :  { %645 = vst.msk [vmem:[#allocation5 + $0x3] sm:$0x1] %vm548_vm4, %v622_v53  ;;  %885 = vrot.lane.b32.xlu1 %v2900_v26, %s2344_s24 }
 0x179   :  { %883 = vrot.lane.b32.xlu0 %v2902_v27, %s2344_s24 }
 0x17a   :  { %v628_v46 = vpop.permute.xlu1 %627 }
 0x17b   :  { %v626_v47 = vpop.permute.xlu0 %625  ;;  %648 = vst.msk [vmem:[#allocation5 + $0xf] sm:$0x1] %vm548_vm4, %v628_v46  ;;  %v3144_v46 = vld [vmem:[#allocation2 + $0x6c] sm:$0x1] }
 0x17c   :  { %647 = vst.msk [vmem:[#allocation5 + $0xb] sm:$0x1] %vm548_vm4, %v626_v47  ;;  %889 = vrot.lane.b32.xlu1 %v2910_v30, %s2344_s24  ;;  %v3146_v47 = vld [vmem:[#allocation2 + $0x68] sm:$0x1] }
 0x17d   :  { %887 = vrot.lane.b32.xlu0 %v2912_v31, %s2344_s24 }
 0x17e   :  { %v632_v54 = vpop.permute.xlu1 %631 }
 0x17f   :  { %v630_v55 = vpop.permute.xlu0 %629  ;;  %650 = vst.msk [vmem:[#allocation5 + $0x17] sm:$0x1] %vm548_vm4, %v632_v54 }
 0x180   :  { %649 = vst.msk [vmem:[#allocation5 + $0x13] sm:$0x1] %vm548_vm4, %v630_v55  ;;  %893 = vrot.lane.b32.xlu1 %v2920_v34, %s2344_s24 }
 0x181   :  { %891 = vrot.lane.b32.xlu0 %v2922_v35, %s2344_s24 }
 0x182   :  { %v636_v51 = vpop.permute.xlu1 %635 }
 0x183   :  { %v634_v56 = vpop.permute.xlu0 %633  ;;  %652 = vst.msk [vmem:[#allocation5 + $0x1f] sm:$0x1] %vm548_vm4, %v636_v51 }
 0x184   :  { %651 = vst.msk [vmem:[#allocation5 + $0x1b] sm:$0x1] %vm548_vm4, %v634_v56  ;;  %913 = vrot.lane.b32.xlu1 %v2890_v22, %s2343_s23 }
 0x185   :  { %911 = vrot.lane.b32.xlu0 %v2892_v23, %s2343_s23 }
 0x186   :  { %v672_v50 = vpop.permute.xlu1 %671 }
 0x187   :  { %v670_v57 = vpop.permute.xlu0 %669  ;;  %695 = vst.msk [vmem:[#allocation5 + $0x4] sm:$0x1] %vm693_vm5, %v672_v50 }
 0x188   :  { %694 = vst.msk [vmem:[#allocation5] sm:$0x1] %vm693_vm5, %v670_v57  ;;  %917 = vrot.lane.b32.xlu1 %v2900_v26, %s2343_s23 }
 0x189   :  { %915 = vrot.lane.b32.xlu0 %v2902_v27, %s2343_s23 }
 0x18a   :  { %v676_v58 = vpop.permute.xlu1 %675 }
 0x18b   :  { %v674_v59 = vpop.permute.xlu0 %673  ;;  %697 = vst.msk [vmem:[#allocation5 + $0xc] sm:$0x1] %vm693_vm5, %v676_v58 }
 0x18c   :  { %696 = vst.msk [vmem:[#allocation5 + $0x8] sm:$0x1] %vm693_vm5, %v674_v59  ;;  %921 = vrot.lane.b32.xlu1 %v2910_v30, %s2343_s23 }
 0x18d   :  { %919 = vrot.lane.b32.xlu0 %v2912_v31, %s2343_s23 }
 0x18e   :  { %v680_v60 = vpop.permute.xlu1 %679 }
 0x18f   :  { %v678_v61 = vpop.permute.xlu0 %677  ;;  %699 = vst.msk [vmem:[#allocation5 + $0x14] sm:$0x1] %vm693_vm5, %v680_v60 }
 0x190   :  { %698 = vst.msk [vmem:[#allocation5 + $0x10] sm:$0x1] %vm693_vm5, %v678_v61  ;;  %925 = vrot.lane.b32.xlu1 %v2920_v34, %s2343_s23 }
 0x191   :  { %923 = vrot.lane.b32.xlu0 %v2922_v35, %s2343_s23 }
 0x192   :  { %v684_v0 = vpop.permute.xlu1 %683 }
 0x193   :  { %v682_v1 = vpop.permute.xlu0 %681  ;;  %701 = vst.msk [vmem:[#allocation5 + $0x1c] sm:$0x1] %vm693_vm5, %v684_v0 }
 0x194   :  { %700 = vst.msk [vmem:[#allocation5 + $0x18] sm:$0x1] %vm693_vm5, %v682_v1  ;;  %961 = vrot.lane.b32.xlu1 %v3002_v62, %s2347_s27 }
 0x195   :  { %959 = vrot.lane.b32.xlu0 %v3004_v63, %s2347_s27 }
 0x196   :  { %v705_v4 = vpop.permute.xlu1 %704 }
 0x197   :  { %v703_v5 = vpop.permute.xlu0 %702  ;;  %727 = vst.msk [vmem:[#allocation5 + $0x5] sm:$0x1] %vm693_vm5, %v705_v4 }
 0x198   :  { %726 = vst.msk [vmem:[#allocation5 + $0x1] sm:$0x1] %vm693_vm5, %v703_v5  ;;  %965 = vrot.lane.b32.xlu1 %v3012_v2, %s2347_s27 }
 0x199   :  { %963 = vrot.lane.b32.xlu0 %v3014_v3, %s2347_s27 }
 0x19a   :  { %v709_v8 = vpop.permute.xlu1 %708 }
 0x19b   :  { %v707_v9 = vpop.permute.xlu0 %706  ;;  %729 = vst.msk [vmem:[#allocation5 + $0xd] sm:$0x1] %vm693_vm5, %v709_v8 }
 0x19c   :  { %728 = vst.msk [vmem:[#allocation5 + $0x9] sm:$0x1] %vm693_vm5, %v707_v9  ;;  %969 = vrot.lane.b32.xlu1 %v3022_v6, %s2347_s27 }
 0x19d   :  { %967 = vrot.lane.b32.xlu0 %v3024_v7, %s2347_s27 }
 0x19e   :  { %v713_v12 = vpop.permute.xlu1 %712 }
 0x19f   :  { %v711_v13 = vpop.permute.xlu0 %710  ;;  %731 = vst.msk [vmem:[#allocation5 + $0x15] sm:$0x1] %vm693_vm5, %v713_v12 }
 0x1a0   :  { %730 = vst.msk [vmem:[#allocation5 + $0x11] sm:$0x1] %vm693_vm5, %v711_v13  ;;  %973 = vrot.lane.b32.xlu1 %v3032_v10, %s2347_s27 }
 0x1a1   :  { %971 = vrot.lane.b32.xlu0 %v3034_v11, %s2347_s27 }
 0x1a2   :  { %v717_v14 = vpop.permute.xlu1 %716 }
 0x1a3   :  { %v715_v15 = vpop.permute.xlu0 %714  ;;  %733 = vst.msk [vmem:[#allocation5 + $0x1d] sm:$0x1] %vm693_vm5, %v717_v14  ;;  %v3226_v14 = vld [vmem:[#allocation2 + $0x25] sm:$0x1] }
 0x1a4   :  { %732 = vst.msk [vmem:[#allocation5 + $0x19] sm:$0x1] %vm693_vm5, %v715_v15  ;;  %994 = vrot.lane.b32.xlu1 %v3002_v62, %s2346_s26  ;;  %v3228_v15 = vld [vmem:[#allocation2 + $0x21] sm:$0x1] }
 0x1a5   :  { %992 = vrot.lane.b32.xlu0 %v3004_v63, %s2346_s26 }
 0x1a6   :  { %v737_v16 = vpop.permute.xlu1 %736 }
 0x1a7   :  { %v735_v17 = vpop.permute.xlu0 %734  ;;  %759 = vst.msk [vmem:[#allocation5 + $0x6] sm:$0x1] %vm693_vm5, %v737_v16 }
 0x1a8   :  { %758 = vst.msk [vmem:[#allocation5 + $0x2] sm:$0x1] %vm693_vm5, %v735_v17  ;;  %998 = vrot.lane.b32.xlu1 %v3012_v2, %s2346_s26 }
 0x1a9   :  { %996 = vrot.lane.b32.xlu0 %v3014_v3, %s2346_s26 }
 0x1aa   :  { %v741_v18 = vpop.permute.xlu1 %740 }
 0x1ab   :  { %v739_v19 = vpop.permute.xlu0 %738  ;;  %761 = vst.msk [vmem:[#allocation5 + $0xe] sm:$0x1] %vm693_vm5, %v741_v18  ;;  %v3236_v18 = vld [vmem:[#allocation2 + $0x2d] sm:$0x1] }
 0x1ac   :  { %760 = vst.msk [vmem:[#allocation5 + $0xa] sm:$0x1] %vm693_vm5, %v739_v19  ;;  %1002 = vrot.lane.b32.xlu1 %v3022_v6, %s2346_s26  ;;  %v3238_v19 = vld [vmem:[#allocation2 + $0x29] sm:$0x1] }
 0x1ad   :  { %1000 = vrot.lane.b32.xlu0 %v3024_v7, %s2346_s26 }
 0x1ae   :  { %v745_v20 = vpop.permute.xlu1 %744 }
 0x1af   :  { %v743_v21 = vpop.permute.xlu0 %742  ;;  %763 = vst.msk [vmem:[#allocation5 + $0x16] sm:$0x1] %vm693_vm5, %v745_v20 }
 0x1b0   :  { %762 = vst.msk [vmem:[#allocation5 + $0x12] sm:$0x1] %vm693_vm5, %v743_v21  ;;  %1006 = vrot.lane.b32.xlu1 %v3032_v10, %s2346_s26 }
 0x1b1   :  { %1004 = vrot.lane.b32.xlu0 %v3034_v11, %s2346_s26 }
 0x1b2   :  { %v749_v22 = vpop.permute.xlu1 %748 }
 0x1b3   :  { %v747_v23 = vpop.permute.xlu0 %746  ;;  %765 = vst.msk [vmem:[#allocation5 + $0x1e] sm:$0x1] %vm693_vm5, %v749_v22  ;;  %v3246_v22 = vld [vmem:[#allocation2 + $0x65] sm:$0x1] }
 0x1b4   :  { %764 = vst.msk [vmem:[#allocation5 + $0x1a] sm:$0x1] %vm693_vm5, %v747_v23  ;;  %1026 = vrot.lane.b32.xlu1 %v3002_v62, %s2345_s25  ;;  %v3248_v23 = vld [vmem:[#allocation2 + $0x61] sm:$0x1] }
 0x1b5   :  { %1024 = vrot.lane.b32.xlu0 %v3004_v63, %s2345_s25 }
 0x1b6   :  { %v769_v24 = vpop.permute.xlu1 %768 }
 0x1b7   :  { %v767_v25 = vpop.permute.xlu0 %766  ;;  %791 = vst.msk [vmem:[#allocation5 + $0x7] sm:$0x1] %vm693_vm5, %v769_v24 }
 0x1b8   :  { %790 = vst.msk [vmem:[#allocation5 + $0x3] sm:$0x1] %vm693_vm5, %v767_v25  ;;  %1030 = vrot.lane.b32.xlu1 %v3012_v2, %s2345_s25 }
 0x1b9   :  { %1028 = vrot.lane.b32.xlu0 %v3014_v3, %s2345_s25 }
 0x1ba   :  { %v773_v26 = vpop.permute.xlu1 %772 }
 0x1bb   :  { %v771_v27 = vpop.permute.xlu0 %770  ;;  %793 = vst.msk [vmem:[#allocation5 + $0xf] sm:$0x1] %vm693_vm5, %v773_v26  ;;  %v3256_v26 = vld [vmem:[#allocation2 + $0x6d] sm:$0x1] }
 0x1bc   :  { %792 = vst.msk [vmem:[#allocation5 + $0xb] sm:$0x1] %vm693_vm5, %v771_v27  ;;  %1034 = vrot.lane.b32.xlu1 %v3022_v6, %s2345_s25  ;;  %v3258_v27 = vld [vmem:[#allocation2 + $0x69] sm:$0x1] }
 0x1bd   :  { %1032 = vrot.lane.b32.xlu0 %v3024_v7, %s2345_s25 }
 0x1be   :  { %v777_v28 = vpop.permute.xlu1 %776 }
 0x1bf   :  { %v775_v29 = vpop.permute.xlu0 %774  ;;  %795 = vst.msk [vmem:[#allocation5 + $0x17] sm:$0x1] %vm693_vm5, %v777_v28 }
 0x1c0   :  { %794 = vst.msk [vmem:[#allocation5 + $0x13] sm:$0x1] %vm693_vm5, %v775_v29  ;;  %1038 = vrot.lane.b32.xlu1 %v3032_v10, %s2345_s25 }
 0x1c1   :  { %1036 = vrot.lane.b32.xlu0 %v3034_v11, %s2345_s25 }
 0x1c2   :  { %v781_v30 = vpop.permute.xlu1 %780 }
 0x1c3   :  { %v779_v31 = vpop.permute.xlu0 %778  ;;  %797 = vst.msk [vmem:[#allocation5 + $0x1f] sm:$0x1] %vm693_vm5, %v781_v30 }
 0x1c4   :  { %796 = vst.msk [vmem:[#allocation5 + $0x1b] sm:$0x1] %vm693_vm5, %v779_v31  ;;  %1058 = vrot.lane.b32.xlu1 %v3002_v62, %s2344_s24 }
 0x1c5   :  { %1056 = vrot.lane.b32.xlu0 %v3004_v63, %s2344_s24 }
 0x1c6   :  { %v817_v32 = vpop.permute.xlu1 %816 }
 0x1c7   :  { %v815_v33 = vpop.permute.xlu0 %814  ;;  %840 = vst.msk [vmem:[#allocation5 + $0x4] sm:$0x1] %vm838_vm6, %v817_v32 }
 0x1c8   :  { %839 = vst.msk [vmem:[#allocation5] sm:$0x1] %vm838_vm6, %v815_v33  ;;  %1062 = vrot.lane.b32.xlu1 %v3012_v2, %s2344_s24 }
 0x1c9   :  { %1060 = vrot.lane.b32.xlu0 %v3014_v3, %s2344_s24 }
 0x1ca   :  { %v821_v34 = vpop.permute.xlu1 %820 }
 0x1cb   :  { %v819_v35 = vpop.permute.xlu0 %818  ;;  %842 = vst.msk [vmem:[#allocation5 + $0xc] sm:$0x1] %vm838_vm6, %v821_v34 }
 0x1cc   :  { %841 = vst.msk [vmem:[#allocation5 + $0x8] sm:$0x1] %vm838_vm6, %v819_v35  ;;  %1066 = vrot.lane.b32.xlu1 %v3022_v6, %s2344_s24 }
 0x1cd   :  { %1064 = vrot.lane.b32.xlu0 %v3024_v7, %s2344_s24 }
 0x1ce   :  { %v825_v36 = vpop.permute.xlu1 %824 }
 0x1cf   :  { %v823_v37 = vpop.permute.xlu0 %822  ;;  %844 = vst.msk [vmem:[#allocation5 + $0x14] sm:$0x1] %vm838_vm6, %v825_v36 }
 0x1d0   :  { %843 = vst.msk [vmem:[#allocation5 + $0x10] sm:$0x1] %vm838_vm6, %v823_v37  ;;  %1070 = vrot.lane.b32.xlu1 %v3032_v10, %s2344_s24 }
 0x1d1   :  { %1068 = vrot.lane.b32.xlu0 %v3034_v11, %s2344_s24 }
 0x1d2   :  { %v829_v44 = vpop.permute.xlu1 %828 }
 0x1d3   :  { %v827_v45 = vpop.permute.xlu0 %826  ;;  %846 = vst.msk [vmem:[#allocation5 + $0x1c] sm:$0x1] %vm838_vm6, %v829_v44 }
 0x1d4   :  { %845 = vst.msk [vmem:[#allocation5 + $0x18] sm:$0x1] %vm838_vm6, %v827_v45  ;;  %1107 = vrot.lane.b32.xlu1 %v3114_v40, %s2348_s28 }
 0x1d5   :  { %1105 = vrot.lane.b32.xlu0 %v3116_v41, %s2348_s28 }
 0x1d6   :  { %v850_v39 = vpop.permute.xlu1 %849 }
 0x1d7   :  { %v848_v38 = vpop.permute.xlu0 %847  ;;  %872 = vst.msk [vmem:[#allocation5 + $0x5] sm:$0x1] %vm838_vm6, %v850_v39 }
 0x1d8   :  { %871 = vst.msk [vmem:[#allocation5 + $0x1] sm:$0x1] %vm838_vm6, %v848_v38  ;;  %1111 = vrot.lane.b32.xlu1 %v3124_v48, %s2348_s28 }
 0x1d9   :  { %1109 = vrot.lane.b32.xlu0 %v3126_v49, %s2348_s28 }
 0x1da   :  { %v854_v52 = vpop.permute.xlu1 %853 }
 0x1db   :  { %v852_v53 = vpop.permute.xlu0 %851  ;;  %874 = vst.msk [vmem:[#allocation5 + $0xd] sm:$0x1] %vm838_vm6, %v854_v52 }
 0x1dc   :  { %873 = vst.msk [vmem:[#allocation5 + $0x9] sm:$0x1] %vm838_vm6, %v852_v53  ;;  %1115 = vrot.lane.b32.xlu1 %v3134_v43, %s2348_s28 }
 0x1dd   :  { %1113 = vrot.lane.b32.xlu0 %v3136_v42, %s2348_s28 }
 0x1de   :  { %v858_v54 = vpop.permute.xlu1 %857 }
 0x1df   :  { %v856_v55 = vpop.permute.xlu0 %855  ;;  %876 = vst.msk [vmem:[#allocation5 + $0x15] sm:$0x1] %vm838_vm6, %v858_v54 }
 0x1e0   :  { %875 = vst.msk [vmem:[#allocation5 + $0x11] sm:$0x1] %vm838_vm6, %v856_v55  ;;  %1119 = vrot.lane.b32.xlu1 %v3144_v46, %s2348_s28 }
 0x1e1   :  { %1117 = vrot.lane.b32.xlu0 %v3146_v47, %s2348_s28 }
 0x1e2   :  { %v862_v51 = vpop.permute.xlu1 %861 }
 0x1e3   :  { %v860_v56 = vpop.permute.xlu0 %859  ;;  %878 = vst.msk [vmem:[#allocation5 + $0x1d] sm:$0x1] %vm838_vm6, %v862_v51  ;;  %v3338_v51 = vld [vmem:[#allocation2 + $0x26] sm:$0x1] }
 0x1e4   :  { %877 = vst.msk [vmem:[#allocation5 + $0x19] sm:$0x1] %vm838_vm6, %v860_v56  ;;  %1140 = vrot.lane.b32.xlu1 %v3114_v40, %s2347_s27  ;;  %v3340_v56 = vld [vmem:[#allocation2 + $0x22] sm:$0x1] }
 0x1e5   :  { %1138 = vrot.lane.b32.xlu0 %v3116_v41, %s2347_s27 }
 0x1e6   :  { %v882_v50 = vpop.permute.xlu1 %881 }
 0x1e7   :  { %v880_v57 = vpop.permute.xlu0 %879  ;;  %904 = vst.msk [vmem:[#allocation5 + $0x6] sm:$0x1] %vm838_vm6, %v882_v50 }
 0x1e8   :  { %903 = vst.msk [vmem:[#allocation5 + $0x2] sm:$0x1] %vm838_vm6, %v880_v57  ;;  %1144 = vrot.lane.b32.xlu1 %v3124_v48, %s2347_s27 }
 0x1e9   :  { %1142 = vrot.lane.b32.xlu0 %v3126_v49, %s2347_s27 }
 0x1ea   :  { %v886_v58 = vpop.permute.xlu1 %885 }
 0x1eb   :  { %v884_v59 = vpop.permute.xlu0 %883  ;;  %906 = vst.msk [vmem:[#allocation5 + $0xe] sm:$0x1] %vm838_vm6, %v886_v58  ;;  %v3348_v58 = vld [vmem:[#allocation2 + $0x2e] sm:$0x1] }
 0x1ec   :  { %905 = vst.msk [vmem:[#allocation5 + $0xa] sm:$0x1] %vm838_vm6, %v884_v59  ;;  %1148 = vrot.lane.b32.xlu1 %v3134_v43, %s2347_s27  ;;  %v3350_v59 = vld [vmem:[#allocation2 + $0x2a] sm:$0x1] }
 0x1ed   :  { %1146 = vrot.lane.b32.xlu0 %v3136_v42, %s2347_s27 }
 0x1ee   :  { %v890_v60 = vpop.permute.xlu1 %889 }
 0x1ef   :  { %v888_v61 = vpop.permute.xlu0 %887  ;;  %908 = vst.msk [vmem:[#allocation5 + $0x16] sm:$0x1] %vm838_vm6, %v890_v60 }
 0x1f0   :  { %907 = vst.msk [vmem:[#allocation5 + $0x12] sm:$0x1] %vm838_vm6, %v888_v61  ;;  %1152 = vrot.lane.b32.xlu1 %v3144_v46, %s2347_s27 }
 0x1f1   :  { %1150 = vrot.lane.b32.xlu0 %v3146_v47, %s2347_s27 }
 0x1f2   :  { %v894_v62 = vpop.permute.xlu1 %893 }
 0x1f3   :  { %v892_v63 = vpop.permute.xlu0 %891  ;;  %910 = vst.msk [vmem:[#allocation5 + $0x1e] sm:$0x1] %vm838_vm6, %v894_v62  ;;  %v3358_v62 = vld [vmem:[#allocation2 + $0x66] sm:$0x1] }
 0x1f4   :  { %909 = vst.msk [vmem:[#allocation5 + $0x1a] sm:$0x1] %vm838_vm6, %v892_v63  ;;  %1172 = vrot.lane.b32.xlu1 %v3114_v40, %s2346_s26  ;;  %v3360_v63 = vld [vmem:[#allocation2 + $0x62] sm:$0x1] }
 0x1f5   :  { %1170 = vrot.lane.b32.xlu0 %v3116_v41, %s2346_s26 }
 0x1f6   :  { %v914_v0 = vpop.permute.xlu1 %913 }
 0x1f7   :  { %v912_v1 = vpop.permute.xlu0 %911  ;;  %936 = vst.msk [vmem:[#allocation5 + $0x7] sm:$0x1] %vm838_vm6, %v914_v0 }
 0x1f8   :  { %935 = vst.msk [vmem:[#allocation5 + $0x3] sm:$0x1] %vm838_vm6, %v912_v1  ;;  %1176 = vrot.lane.b32.xlu1 %v3124_v48, %s2346_s26 }
 0x1f9   :  { %1174 = vrot.lane.b32.xlu0 %v3126_v49, %s2346_s26 }
 0x1fa   :  { %v918_v2 = vpop.permute.xlu1 %917 }
 0x1fb   :  { %v916_v3 = vpop.permute.xlu0 %915  ;;  %938 = vst.msk [vmem:[#allocation5 + $0xf] sm:$0x1] %vm838_vm6, %v918_v2  ;;  %v3368_v2 = vld [vmem:[#allocation2 + $0x6e] sm:$0x1] }
 0x1fc   :  { %937 = vst.msk [vmem:[#allocation5 + $0xb] sm:$0x1] %vm838_vm6, %v916_v3  ;;  %1180 = vrot.lane.b32.xlu1 %v3134_v43, %s2346_s26  ;;  %v3370_v3 = vld [vmem:[#allocation2 + $0x6a] sm:$0x1] }
 0x1fd   :  { %1178 = vrot.lane.b32.xlu0 %v3136_v42, %s2346_s26 }
 0x1fe   :  { %v922_v4 = vpop.permute.xlu1 %921 }
 0x1ff   :  { %v920_v5 = vpop.permute.xlu0 %919  ;;  %940 = vst.msk [vmem:[#allocation5 + $0x17] sm:$0x1] %vm838_vm6, %v922_v4 }
 0x200   :  { %939 = vst.msk [vmem:[#allocation5 + $0x13] sm:$0x1] %vm838_vm6, %v920_v5  ;;  %1184 = vrot.lane.b32.xlu1 %v3144_v46, %s2346_s26 }
 0x201   :  { %1182 = vrot.lane.b32.xlu0 %v3146_v47, %s2346_s26 }
 0x202   :  { %v926_v6 = vpop.permute.xlu1 %925 }
 0x203   :  { %v924_v7 = vpop.permute.xlu0 %923  ;;  %942 = vst.msk [vmem:[#allocation5 + $0x1f] sm:$0x1] %vm838_vm6, %v926_v6 }
 0x204   :  { %941 = vst.msk [vmem:[#allocation5 + $0x1b] sm:$0x1] %vm838_vm6, %v924_v7  ;;  %1204 = vrot.lane.b32.xlu1 %v3114_v40, %s2345_s25 }
 0x205   :  { %1202 = vrot.lane.b32.xlu0 %v3116_v41, %s2345_s25 }
 0x206   :  { %v962_v8 = vpop.permute.xlu1 %961 }
 0x207   :  { %v960_v9 = vpop.permute.xlu0 %959  ;;  %985 = vst.msk [vmem:[#allocation5 + $0x4] sm:$0x1] %vm983_vm7, %v962_v8 }
 0x208   :  { %984 = vst.msk [vmem:[#allocation5] sm:$0x1] %vm983_vm7, %v960_v9  ;;  %1208 = vrot.lane.b32.xlu1 %v3124_v48, %s2345_s25 }
 0x209   :  { %1206 = vrot.lane.b32.xlu0 %v3126_v49, %s2345_s25 }
 0x20a   :  { %v966_v10 = vpop.permute.xlu1 %965 }
 0x20b   :  { %v964_v11 = vpop.permute.xlu0 %963  ;;  %987 = vst.msk [vmem:[#allocation5 + $0xc] sm:$0x1] %vm983_vm7, %v966_v10 }
 0x20c   :  { %986 = vst.msk [vmem:[#allocation5 + $0x8] sm:$0x1] %vm983_vm7, %v964_v11  ;;  %1212 = vrot.lane.b32.xlu1 %v3134_v43, %s2345_s25 }
 0x20d   :  { %1210 = vrot.lane.b32.xlu0 %v3136_v42, %s2345_s25 }
 0x20e   :  { %v970_v12 = vpop.permute.xlu1 %969 }
 0x20f   :  { %v968_v13 = vpop.permute.xlu0 %967  ;;  %989 = vst.msk [vmem:[#allocation5 + $0x14] sm:$0x1] %vm983_vm7, %v970_v12 }
 0x210   :  { %988 = vst.msk [vmem:[#allocation5 + $0x10] sm:$0x1] %vm983_vm7, %v968_v13  ;;  %1216 = vrot.lane.b32.xlu1 %v3144_v46, %s2345_s25 }
 0x211   :  { %1214 = vrot.lane.b32.xlu0 %v3146_v47, %s2345_s25 }
 0x212   :  { %v974_v16 = vpop.permute.xlu1 %973 }
 0x213   :  { %v972_v17 = vpop.permute.xlu0 %971  ;;  %991 = vst.msk [vmem:[#allocation5 + $0x1c] sm:$0x1] %vm983_vm7, %v974_v16 }
 0x214   :  { %990 = vst.msk [vmem:[#allocation5 + $0x18] sm:$0x1] %vm983_vm7, %v972_v17  ;;  %1252 = vrot.lane.b32.xlu1 %v3226_v14, %s2349_s29 }
 0x215   :  { %1250 = vrot.lane.b32.xlu0 %v3228_v15, %s2349_s29 }
 0x216   :  { %v995_v20 = vpop.permute.xlu1 %994 }
 0x217   :  { %v993_v21 = vpop.permute.xlu0 %992  ;;  %1017 = vst.msk [vmem:[#allocation5 + $0x5] sm:$0x1] %vm983_vm7, %v995_v20 }
 0x218   :  { %1016 = vst.msk [vmem:[#allocation5 + $0x1] sm:$0x1] %vm983_vm7, %v993_v21  ;;  %1256 = vrot.lane.b32.xlu1 %v3236_v18, %s2349_s29 }
 0x219   :  { %1254 = vrot.lane.b32.xlu0 %v3238_v19, %s2349_s29 }
 0x21a   :  { %v999_v24 = vpop.permute.xlu1 %998 }
 0x21b   :  { %v997_v25 = vpop.permute.xlu0 %996  ;;  %1019 = vst.msk [vmem:[#allocation5 + $0xd] sm:$0x1] %vm983_vm7, %v999_v24 }
 0x21c   :  { %1018 = vst.msk [vmem:[#allocation5 + $0x9] sm:$0x1] %vm983_vm7, %v997_v25  ;;  %1260 = vrot.lane.b32.xlu1 %v3246_v22, %s2349_s29 }
 0x21d   :  { %1258 = vrot.lane.b32.xlu0 %v3248_v23, %s2349_s29 }
 0x21e   :  { %v1003_v28 = vpop.permute.xlu1 %1002 }
 0x21f   :  { %v1001_v29 = vpop.permute.xlu0 %1000  ;;  %1021 = vst.msk [vmem:[#allocation5 + $0x15] sm:$0x1] %vm983_vm7, %v1003_v28 }
 0x220   :  { %1020 = vst.msk [vmem:[#allocation5 + $0x11] sm:$0x1] %vm983_vm7, %v1001_v29  ;;  %1264 = vrot.lane.b32.xlu1 %v3256_v26, %s2349_s29 }
 0x221   :  { %1262 = vrot.lane.b32.xlu0 %v3258_v27, %s2349_s29 }
 0x222   :  { %v1007_v30 = vpop.permute.xlu1 %1006 }
 0x223   :  { %v1005_v31 = vpop.permute.xlu0 %1004  ;;  %1023 = vst.msk [vmem:[#allocation5 + $0x1d] sm:$0x1] %vm983_vm7, %v1007_v30  ;;  %v3450_v30 = vld [vmem:[#allocation2 + $0x27] sm:$0x1] }
 0x224   :  { %1022 = vst.msk [vmem:[#allocation5 + $0x19] sm:$0x1] %vm983_vm7, %v1005_v31  ;;  %1285 = vrot.lane.b32.xlu1 %v3226_v14, %s2348_s28  ;;  %v3452_v31 = vld [vmem:[#allocation2 + $0x23] sm:$0x1] }
 0x225   :  { %1283 = vrot.lane.b32.xlu0 %v3228_v15, %s2348_s28 }
 0x226   :  { %v1027_v32 = vpop.permute.xlu1 %1026 }
 0x227   :  { %v1025_v33 = vpop.permute.xlu0 %1024  ;;  %1049 = vst.msk [vmem:[#allocation5 + $0x6] sm:$0x1] %vm983_vm7, %v1027_v32 }
 0x228   :  { %1048 = vst.msk [vmem:[#allocation5 + $0x2] sm:$0x1] %vm983_vm7, %v1025_v33  ;;  %1289 = vrot.lane.b32.xlu1 %v3236_v18, %s2348_s28 }
 0x229   :  { %1287 = vrot.lane.b32.xlu0 %v3238_v19, %s2348_s28 }
 0x22a   :  { %v1031_v34 = vpop.permute.xlu1 %1030 }
 0x22b   :  { %v1029_v35 = vpop.permute.xlu0 %1028  ;;  %1051 = vst.msk [vmem:[#allocation5 + $0xe] sm:$0x1] %vm983_vm7, %v1031_v34  ;;  %v3460_v34 = vld [vmem:[#allocation2 + $0x2f] sm:$0x1] }
 0x22c   :  { %1050 = vst.msk [vmem:[#allocation5 + $0xa] sm:$0x1] %vm983_vm7, %v1029_v35  ;;  %1293 = vrot.lane.b32.xlu1 %v3246_v22, %s2348_s28  ;;  %v3462_v35 = vld [vmem:[#allocation2 + $0x2b] sm:$0x1] }
 0x22d   :  { %1291 = vrot.lane.b32.xlu0 %v3248_v23, %s2348_s28 }
 0x22e   :  { %v1035_v36 = vpop.permute.xlu1 %1034 }
 0x22f   :  { %v1033_v37 = vpop.permute.xlu0 %1032  ;;  %1053 = vst.msk [vmem:[#allocation5 + $0x16] sm:$0x1] %vm983_vm7, %v1035_v36 }
 0x230   :  { %1052 = vst.msk [vmem:[#allocation5 + $0x12] sm:$0x1] %vm983_vm7, %v1033_v37  ;;  %1297 = vrot.lane.b32.xlu1 %v3256_v26, %s2348_s28 }
 0x231   :  { %1295 = vrot.lane.b32.xlu0 %v3258_v27, %s2348_s28 }
 0x232   :  { %v1039_v40 = vpop.permute.xlu1 %1038 }
 0x233   :  { %v1037_v41 = vpop.permute.xlu0 %1036  ;;  %1055 = vst.msk [vmem:[#allocation5 + $0x1e] sm:$0x1] %vm983_vm7, %v1039_v40  ;;  %v3470_v40 = vld [vmem:[#allocation2 + $0x67] sm:$0x1] }
 0x234   :  { %1054 = vst.msk [vmem:[#allocation5 + $0x1a] sm:$0x1] %vm983_vm7, %v1037_v41  ;;  %1317 = vrot.lane.b32.xlu1 %v3226_v14, %s2347_s27  ;;  %v3472_v41 = vld [vmem:[#allocation2 + $0x63] sm:$0x1] }
 0x235   :  { %1315 = vrot.lane.b32.xlu0 %v3228_v15, %s2347_s27 }
 0x236   :  { %v1059_v44 = vpop.permute.xlu1 %1058 }
 0x237   :  { %v1057_v45 = vpop.permute.xlu0 %1056  ;;  %1081 = vst.msk [vmem:[#allocation5 + $0x7] sm:$0x1] %vm983_vm7, %v1059_v44 }
 0x238   :  { %1080 = vst.msk [vmem:[#allocation5 + $0x3] sm:$0x1] %vm983_vm7, %v1057_v45  ;;  %1321 = vrot.lane.b32.xlu1 %v3236_v18, %s2347_s27 }
 0x239   :  { %1319 = vrot.lane.b32.xlu0 %v3238_v19, %s2347_s27 }
 0x23a   :  { %v1063_v48 = vpop.permute.xlu1 %1062 }
 0x23b   :  { %v1061_v49 = vpop.permute.xlu0 %1060  ;;  %1083 = vst.msk [vmem:[#allocation5 + $0xf] sm:$0x1] %vm983_vm7, %v1063_v48  ;;  %v3480_v48 = vld [vmem:[#allocation2 + $0x6f] sm:$0x1] }
 0x23c   :  { %1082 = vst.msk [vmem:[#allocation5 + $0xb] sm:$0x1] %vm983_vm7, %v1061_v49  ;;  %1325 = vrot.lane.b32.xlu1 %v3246_v22, %s2347_s27  ;;  %v3482_v49 = vld [vmem:[#allocation2 + $0x6b] sm:$0x1] }
 0x23d   :  { %1323 = vrot.lane.b32.xlu0 %v3248_v23, %s2347_s27 }
 0x23e   :  { %v1067_v39 = vpop.permute.xlu1 %1066 }
 0x23f   :  { %v1065_v38 = vpop.permute.xlu0 %1064  ;;  %1085 = vst.msk [vmem:[#allocation5 + $0x17] sm:$0x1] %vm983_vm7, %v1067_v39 }
 0x240   :  { %1084 = vst.msk [vmem:[#allocation5 + $0x13] sm:$0x1] %vm983_vm7, %v1065_v38  ;;  %1329 = vrot.lane.b32.xlu1 %v3256_v26, %s2347_s27 }
 0x241   :  { %1327 = vrot.lane.b32.xlu0 %v3258_v27, %s2347_s27 }
 0x242   :  { %v1071_v43 = vpop.permute.xlu1 %1070 }
 0x243   :  { %v1069_v42 = vpop.permute.xlu0 %1068  ;;  %1087 = vst.msk [vmem:[#allocation5 + $0x1f] sm:$0x1] %vm983_vm7, %v1071_v43 }
 0x244   :  { %1086 = vst.msk [vmem:[#allocation5 + $0x1b] sm:$0x1] %vm983_vm7, %v1069_v42  ;;  %1349 = vrot.lane.b32.xlu1 %v3226_v14, %s2346_s26 }
 0x245   :  { %1347 = vrot.lane.b32.xlu0 %v3228_v15, %s2346_s26 }
 0x246   :  { %v1108_v52 = vpop.permute.xlu1 %1107 }
 0x247   :  { %v1106_v53 = vpop.permute.xlu0 %1105  ;;  %1131 = vst.msk [vmem:[#allocation5 + $0x4] sm:$0x1] %vm1129_vm8, %v1108_v52 }
 0x248   :  { %1130 = vst.msk [vmem:[#allocation5] sm:$0x1] %vm1129_vm8, %v1106_v53  ;;  %1353 = vrot.lane.b32.xlu1 %v3236_v18, %s2346_s26 }
 0x249   :  { %1351 = vrot.lane.b32.xlu0 %v3238_v19, %s2346_s26 }
 0x24a   :  { %v1112_v46 = vpop.permute.xlu1 %1111 }
 0x24b   :  { %v1110_v47 = vpop.permute.xlu0 %1109  ;;  %1133 = vst.msk [vmem:[#allocation5 + $0xc] sm:$0x1] %vm1129_vm8, %v1112_v46 }
 0x24c   :  { %1132 = vst.msk [vmem:[#allocation5 + $0x8] sm:$0x1] %vm1129_vm8, %v1110_v47  ;;  %1357 = vrot.lane.b32.xlu1 %v3246_v22, %s2346_s26 }
 0x24d   :  { %1355 = vrot.lane.b32.xlu0 %v3248_v23, %s2346_s26 }
 0x24e   :  { %v1116_v54 = vpop.permute.xlu1 %1115 }
 0x24f   :  { %v1114_v55 = vpop.permute.xlu0 %1113  ;;  %1135 = vst.msk [vmem:[#allocation5 + $0x14] sm:$0x1] %vm1129_vm8, %v1116_v54 }
 0x250   :  { %1134 = vst.msk [vmem:[#allocation5 + $0x10] sm:$0x1] %vm1129_vm8, %v1114_v55  ;;  %1361 = vrot.lane.b32.xlu1 %v3256_v26, %s2346_s26 }
 0x251   :  { %1359 = vrot.lane.b32.xlu0 %v3258_v27, %s2346_s26 }
 0x252   :  { %v1120_v50 = vpop.permute.xlu1 %1119 }
 0x253   :  { %v1118_v57 = vpop.permute.xlu0 %1117  ;;  %1137 = vst.msk [vmem:[#allocation5 + $0x1c] sm:$0x1] %vm1129_vm8, %v1120_v50 }
 0x254   :  { %1136 = vst.msk [vmem:[#allocation5 + $0x18] sm:$0x1] %vm1129_vm8, %v1118_v57  ;;  %1397 = vrot.lane.b32.xlu1 %v3338_v51, %s2350_s30 }
 0x255   :  { %1395 = vrot.lane.b32.xlu0 %v3340_v56, %s2350_s30 }
 0x256   :  { %v1141_v60 = vpop.permute.xlu1 %1140 }
 0x257   :  { %v1139_v61 = vpop.permute.xlu0 %1138  ;;  %1163 = vst.msk [vmem:[#allocation5 + $0x5] sm:$0x1] %vm1129_vm8, %v1141_v60 }
 0x258   :  { %1162 = vst.msk [vmem:[#allocation5 + $0x1] sm:$0x1] %vm1129_vm8, %v1139_v61  ;;  %1401 = vrot.lane.b32.xlu1 %v3348_v58, %s2350_s30 }
 0x259   :  { %1399 = vrot.lane.b32.xlu0 %v3350_v59, %s2350_s30 }
 0x25a   :  { %v1145_v0 = vpop.permute.xlu1 %1144 }
 0x25b   :  { %v1143_v1 = vpop.permute.xlu0 %1142  ;;  %1165 = vst.msk [vmem:[#allocation5 + $0xd] sm:$0x1] %vm1129_vm8, %v1145_v0 }
 0x25c   :  { %1164 = vst.msk [vmem:[#allocation5 + $0x9] sm:$0x1] %vm1129_vm8, %v1143_v1  ;;  %1405 = vrot.lane.b32.xlu1 %v3358_v62, %s2350_s30 }
 0x25d   :  { %1403 = vrot.lane.b32.xlu0 %v3360_v63, %s2350_s30 }
 0x25e   :  { %v1149_v4 = vpop.permute.xlu1 %1148 }
 0x25f   :  { %v1147_v5 = vpop.permute.xlu0 %1146  ;;  %1167 = vst.msk [vmem:[#allocation5 + $0x15] sm:$0x1] %vm1129_vm8, %v1149_v4 }
 0x260   :  { %1166 = vst.msk [vmem:[#allocation5 + $0x11] sm:$0x1] %vm1129_vm8, %v1147_v5  ;;  %1409 = vrot.lane.b32.xlu1 %v3368_v2, %s2350_s30 }
 0x261   :  { %1407 = vrot.lane.b32.xlu0 %v3370_v3, %s2350_s30 }
 0x262   :  { %v1153_v6 = vpop.permute.xlu1 %1152 }
 0x263   :  { %v1151_v7 = vpop.permute.xlu0 %1150  ;;  %1169 = vst.msk [vmem:[#allocation5 + $0x1d] sm:$0x1] %vm1129_vm8, %v1153_v6  ;;  %v3562_v6 = vld [vmem:[#allocation2 + $0x34] sm:$0x1] }
 0x264   :  { %1168 = vst.msk [vmem:[#allocation5 + $0x19] sm:$0x1] %vm1129_vm8, %v1151_v7  ;;  %1430 = vrot.lane.b32.xlu1 %v3338_v51, %s2349_s29  ;;  %v3564_v7 = vld [vmem:[#allocation2 + $0x30] sm:$0x1] }
 0x265   :  { %1428 = vrot.lane.b32.xlu0 %v3340_v56, %s2349_s29 }
 0x266   :  { %v1173_v8 = vpop.permute.xlu1 %1172 }
 0x267   :  { %v1171_v9 = vpop.permute.xlu0 %1170  ;;  %1195 = vst.msk [vmem:[#allocation5 + $0x6] sm:$0x1] %vm1129_vm8, %v1173_v8 }
 0x268   :  { %1194 = vst.msk [vmem:[#allocation5 + $0x2] sm:$0x1] %vm1129_vm8, %v1171_v9  ;;  %1434 = vrot.lane.b32.xlu1 %v3348_v58, %s2349_s29 }
 0x269   :  { %1432 = vrot.lane.b32.xlu0 %v3350_v59, %s2349_s29 }
 0x26a   :  { %v1177_v10 = vpop.permute.xlu1 %1176 }
 0x26b   :  { %v1175_v11 = vpop.permute.xlu0 %1174  ;;  %1197 = vst.msk [vmem:[#allocation5 + $0xe] sm:$0x1] %vm1129_vm8, %v1177_v10  ;;  %v3572_v10 = vld [vmem:[#allocation2 + $0x3c] sm:$0x1] }
 0x26c   :  { %1196 = vst.msk [vmem:[#allocation5 + $0xa] sm:$0x1] %vm1129_vm8, %v1175_v11  ;;  %1438 = vrot.lane.b32.xlu1 %v3358_v62, %s2349_s29  ;;  %v3574_v11 = vld [vmem:[#allocation2 + $0x38] sm:$0x1] }
 0x26d   :  { %1436 = vrot.lane.b32.xlu0 %v3360_v63, %s2349_s29 }
 0x26e   :  { %v1181_v12 = vpop.permute.xlu1 %1180 }
 0x26f   :  { %v1179_v13 = vpop.permute.xlu0 %1178  ;;  %1199 = vst.msk [vmem:[#allocation5 + $0x16] sm:$0x1] %vm1129_vm8, %v1181_v12 }
 0x270   :  { %1198 = vst.msk [vmem:[#allocation5 + $0x12] sm:$0x1] %vm1129_vm8, %v1179_v13  ;;  %1442 = vrot.lane.b32.xlu1 %v3368_v2, %s2349_s29 }
 0x271   :  { %1440 = vrot.lane.b32.xlu0 %v3370_v3, %s2349_s29 }
 0x272   :  { %v1185_v14 = vpop.permute.xlu1 %1184 }
 0x273   :  { %v1183_v15 = vpop.permute.xlu0 %1182  ;;  %1201 = vst.msk [vmem:[#allocation5 + $0x1e] sm:$0x1] %vm1129_vm8, %v1185_v14  ;;  %v3582_v14 = vld [vmem:[#allocation2 + $0x74] sm:$0x1] }
 0x274   :  { %1200 = vst.msk [vmem:[#allocation5 + $0x1a] sm:$0x1] %vm1129_vm8, %v1183_v15  ;;  %1462 = vrot.lane.b32.xlu1 %v3338_v51, %s2348_s28  ;;  %v3584_v15 = vld [vmem:[#allocation2 + $0x70] sm:$0x1] }
 0x275   :  { %1460 = vrot.lane.b32.xlu0 %v3340_v56, %s2348_s28 }
 0x276   :  { %v1205_v16 = vpop.permute.xlu1 %1204 }
 0x277   :  { %v1203_v17 = vpop.permute.xlu0 %1202  ;;  %1227 = vst.msk [vmem:[#allocation5 + $0x7] sm:$0x1] %vm1129_vm8, %v1205_v16 }
 0x278   :  { %1226 = vst.msk [vmem:[#allocation5 + $0x3] sm:$0x1] %vm1129_vm8, %v1203_v17  ;;  %1466 = vrot.lane.b32.xlu1 %v3348_v58, %s2348_s28 }
 0x279   :  { %1464 = vrot.lane.b32.xlu0 %v3350_v59, %s2348_s28 }
 0x27a   :  { %v1209_v18 = vpop.permute.xlu1 %1208 }
 0x27b   :  { %v1207_v19 = vpop.permute.xlu0 %1206  ;;  %1229 = vst.msk [vmem:[#allocation5 + $0xf] sm:$0x1] %vm1129_vm8, %v1209_v18  ;;  %v3592_v18 = vld [vmem:[#allocation2 + $0x7c] sm:$0x1] }
 0x27c   :  { %1228 = vst.msk [vmem:[#allocation5 + $0xb] sm:$0x1] %vm1129_vm8, %v1207_v19  ;;  %1470 = vrot.lane.b32.xlu1 %v3358_v62, %s2348_s28  ;;  %v3594_v19 = vld [vmem:[#allocation2 + $0x78] sm:$0x1] }
 0x27d   :  { %1468 = vrot.lane.b32.xlu0 %v3360_v63, %s2348_s28 }
 0x27e   :  { %v1213_v20 = vpop.permute.xlu1 %1212 }
 0x27f   :  { %v1211_v21 = vpop.permute.xlu0 %1210  ;;  %1231 = vst.msk [vmem:[#allocation5 + $0x17] sm:$0x1] %vm1129_vm8, %v1213_v20 }
 0x280   :  { %1230 = vst.msk [vmem:[#allocation5 + $0x13] sm:$0x1] %vm1129_vm8, %v1211_v21  ;;  %1474 = vrot.lane.b32.xlu1 %v3368_v2, %s2348_s28 }
 0x281   :  { %1472 = vrot.lane.b32.xlu0 %v3370_v3, %s2348_s28 }
 0x282   :  { %v1217_v22 = vpop.permute.xlu1 %1216 }
 0x283   :  { %v1215_v23 = vpop.permute.xlu0 %1214  ;;  %1233 = vst.msk [vmem:[#allocation5 + $0x1f] sm:$0x1] %vm1129_vm8, %v1217_v22 }
 0x284   :  { %1232 = vst.msk [vmem:[#allocation5 + $0x1b] sm:$0x1] %vm1129_vm8, %v1215_v23  ;;  %1494 = vrot.lane.b32.xlu1 %v3338_v51, %s2347_s27 }
 0x285   :  { %1492 = vrot.lane.b32.xlu0 %v3340_v56, %s2347_s27 }
 0x286   :  { %v1253_v24 = vpop.permute.xlu1 %1252 }
 0x287   :  { %v1251_v25 = vpop.permute.xlu0 %1250  ;;  %1276 = vst.msk [vmem:[#allocation5 + $0x4] sm:$0x1] %vm1274_vm9, %v1253_v24 }
 0x288   :  { %1275 = vst.msk [vmem:[#allocation5] sm:$0x1] %vm1274_vm9, %v1251_v25  ;;  %1498 = vrot.lane.b32.xlu1 %v3348_v58, %s2347_s27 }
 0x289   :  { %1496 = vrot.lane.b32.xlu0 %v3350_v59, %s2347_s27 }
 0x28a   :  { %v1257_v26 = vpop.permute.xlu1 %1256 }
 0x28b   :  { %v1255_v27 = vpop.permute.xlu0 %1254  ;;  %1278 = vst.msk [vmem:[#allocation5 + $0xc] sm:$0x1] %vm1274_vm9, %v1257_v26 }
 0x28c   :  { %1277 = vst.msk [vmem:[#allocation5 + $0x8] sm:$0x1] %vm1274_vm9, %v1255_v27  ;;  %1502 = vrot.lane.b32.xlu1 %v3358_v62, %s2347_s27 }
 0x28d   :  { %1500 = vrot.lane.b32.xlu0 %v3360_v63, %s2347_s27 }
 0x28e   :  { %v1261_v28 = vpop.permute.xlu1 %1260 }
 0x28f   :  { %v1259_v29 = vpop.permute.xlu0 %1258  ;;  %1280 = vst.msk [vmem:[#allocation5 + $0x14] sm:$0x1] %vm1274_vm9, %v1261_v28 }
 0x290   :  { %1279 = vst.msk [vmem:[#allocation5 + $0x10] sm:$0x1] %vm1274_vm9, %v1259_v29  ;;  %1506 = vrot.lane.b32.xlu1 %v3368_v2, %s2347_s27 }
 0x291   :  { %1504 = vrot.lane.b32.xlu0 %v3370_v3, %s2347_s27 }
 0x292   :  { %v1265_v32 = vpop.permute.xlu1 %1264 }
 0x293   :  { %v1263_v33 = vpop.permute.xlu0 %1262  ;;  %1282 = vst.msk [vmem:[#allocation5 + $0x1c] sm:$0x1] %vm1274_vm9, %v1265_v32 }
 0x294   :  { %1281 = vst.msk [vmem:[#allocation5 + $0x18] sm:$0x1] %vm1274_vm9, %v1263_v33  ;;  %1542 = vrot.lane.b32.xlu1 %v3450_v30, %s2351_s2 }
 0x295   :  { %1540 = vrot.lane.b32.xlu0 %v3452_v31, %s2351_s2 }
 0x296   :  { %v1286_v36 = vpop.permute.xlu1 %1285 }
 0x297   :  { %v1284_v37 = vpop.permute.xlu0 %1283  ;;  %1308 = vst.msk [vmem:[#allocation5 + $0x5] sm:$0x1] %vm1274_vm9, %v1286_v36 }
 0x298   :  { %1307 = vst.msk [vmem:[#allocation5 + $0x1] sm:$0x1] %vm1274_vm9, %v1284_v37  ;;  %1546 = vrot.lane.b32.xlu1 %v3460_v34, %s2351_s2 }
 0x299   :  { %1544 = vrot.lane.b32.xlu0 %v3462_v35, %s2351_s2 }
 0x29a   :  { %v1290_v44 = vpop.permute.xlu1 %1289 }
 0x29b   :  { %v1288_v45 = vpop.permute.xlu0 %1287  ;;  %1310 = vst.msk [vmem:[#allocation5 + $0xd] sm:$0x1] %vm1274_vm9, %v1290_v44 }
 0x29c   :  { %1309 = vst.msk [vmem:[#allocation5 + $0x9] sm:$0x1] %vm1274_vm9, %v1288_v45  ;;  %1550 = vrot.lane.b32.xlu1 %v3470_v40, %s2351_s2 }
 0x29d   :  { %1548 = vrot.lane.b32.xlu0 %v3472_v41, %s2351_s2 }
 0x29e   :  { %v1294_v39 = vpop.permute.xlu1 %1293 }
 0x29f   :  { %v1292_v38 = vpop.permute.xlu0 %1291  ;;  %1312 = vst.msk [vmem:[#allocation5 + $0x15] sm:$0x1] %vm1274_vm9, %v1294_v39 }
 0x2a0   :  { %1311 = vst.msk [vmem:[#allocation5 + $0x11] sm:$0x1] %vm1274_vm9, %v1292_v38  ;;  %1554 = vrot.lane.b32.xlu1 %v3480_v48, %s2351_s2 }
 0x2a1   :  { %1552 = vrot.lane.b32.xlu0 %v3482_v49, %s2351_s2 }
 0x2a2   :  { %v1298_v43 = vpop.permute.xlu1 %1297 }
 0x2a3   :  { %v1296_v42 = vpop.permute.xlu0 %1295  ;;  %1314 = vst.msk [vmem:[#allocation5 + $0x1d] sm:$0x1] %vm1274_vm9, %v1298_v43  ;;  %v3674_v43 = vld [vmem:[#allocation2 + $0x35] sm:$0x1] }
 0x2a4   :  { %1313 = vst.msk [vmem:[#allocation5 + $0x19] sm:$0x1] %vm1274_vm9, %v1296_v42  ;;  %1575 = vrot.lane.b32.xlu1 %v3450_v30, %s2350_s30  ;;  %v3676_v42 = vld [vmem:[#allocation2 + $0x31] sm:$0x1] }
 0x2a5   :  { %1573 = vrot.lane.b32.xlu0 %v3452_v31, %s2350_s30 }
 0x2a6   :  { %v1318_v52 = vpop.permute.xlu1 %1317 }
 0x2a7   :  { %v1316_v53 = vpop.permute.xlu0 %1315  ;;  %1340 = vst.msk [vmem:[#allocation5 + $0x6] sm:$0x1] %vm1274_vm9, %v1318_v52 }
 0x2a8   :  { %1339 = vst.msk [vmem:[#allocation5 + $0x2] sm:$0x1] %vm1274_vm9, %v1316_v53  ;;  %1579 = vrot.lane.b32.xlu1 %v3460_v34, %s2350_s30 }
 0x2a9   :  { %1577 = vrot.lane.b32.xlu0 %v3462_v35, %s2350_s30 }
 0x2aa   :  { %v1322_v46 = vpop.permute.xlu1 %1321 }
 0x2ab   :  { %v1320_v47 = vpop.permute.xlu0 %1319  ;;  %1342 = vst.msk [vmem:[#allocation5 + $0xe] sm:$0x1] %vm1274_vm9, %v1322_v46  ;;  %v3684_v46 = vld [vmem:[#allocation2 + $0x3d] sm:$0x1] }
 0x2ac   :  { %1341 = vst.msk [vmem:[#allocation5 + $0xa] sm:$0x1] %vm1274_vm9, %v1320_v47  ;;  %1583 = vrot.lane.b32.xlu1 %v3470_v40, %s2350_s30  ;;  %v3686_v47 = vld [vmem:[#allocation2 + $0x39] sm:$0x1] }
 0x2ad   :  { %1581 = vrot.lane.b32.xlu0 %v3472_v41, %s2350_s30 }
 0x2ae   :  { %v1326_v54 = vpop.permute.xlu1 %1325 }
 0x2af   :  { %v1324_v55 = vpop.permute.xlu0 %1323  ;;  %1344 = vst.msk [vmem:[#allocation5 + $0x16] sm:$0x1] %vm1274_vm9, %v1326_v54 }
 0x2b0   :  { %1343 = vst.msk [vmem:[#allocation5 + $0x12] sm:$0x1] %vm1274_vm9, %v1324_v55  ;;  %1587 = vrot.lane.b32.xlu1 %v3480_v48, %s2350_s30 }
 0x2b1   :  { %1585 = vrot.lane.b32.xlu0 %v3482_v49, %s2350_s30 }
 0x2b2   :  { %v1330_v51 = vpop.permute.xlu1 %1329 }
 0x2b3   :  { %v1328_v56 = vpop.permute.xlu0 %1327  ;;  %1346 = vst.msk [vmem:[#allocation5 + $0x1e] sm:$0x1] %vm1274_vm9, %v1330_v51  ;;  %v3694_v51 = vld [vmem:[#allocation2 + $0x75] sm:$0x1] }
 0x2b4   :  { %1345 = vst.msk [vmem:[#allocation5 + $0x1a] sm:$0x1] %vm1274_vm9, %v1328_v56  ;;  %1607 = vrot.lane.b32.xlu1 %v3450_v30, %s2349_s29  ;;  %v3696_v56 = vld [vmem:[#allocation2 + $0x71] sm:$0x1] }
 0x2b5   :  { %1605 = vrot.lane.b32.xlu0 %v3452_v31, %s2349_s29 }
 0x2b6   :  { %v1350_v50 = vpop.permute.xlu1 %1349 }
 0x2b7   :  { %v1348_v57 = vpop.permute.xlu0 %1347  ;;  %1372 = vst.msk [vmem:[#allocation5 + $0x7] sm:$0x1] %vm1274_vm9, %v1350_v50 }
 0x2b8   :  { %1371 = vst.msk [vmem:[#allocation5 + $0x3] sm:$0x1] %vm1274_vm9, %v1348_v57  ;;  %1611 = vrot.lane.b32.xlu1 %v3460_v34, %s2349_s29 }
 0x2b9   :  { %1609 = vrot.lane.b32.xlu0 %v3462_v35, %s2349_s29 }
 0x2ba   :  { %v1354_v58 = vpop.permute.xlu1 %1353 }
 0x2bb   :  { %v1352_v59 = vpop.permute.xlu0 %1351  ;;  %1374 = vst.msk [vmem:[#allocation5 + $0xf] sm:$0x1] %vm1274_vm9, %v1354_v58  ;;  %v3704_v58 = vld [vmem:[#allocation2 + $0x7d] sm:$0x1] }
 0x2bc   :  { %1373 = vst.msk [vmem:[#allocation5 + $0xb] sm:$0x1] %vm1274_vm9, %v1352_v59  ;;  %1615 = vrot.lane.b32.xlu1 %v3470_v40, %s2349_s29  ;;  %v3706_v59 = vld [vmem:[#allocation2 + $0x79] sm:$0x1] }
 0x2bd   :  { %1613 = vrot.lane.b32.xlu0 %v3472_v41, %s2349_s29 }
 0x2be   :  { %v1358_v60 = vpop.permute.xlu1 %1357 }
 0x2bf   :  { %v1356_v61 = vpop.permute.xlu0 %1355  ;;  %1376 = vst.msk [vmem:[#allocation5 + $0x17] sm:$0x1] %vm1274_vm9, %v1358_v60 }
 0x2c0   :  { %1375 = vst.msk [vmem:[#allocation5 + $0x13] sm:$0x1] %vm1274_vm9, %v1356_v61  ;;  %1619 = vrot.lane.b32.xlu1 %v3480_v48, %s2349_s29 }
 0x2c1   :  { %1617 = vrot.lane.b32.xlu0 %v3482_v49, %s2349_s29 }
 0x2c2   :  { %v1362_v62 = vpop.permute.xlu1 %1361 }
 0x2c3   :  { %v1360_v63 = vpop.permute.xlu0 %1359  ;;  %1378 = vst.msk [vmem:[#allocation5 + $0x1f] sm:$0x1] %vm1274_vm9, %v1362_v62 }
 0x2c4   :  { %1377 = vst.msk [vmem:[#allocation5 + $0x1b] sm:$0x1] %vm1274_vm9, %v1360_v63  ;;  %1639 = vrot.lane.b32.xlu1 %v3450_v30, %s2348_s28 }
 0x2c5   :  { %1637 = vrot.lane.b32.xlu0 %v3452_v31, %s2348_s28 }
 0x2c6   :  { %v1398_v0 = vpop.permute.xlu1 %1397 }
 0x2c7   :  { %v1396_v1 = vpop.permute.xlu0 %1395  ;;  %1421 = vst.msk [vmem:[#allocation5 + $0x4] sm:$0x1] %vm1419_vm10, %v1398_v0 }
 0x2c8   :  { %1420 = vst.msk [vmem:[#allocation5] sm:$0x1] %vm1419_vm10, %v1396_v1  ;;  %1643 = vrot.lane.b32.xlu1 %v3460_v34, %s2348_s28 }
 0x2c9   :  { %1641 = vrot.lane.b32.xlu0 %v3462_v35, %s2348_s28 }
 0x2ca   :  { %v1402_v2 = vpop.permute.xlu1 %1401 }
 0x2cb   :  { %v1400_v3 = vpop.permute.xlu0 %1399  ;;  %1423 = vst.msk [vmem:[#allocation5 + $0xc] sm:$0x1] %vm1419_vm10, %v1402_v2 }
 0x2cc   :  { %1422 = vst.msk [vmem:[#allocation5 + $0x8] sm:$0x1] %vm1419_vm10, %v1400_v3  ;;  %1647 = vrot.lane.b32.xlu1 %v3470_v40, %s2348_s28 }
 0x2cd   :  { %1645 = vrot.lane.b32.xlu0 %v3472_v41, %s2348_s28 }
 0x2ce   :  { %v1406_v4 = vpop.permute.xlu1 %1405 }
 0x2cf   :  { %v1404_v5 = vpop.permute.xlu0 %1403  ;;  %1425 = vst.msk [vmem:[#allocation5 + $0x14] sm:$0x1] %vm1419_vm10, %v1406_v4 }
 0x2d0   :  { %1424 = vst.msk [vmem:[#allocation5 + $0x10] sm:$0x1] %vm1419_vm10, %v1404_v5  ;;  %1651 = vrot.lane.b32.xlu1 %v3480_v48, %s2348_s28 }
 0x2d1   :  { %1649 = vrot.lane.b32.xlu0 %v3482_v49, %s2348_s28 }
 0x2d2   :  { %v1410_v8 = vpop.permute.xlu1 %1409 }
 0x2d3   :  { %v1408_v9 = vpop.permute.xlu0 %1407  ;;  %1427 = vst.msk [vmem:[#allocation5 + $0x1c] sm:$0x1] %vm1419_vm10, %v1410_v8 }
 0x2d4   :  { %1426 = vst.msk [vmem:[#allocation5 + $0x18] sm:$0x1] %vm1419_vm10, %v1408_v9  ;;  %1688 = vrot.lane.b32.xlu1 %v3562_v6, %s2352_s3 }
 0x2d5   :  { %1686 = vrot.lane.b32.xlu0 %v3564_v7, %s2352_s3 }
 0x2d6   :  { %v1431_v12 = vpop.permute.xlu1 %1430 }
 0x2d7   :  { %v1429_v13 = vpop.permute.xlu0 %1428  ;;  %1453 = vst.msk [vmem:[#allocation5 + $0x5] sm:$0x1] %vm1419_vm10, %v1431_v12 }
 0x2d8   :  { %1452 = vst.msk [vmem:[#allocation5 + $0x1] sm:$0x1] %vm1419_vm10, %v1429_v13  ;;  %1692 = vrot.lane.b32.xlu1 %v3572_v10, %s2352_s3 }
 0x2d9   :  { %1690 = vrot.lane.b32.xlu0 %v3574_v11, %s2352_s3 }
 0x2da   :  { %v1435_v16 = vpop.permute.xlu1 %1434 }
 0x2db   :  { %v1433_v17 = vpop.permute.xlu0 %1432  ;;  %1455 = vst.msk [vmem:[#allocation5 + $0xd] sm:$0x1] %vm1419_vm10, %v1435_v16 }
 0x2dc   :  { %1454 = vst.msk [vmem:[#allocation5 + $0x9] sm:$0x1] %vm1419_vm10, %v1433_v17  ;;  %1696 = vrot.lane.b32.xlu1 %v3582_v14, %s2352_s3 }
 0x2dd   :  { %1694 = vrot.lane.b32.xlu0 %v3584_v15, %s2352_s3 }
 0x2de   :  { %v1439_v20 = vpop.permute.xlu1 %1438 }
 0x2df   :  { %v1437_v21 = vpop.permute.xlu0 %1436  ;;  %1457 = vst.msk [vmem:[#allocation5 + $0x15] sm:$0x1] %vm1419_vm10, %v1439_v20 }
 0x2e0   :  { %1456 = vst.msk [vmem:[#allocation5 + $0x11] sm:$0x1] %vm1419_vm10, %v1437_v21  ;;  %1700 = vrot.lane.b32.xlu1 %v3592_v18, %s2352_s3 }
 0x2e1   :  { %1698 = vrot.lane.b32.xlu0 %v3594_v19, %s2352_s3 }
 0x2e2   :  { %v1443_v22 = vpop.permute.xlu1 %1442 }
 0x2e3   :  { %v1441_v23 = vpop.permute.xlu0 %1440  ;;  %1459 = vst.msk [vmem:[#allocation5 + $0x1d] sm:$0x1] %vm1419_vm10, %v1443_v22  ;;  %v3786_v22 = vld [vmem:[#allocation2 + $0x36] sm:$0x1] }
 0x2e4   :  { %1458 = vst.msk [vmem:[#allocation5 + $0x19] sm:$0x1] %vm1419_vm10, %v1441_v23  ;;  %1721 = vrot.lane.b32.xlu1 %v3562_v6, %s2351_s2  ;;  %v3788_v23 = vld [vmem:[#allocation2 + $0x32] sm:$0x1] }
 0x2e5   :  { %1719 = vrot.lane.b32.xlu0 %v3564_v7, %s2351_s2 }
 0x2e6   :  { %v1463_v24 = vpop.permute.xlu1 %1462 }
 0x2e7   :  { %v1461_v25 = vpop.permute.xlu0 %1460  ;;  %1485 = vst.msk [vmem:[#allocation5 + $0x6] sm:$0x1] %vm1419_vm10, %v1463_v24 }
 0x2e8   :  { %1484 = vst.msk [vmem:[#allocation5 + $0x2] sm:$0x1] %vm1419_vm10, %v1461_v25  ;;  %1725 = vrot.lane.b32.xlu1 %v3572_v10, %s2351_s2 }
 0x2e9   :  { %1723 = vrot.lane.b32.xlu0 %v3574_v11, %s2351_s2 }
 0x2ea   :  { %v1467_v26 = vpop.permute.xlu1 %1466 }
 0x2eb   :  { %v1465_v27 = vpop.permute.xlu0 %1464  ;;  %1487 = vst.msk [vmem:[#allocation5 + $0xe] sm:$0x1] %vm1419_vm10, %v1467_v26  ;;  %v3796_v26 = vld [vmem:[#allocation2 + $0x3e] sm:$0x1] }
 0x2ec   :  { %1486 = vst.msk [vmem:[#allocation5 + $0xa] sm:$0x1] %vm1419_vm10, %v1465_v27  ;;  %1729 = vrot.lane.b32.xlu1 %v3582_v14, %s2351_s2  ;;  %v3798_v27 = vld [vmem:[#allocation2 + $0x3a] sm:$0x1] }
 0x2ed   :  { %1727 = vrot.lane.b32.xlu0 %v3584_v15, %s2351_s2 }
 0x2ee   :  { %v1471_v28 = vpop.permute.xlu1 %1470 }
 0x2ef   :  { %v1469_v29 = vpop.permute.xlu0 %1468  ;;  %1489 = vst.msk [vmem:[#allocation5 + $0x16] sm:$0x1] %vm1419_vm10, %v1471_v28 }
 0x2f0   :  { %1488 = vst.msk [vmem:[#allocation5 + $0x12] sm:$0x1] %vm1419_vm10, %v1469_v29  ;;  %1733 = vrot.lane.b32.xlu1 %v3592_v18, %s2351_s2 }
 0x2f1   :  { %1731 = vrot.lane.b32.xlu0 %v3594_v19, %s2351_s2 }
 0x2f2   :  { %v1475_v30 = vpop.permute.xlu1 %1474 }
 0x2f3   :  { %v1473_v31 = vpop.permute.xlu0 %1472  ;;  %1491 = vst.msk [vmem:[#allocation5 + $0x1e] sm:$0x1] %vm1419_vm10, %v1475_v30  ;;  %v3806_v30 = vld [vmem:[#allocation2 + $0x76] sm:$0x1] }
 0x2f4   :  { %1490 = vst.msk [vmem:[#allocation5 + $0x1a] sm:$0x1] %vm1419_vm10, %v1473_v31  ;;  %1753 = vrot.lane.b32.xlu1 %v3562_v6, %s2350_s30  ;;  %v3808_v31 = vld [vmem:[#allocation2 + $0x72] sm:$0x1] }
 0x2f5   :  { %1751 = vrot.lane.b32.xlu0 %v3564_v7, %s2350_s30 }
 0x2f6   :  { %v1495_v32 = vpop.permute.xlu1 %1494 }
 0x2f7   :  { %v1493_v33 = vpop.permute.xlu0 %1492  ;;  %1517 = vst.msk [vmem:[#allocation5 + $0x7] sm:$0x1] %vm1419_vm10, %v1495_v32 }
 0x2f8   :  { %1516 = vst.msk [vmem:[#allocation5 + $0x3] sm:$0x1] %vm1419_vm10, %v1493_v33  ;;  %1757 = vrot.lane.b32.xlu1 %v3572_v10, %s2350_s30 }
 0x2f9   :  { %1755 = vrot.lane.b32.xlu0 %v3574_v11, %s2350_s30 }
 0x2fa   :  { %v1499_v34 = vpop.permute.xlu1 %1498 }
 0x2fb   :  { %v1497_v35 = vpop.permute.xlu0 %1496  ;;  %1519 = vst.msk [vmem:[#allocation5 + $0xf] sm:$0x1] %vm1419_vm10, %v1499_v34  ;;  %v3816_v34 = vld [vmem:[#allocation2 + $0x7e] sm:$0x1] }
 0x2fc   :  { %1518 = vst.msk [vmem:[#allocation5 + $0xb] sm:$0x1] %vm1419_vm10, %v1497_v35  ;;  %1761 = vrot.lane.b32.xlu1 %v3582_v14, %s2350_s30  ;;  %v3818_v35 = vld [vmem:[#allocation2 + $0x7a] sm:$0x1] }
 0x2fd   :  { %1759 = vrot.lane.b32.xlu0 %v3584_v15, %s2350_s30 }
 0x2fe   :  { %v1503_v36 = vpop.permute.xlu1 %1502 }
 0x2ff   :  { %v1501_v37 = vpop.permute.xlu0 %1500  ;;  %1521 = vst.msk [vmem:[#allocation5 + $0x17] sm:$0x1] %vm1419_vm10, %v1503_v36 }
 0x300   :  { %1520 = vst.msk [vmem:[#allocation5 + $0x13] sm:$0x1] %vm1419_vm10, %v1501_v37  ;;  %1765 = vrot.lane.b32.xlu1 %v3592_v18, %s2350_s30 }
 0x301   :  { %1763 = vrot.lane.b32.xlu0 %v3594_v19, %s2350_s30 }
 0x302   :  { %v1507_v40 = vpop.permute.xlu1 %1506 }
 0x303   :  { %v1505_v41 = vpop.permute.xlu0 %1504  ;;  %1523 = vst.msk [vmem:[#allocation5 + $0x1f] sm:$0x1] %vm1419_vm10, %v1507_v40 }
 0x304   :  { %1522 = vst.msk [vmem:[#allocation5 + $0x1b] sm:$0x1] %vm1419_vm10, %v1505_v41  ;;  %1785 = vrot.lane.b32.xlu1 %v3562_v6, %s2349_s29 }
 0x305   :  { %1783 = vrot.lane.b32.xlu0 %v3564_v7, %s2349_s29 }
 0x306   :  { %v1543_v44 = vpop.permute.xlu1 %1542 }
 0x307   :  { %v1541_v45 = vpop.permute.xlu0 %1540  ;;  %1566 = vst.msk [vmem:[#allocation5 + $0x4] sm:$0x1] %vm1564_vm11, %v1543_v44 }
 0x308   :  { %1565 = vst.msk [vmem:[#allocation5] sm:$0x1] %vm1564_vm11, %v1541_v45  ;;  %1789 = vrot.lane.b32.xlu1 %v3572_v10, %s2349_s29 }
 0x309   :  { %1787 = vrot.lane.b32.xlu0 %v3574_v11, %s2349_s29 }
 0x30a   :  { %v1547_v48 = vpop.permute.xlu1 %1546 }
 0x30b   :  { %v1545_v49 = vpop.permute.xlu0 %1544  ;;  %1568 = vst.msk [vmem:[#allocation5 + $0xc] sm:$0x1] %vm1564_vm11, %v1547_v48 }
 0x30c   :  { %1567 = vst.msk [vmem:[#allocation5 + $0x8] sm:$0x1] %vm1564_vm11, %v1545_v49  ;;  %1793 = vrot.lane.b32.xlu1 %v3582_v14, %s2349_s29 }
 0x30d   :  { %1791 = vrot.lane.b32.xlu0 %v3584_v15, %s2349_s29 }
 0x30e   :  { %v1551_v39 = vpop.permute.xlu1 %1550 }
 0x30f   :  { %v1549_v38 = vpop.permute.xlu0 %1548  ;;  %1570 = vst.msk [vmem:[#allocation5 + $0x14] sm:$0x1] %vm1564_vm11, %v1551_v39 }
 0x310   :  { %1569 = vst.msk [vmem:[#allocation5 + $0x10] sm:$0x1] %vm1564_vm11, %v1549_v38  ;;  %1797 = vrot.lane.b32.xlu1 %v3592_v18, %s2349_s29 }
 0x311   :  { %1795 = vrot.lane.b32.xlu0 %v3594_v19, %s2349_s29 }
 0x312   :  { %v1555_v52 = vpop.permute.xlu1 %1554 }
 0x313   :  { %v1553_v53 = vpop.permute.xlu0 %1552  ;;  %1572 = vst.msk [vmem:[#allocation5 + $0x1c] sm:$0x1] %vm1564_vm11, %v1555_v52 }
 0x314   :  { %1571 = vst.msk [vmem:[#allocation5 + $0x18] sm:$0x1] %vm1564_vm11, %v1553_v53  ;;  %1833 = vrot.lane.b32.xlu1 %v3674_v43, %s2353_s4 }
 0x315   :  { %1831 = vrot.lane.b32.xlu0 %v3676_v42, %s2353_s4 }
 0x316   :  { %v1576_v54 = vpop.permute.xlu1 %1575 }
 0x317   :  { %v1574_v55 = vpop.permute.xlu0 %1573  ;;  %1598 = vst.msk [vmem:[#allocation5 + $0x5] sm:$0x1] %vm1564_vm11, %v1576_v54 }
 0x318   :  { %1597 = vst.msk [vmem:[#allocation5 + $0x1] sm:$0x1] %vm1564_vm11, %v1574_v55  ;;  %1837 = vrot.lane.b32.xlu1 %v3684_v46, %s2353_s4 }
 0x319   :  { %1835 = vrot.lane.b32.xlu0 %v3686_v47, %s2353_s4 }
 0x31a   :  { %v1580_v50 = vpop.permute.xlu1 %1579 }
 0x31b   :  { %v1578_v57 = vpop.permute.xlu0 %1577  ;;  %1600 = vst.msk [vmem:[#allocation5 + $0xd] sm:$0x1] %vm1564_vm11, %v1580_v50 }
 0x31c   :  { %1599 = vst.msk [vmem:[#allocation5 + $0x9] sm:$0x1] %vm1564_vm11, %v1578_v57  ;;  %1841 = vrot.lane.b32.xlu1 %v3694_v51, %s2353_s4 }
 0x31d   :  { %1839 = vrot.lane.b32.xlu0 %v3696_v56, %s2353_s4 }
 0x31e   :  { %v1584_v60 = vpop.permute.xlu1 %1583 }
 0x31f   :  { %v1582_v61 = vpop.permute.xlu0 %1581  ;;  %1602 = vst.msk [vmem:[#allocation5 + $0x15] sm:$0x1] %vm1564_vm11, %v1584_v60 }
 0x320   :  { %1601 = vst.msk [vmem:[#allocation5 + $0x11] sm:$0x1] %vm1564_vm11, %v1582_v61  ;;  %1845 = vrot.lane.b32.xlu1 %v3704_v58, %s2353_s4 }
 0x321   :  { %1843 = vrot.lane.b32.xlu0 %v3706_v59, %s2353_s4 }
 0x322   :  { %v1588_v62 = vpop.permute.xlu1 %1587 }
 0x323   :  { %v1586_v63 = vpop.permute.xlu0 %1585  ;;  %1604 = vst.msk [vmem:[#allocation5 + $0x1d] sm:$0x1] %vm1564_vm11, %v1588_v62  ;;  %v3898_v62 = vld [vmem:[#allocation2 + $0x37] sm:$0x1] }
 0x324   :  { %1603 = vst.msk [vmem:[#allocation5 + $0x19] sm:$0x1] %vm1564_vm11, %v1586_v63  ;;  %1866 = vrot.lane.b32.xlu1 %v3674_v43, %s2352_s3  ;;  %v3900_v63 = vld [vmem:[#allocation2 + $0x33] sm:$0x1] }
 0x325   :  { %1864 = vrot.lane.b32.xlu0 %v3676_v42, %s2352_s3 }
 0x326   :  { %v1608_v0 = vpop.permute.xlu1 %1607 }
 0x327   :  { %v1606_v1 = vpop.permute.xlu0 %1605  ;;  %1630 = vst.msk [vmem:[#allocation5 + $0x6] sm:$0x1] %vm1564_vm11, %v1608_v0 }
 0x328   :  { %1629 = vst.msk [vmem:[#allocation5 + $0x2] sm:$0x1] %vm1564_vm11, %v1606_v1  ;;  %1870 = vrot.lane.b32.xlu1 %v3684_v46, %s2352_s3 }
 0x329   :  { %1868 = vrot.lane.b32.xlu0 %v3686_v47, %s2352_s3 }
 0x32a   :  { %v1612_v2 = vpop.permute.xlu1 %1611 }
 0x32b   :  { %v1610_v3 = vpop.permute.xlu0 %1609  ;;  %1632 = vst.msk [vmem:[#allocation5 + $0xe] sm:$0x1] %vm1564_vm11, %v1612_v2  ;;  %v3906_v2 = vld [vmem:[#allocation2 + $0x3f] sm:$0x1] }
 0x32c   :  { %1631 = vst.msk [vmem:[#allocation5 + $0xa] sm:$0x1] %vm1564_vm11, %v1610_v3  ;;  %1874 = vrot.lane.b32.xlu1 %v3694_v51, %s2352_s3  ;;  %v3908_v3 = vld [vmem:[#allocation2 + $0x3b] sm:$0x1] }
 0x32d   :  { %1872 = vrot.lane.b32.xlu0 %v3696_v56, %s2352_s3 }
 0x32e   :  { %v1616_v4 = vpop.permute.xlu1 %1615 }
 0x32f   :  { %v1614_v5 = vpop.permute.xlu0 %1613  ;;  %1634 = vst.msk [vmem:[#allocation5 + $0x16] sm:$0x1] %vm1564_vm11, %v1616_v4 }
 0x330   :  { %1633 = vst.msk [vmem:[#allocation5 + $0x12] sm:$0x1] %vm1564_vm11, %v1614_v5  ;;  %1878 = vrot.lane.b32.xlu1 %v3704_v58, %s2352_s3 }
 0x331   :  { %1876 = vrot.lane.b32.xlu0 %v3706_v59, %s2352_s3 }
 0x332   :  { %v1620_v6 = vpop.permute.xlu1 %1619 }
 0x333   :  { %v1618_v7 = vpop.permute.xlu0 %1617  ;;  %1636 = vst.msk [vmem:[#allocation5 + $0x1e] sm:$0x1] %vm1564_vm11, %v1620_v6  ;;  %v3914_v6 = vld [vmem:[#allocation2 + $0x77] sm:$0x1] }
 0x334   :  { %1635 = vst.msk [vmem:[#allocation5 + $0x1a] sm:$0x1] %vm1564_vm11, %v1618_v7  ;;  %1898 = vrot.lane.b32.xlu1 %v3674_v43, %s2351_s2  ;;  %v3916_v7 = vld [vmem:[#allocation2 + $0x73] sm:$0x1] }
 0x335   :  { %1896 = vrot.lane.b32.xlu0 %v3676_v42, %s2351_s2 }
 0x336   :  { %v1640_v8 = vpop.permute.xlu1 %1639 }
 0x337   :  { %v1638_v9 = vpop.permute.xlu0 %1637  ;;  %1662 = vst.msk [vmem:[#allocation5 + $0x7] sm:$0x1] %vm1564_vm11, %v1640_v8 }
 0x338   :  { %1661 = vst.msk [vmem:[#allocation5 + $0x3] sm:$0x1] %vm1564_vm11, %v1638_v9  ;;  %1902 = vrot.lane.b32.xlu1 %v3684_v46, %s2351_s2 }
 0x339   :  { %1900 = vrot.lane.b32.xlu0 %v3686_v47, %s2351_s2 }
 0x33a   :  { %v1644_v10 = vpop.permute.xlu1 %1643 }
 0x33b   :  { %v1642_v11 = vpop.permute.xlu0 %1641  ;;  %1664 = vst.msk [vmem:[#allocation5 + $0xf] sm:$0x1] %vm1564_vm11, %v1644_v10  ;;  %v3922_v10 = vld [vmem:[#allocation2 + $0x7f] sm:$0x1] }
 0x33c   :  { %1663 = vst.msk [vmem:[#allocation5 + $0xb] sm:$0x1] %vm1564_vm11, %v1642_v11  ;;  %1906 = vrot.lane.b32.xlu1 %v3694_v51, %s2351_s2  ;;  %v3924_v11 = vld [vmem:[#allocation2 + $0x7b] sm:$0x1] }
 0x33d   :  { %1904 = vrot.lane.b32.xlu0 %v3696_v56, %s2351_s2 }
 0x33e   :  { %v1648_v12 = vpop.permute.xlu1 %1647 }
 0x33f   :  { %v1646_v13 = vpop.permute.xlu0 %1645  ;;  %1666 = vst.msk [vmem:[#allocation5 + $0x17] sm:$0x1] %vm1564_vm11, %v1648_v12 }
 0x340   :  { %1665 = vst.msk [vmem:[#allocation5 + $0x13] sm:$0x1] %vm1564_vm11, %v1646_v13  ;;  %1910 = vrot.lane.b32.xlu1 %v3704_v58, %s2351_s2 }
 0x341   :  { %1908 = vrot.lane.b32.xlu0 %v3706_v59, %s2351_s2 }
 0x342   :  { %v1652_v14 = vpop.permute.xlu1 %1651 }
 0x343   :  { %v1650_v15 = vpop.permute.xlu0 %1649  ;;  %1668 = vst.msk [vmem:[#allocation5 + $0x1f] sm:$0x1] %vm1564_vm11, %v1652_v14 }
 0x344   :  { %1667 = vst.msk [vmem:[#allocation5 + $0x1b] sm:$0x1] %vm1564_vm11, %v1650_v15  ;;  %1930 = vrot.lane.b32.xlu1 %v3674_v43, %s2350_s30 }
 0x345   :  { %1928 = vrot.lane.b32.xlu0 %v3676_v42, %s2350_s30 }
 0x346   :  { %v1689_v16 = vpop.permute.xlu1 %1688 }
 0x347   :  { %v1687_v17 = vpop.permute.xlu0 %1686  ;;  %1712 = vst.msk [vmem:[#allocation5 + $0x4] sm:$0x1] %vm1710_vm12, %v1689_v16 }
 0x348   :  { %1711 = vst.msk [vmem:[#allocation5] sm:$0x1] %vm1710_vm12, %v1687_v17  ;;  %1934 = vrot.lane.b32.xlu1 %v3684_v46, %s2350_s30 }
 0x349   :  { %1932 = vrot.lane.b32.xlu0 %v3686_v47, %s2350_s30 }
 0x34a   :  { %v1693_v18 = vpop.permute.xlu1 %1692 }
 0x34b   :  { %v1691_v19 = vpop.permute.xlu0 %1690  ;;  %1714 = vst.msk [vmem:[#allocation5 + $0xc] sm:$0x1] %vm1710_vm12, %v1693_v18 }
 0x34c   :  { %1713 = vst.msk [vmem:[#allocation5 + $0x8] sm:$0x1] %vm1710_vm12, %v1691_v19  ;;  %1938 = vrot.lane.b32.xlu1 %v3694_v51, %s2350_s30 }
 0x34d   :  { %1936 = vrot.lane.b32.xlu0 %v3696_v56, %s2350_s30 }
 0x34e   :  { %v1697_v20 = vpop.permute.xlu1 %1696 }
 0x34f   :  { %v1695_v21 = vpop.permute.xlu0 %1694  ;;  %1716 = vst.msk [vmem:[#allocation5 + $0x14] sm:$0x1] %vm1710_vm12, %v1697_v20 }
 0x350   :  { %1715 = vst.msk [vmem:[#allocation5 + $0x10] sm:$0x1] %vm1710_vm12, %v1695_v21  ;;  %1942 = vrot.lane.b32.xlu1 %v3704_v58, %s2350_s30 }
 0x351   :  { %1940 = vrot.lane.b32.xlu0 %v3706_v59, %s2350_s30 }
 0x352   :  { %v1701_v24 = vpop.permute.xlu1 %1700 }
 0x353   :  { %v1699_v25 = vpop.permute.xlu0 %1698  ;;  %1718 = vst.msk [vmem:[#allocation5 + $0x1c] sm:$0x1] %vm1710_vm12, %v1701_v24 }
 0x354   :  { %1717 = vst.msk [vmem:[#allocation5 + $0x18] sm:$0x1] %vm1710_vm12, %v1699_v25  ;;  %1978 = vrot.lane.b32.xlu1 %v3786_v22, %s2354_s5 }
 0x355   :  { %1976 = vrot.lane.b32.xlu0 %v3788_v23, %s2354_s5 }
 0x356   :  { %v1722_v28 = vpop.permute.xlu1 %1721 }
 0x357   :  { %v1720_v29 = vpop.permute.xlu0 %1719  ;;  %1744 = vst.msk [vmem:[#allocation5 + $0x5] sm:$0x1] %vm1710_vm12, %v1722_v28 }
 0x358   :  { %1743 = vst.msk [vmem:[#allocation5 + $0x1] sm:$0x1] %vm1710_vm12, %v1720_v29  ;;  %1982 = vrot.lane.b32.xlu1 %v3796_v26, %s2354_s5 }
 0x359   :  { %1980 = vrot.lane.b32.xlu0 %v3798_v27, %s2354_s5 }
 0x35a   :  { %v1726_v32 = vpop.permute.xlu1 %1725 }
 0x35b   :  { %v1724_v33 = vpop.permute.xlu0 %1723  ;;  %1746 = vst.msk [vmem:[#allocation5 + $0xd] sm:$0x1] %vm1710_vm12, %v1726_v32 }
 0x35c   :  { %1745 = vst.msk [vmem:[#allocation5 + $0x9] sm:$0x1] %vm1710_vm12, %v1724_v33  ;;  %1986 = vrot.lane.b32.xlu1 %v3806_v30, %s2354_s5 }
 0x35d   :  { %1984 = vrot.lane.b32.xlu0 %v3808_v31, %s2354_s5 }
 0x35e   :  { %v1730_v36 = vpop.permute.xlu1 %1729 }
 0x35f   :  { %v1728_v37 = vpop.permute.xlu0 %1727  ;;  %1748 = vst.msk [vmem:[#allocation5 + $0x15] sm:$0x1] %vm1710_vm12, %v1730_v36 }
 0x360   :  { %1747 = vst.msk [vmem:[#allocation5 + $0x11] sm:$0x1] %vm1710_vm12, %v1728_v37  ;;  %1990 = vrot.lane.b32.xlu1 %v3816_v34, %s2354_s5 }
 0x361   :  { %1988 = vrot.lane.b32.xlu0 %v3818_v35, %s2354_s5 }
 0x362   :  { %v1734_v40 = vpop.permute.xlu1 %1733 }
 0x363   :  { %v1732_v41 = vpop.permute.xlu0 %1731  ;;  %1750 = vst.msk [vmem:[#allocation5 + $0x1d] sm:$0x1] %vm1710_vm12, %v1734_v40 }
 0x364   :  { %1749 = vst.msk [vmem:[#allocation5 + $0x19] sm:$0x1] %vm1710_vm12, %v1732_v41  ;;  %2011 = vrot.lane.b32.xlu1 %v3786_v22, %s2353_s4 }
 0x365   :  { %2009 = vrot.lane.b32.xlu0 %v3788_v23, %s2353_s4 }
 0x366   :  { %v1754_v44 = vpop.permute.xlu1 %1753 }
 0x367   :  { %v1752_v45 = vpop.permute.xlu0 %1751  ;;  %1776 = vst.msk [vmem:[#allocation5 + $0x6] sm:$0x1] %vm1710_vm12, %v1754_v44 }
 0x368   :  { %1775 = vst.msk [vmem:[#allocation5 + $0x2] sm:$0x1] %vm1710_vm12, %v1752_v45  ;;  %2015 = vrot.lane.b32.xlu1 %v3796_v26, %s2353_s4 }
 0x369   :  { %2013 = vrot.lane.b32.xlu0 %v3798_v27, %s2353_s4 }
 0x36a   :  { %v1758_v48 = vpop.permute.xlu1 %1757 }
 0x36b   :  { %v1756_v49 = vpop.permute.xlu0 %1755  ;;  %1778 = vst.msk [vmem:[#allocation5 + $0xe] sm:$0x1] %vm1710_vm12, %v1758_v48 }
 0x36c   :  { %1777 = vst.msk [vmem:[#allocation5 + $0xa] sm:$0x1] %vm1710_vm12, %v1756_v49  ;;  %2019 = vrot.lane.b32.xlu1 %v3806_v30, %s2353_s4 }
 0x36d   :  { %2017 = vrot.lane.b32.xlu0 %v3808_v31, %s2353_s4 }
 0x36e   :  { %v1762_v39 = vpop.permute.xlu1 %1761 }
 0x36f   :  { %v1760_v38 = vpop.permute.xlu0 %1759  ;;  %1780 = vst.msk [vmem:[#allocation5 + $0x16] sm:$0x1] %vm1710_vm12, %v1762_v39 }
 0x370   :  { %1779 = vst.msk [vmem:[#allocation5 + $0x12] sm:$0x1] %vm1710_vm12, %v1760_v38  ;;  %2023 = vrot.lane.b32.xlu1 %v3816_v34, %s2353_s4 }
 0x371   :  { %2021 = vrot.lane.b32.xlu0 %v3818_v35, %s2353_s4 }
 0x372   :  { %v1766_v43 = vpop.permute.xlu1 %1765 }
 0x373   :  { %v1764_v42 = vpop.permute.xlu0 %1763  ;;  %1782 = vst.msk [vmem:[#allocation5 + $0x1e] sm:$0x1] %vm1710_vm12, %v1766_v43 }
 0x374   :  { %1781 = vst.msk [vmem:[#allocation5 + $0x1a] sm:$0x1] %vm1710_vm12, %v1764_v42  ;;  %2043 = vrot.lane.b32.xlu1 %v3786_v22, %s2352_s3 }
 0x375   :  { %2041 = vrot.lane.b32.xlu0 %v3788_v23, %s2352_s3 }
 0x376   :  { %v1786_v52 = vpop.permute.xlu1 %1785 }
 0x377   :  { %v1784_v53 = vpop.permute.xlu0 %1783  ;;  %1808 = vst.msk [vmem:[#allocation5 + $0x7] sm:$0x1] %vm1710_vm12, %v1786_v52 }
 0x378   :  { %1807 = vst.msk [vmem:[#allocation5 + $0x3] sm:$0x1] %vm1710_vm12, %v1784_v53  ;;  %2047 = vrot.lane.b32.xlu1 %v3796_v26, %s2352_s3 }
 0x379   :  { %2045 = vrot.lane.b32.xlu0 %v3798_v27, %s2352_s3 }
 0x37a   :  { %v1790_v46 = vpop.permute.xlu1 %1789 }
 0x37b   :  { %v1788_v47 = vpop.permute.xlu0 %1787  ;;  %1810 = vst.msk [vmem:[#allocation5 + $0xf] sm:$0x1] %vm1710_vm12, %v1790_v46 }
 0x37c   :  { %1809 = vst.msk [vmem:[#allocation5 + $0xb] sm:$0x1] %vm1710_vm12, %v1788_v47  ;;  %2051 = vrot.lane.b32.xlu1 %v3806_v30, %s2352_s3 }
 0x37d   :  { %2049 = vrot.lane.b32.xlu0 %v3808_v31, %s2352_s3 }
 0x37e   :  { %v1794_v54 = vpop.permute.xlu1 %1793 }
 0x37f   :  { %v1792_v55 = vpop.permute.xlu0 %1791  ;;  %1812 = vst.msk [vmem:[#allocation5 + $0x17] sm:$0x1] %vm1710_vm12, %v1794_v54 }
 0x380   :  { %1811 = vst.msk [vmem:[#allocation5 + $0x13] sm:$0x1] %vm1710_vm12, %v1792_v55  ;;  %2055 = vrot.lane.b32.xlu1 %v3816_v34, %s2352_s3 }
 0x381   :  { %2053 = vrot.lane.b32.xlu0 %v3818_v35, %s2352_s3 }
 0x382   :  { %v1798_v51 = vpop.permute.xlu1 %1797 }
 0x383   :  { %v1796_v56 = vpop.permute.xlu0 %1795  ;;  %1814 = vst.msk [vmem:[#allocation5 + $0x1f] sm:$0x1] %vm1710_vm12, %v1798_v51 }
 0x384   :  { %1813 = vst.msk [vmem:[#allocation5 + $0x1b] sm:$0x1] %vm1710_vm12, %v1796_v56  ;;  %2075 = vrot.lane.b32.xlu1 %v3786_v22, %s2351_s2 }
 0x385   :  { %2073 = vrot.lane.b32.xlu0 %v3788_v23, %s2351_s2 }
 0x386   :  { %v1834_v50 = vpop.permute.xlu1 %1833 }
 0x387   :  { %v1832_v57 = vpop.permute.xlu0 %1831  ;;  %1857 = vst.msk [vmem:[#allocation5 + $0x4] sm:$0x1] %vm1855_vm13, %v1834_v50 }
 0x388   :  { %1856 = vst.msk [vmem:[#allocation5] sm:$0x1] %vm1855_vm13, %v1832_v57  ;;  %2079 = vrot.lane.b32.xlu1 %v3796_v26, %s2351_s2 }
 0x389   :  { %2077 = vrot.lane.b32.xlu0 %v3798_v27, %s2351_s2 }
 0x38a   :  { %v1838_v58 = vpop.permute.xlu1 %1837 }
 0x38b   :  { %v1836_v59 = vpop.permute.xlu0 %1835  ;;  %1859 = vst.msk [vmem:[#allocation5 + $0xc] sm:$0x1] %vm1855_vm13, %v1838_v58 }
 0x38c   :  { %1858 = vst.msk [vmem:[#allocation5 + $0x8] sm:$0x1] %vm1855_vm13, %v1836_v59  ;;  %2083 = vrot.lane.b32.xlu1 %v3806_v30, %s2351_s2 }
 0x38d   :  { %2081 = vrot.lane.b32.xlu0 %v3808_v31, %s2351_s2 }
 0x38e   :  { %v1842_v60 = vpop.permute.xlu1 %1841 }
 0x38f   :  { %v1840_v61 = vpop.permute.xlu0 %1839  ;;  %1861 = vst.msk [vmem:[#allocation5 + $0x14] sm:$0x1] %vm1855_vm13, %v1842_v60 }
 0x390   :  { %1860 = vst.msk [vmem:[#allocation5 + $0x10] sm:$0x1] %vm1855_vm13, %v1840_v61  ;;  %2087 = vrot.lane.b32.xlu1 %v3816_v34, %s2351_s2 }
 0x391   :  { %2085 = vrot.lane.b32.xlu0 %v3818_v35, %s2351_s2 }
 0x392   :  { %v1846_v0 = vpop.permute.xlu1 %1845 }
 0x393   :  { %v1844_v1 = vpop.permute.xlu0 %1843  ;;  %1863 = vst.msk [vmem:[#allocation5 + $0x1c] sm:$0x1] %vm1855_vm13, %v1846_v0 }
 0x394   :  { %1862 = vst.msk [vmem:[#allocation5 + $0x18] sm:$0x1] %vm1855_vm13, %v1844_v1  ;;  %2123 = vrot.lane.b32.xlu1 %v3898_v62, %s2355_s6 }
 0x395   :  { %2121 = vrot.lane.b32.xlu0 %v3900_v63, %s2355_s6 }
 0x396   :  { %v1867_v4 = vpop.permute.xlu1 %1866 }
 0x397   :  { %v1865_v5 = vpop.permute.xlu0 %1864  ;;  %1889 = vst.msk [vmem:[#allocation5 + $0x5] sm:$0x1] %vm1855_vm13, %v1867_v4 }
 0x398   :  { %1888 = vst.msk [vmem:[#allocation5 + $0x1] sm:$0x1] %vm1855_vm13, %v1865_v5  ;;  %2127 = vrot.lane.b32.xlu1 %v3906_v2, %s2355_s6 }
 0x399   :  { %2125 = vrot.lane.b32.xlu0 %v3908_v3, %s2355_s6 }
 0x39a   :  { %v1871_v8 = vpop.permute.xlu1 %1870 }
 0x39b   :  { %v1869_v9 = vpop.permute.xlu0 %1868  ;;  %1891 = vst.msk [vmem:[#allocation5 + $0xd] sm:$0x1] %vm1855_vm13, %v1871_v8 }
 0x39c   :  { %1890 = vst.msk [vmem:[#allocation5 + $0x9] sm:$0x1] %vm1855_vm13, %v1869_v9  ;;  %2131 = vrot.lane.b32.xlu1 %v3914_v6, %s2355_s6 }
 0x39d   :  { %2129 = vrot.lane.b32.xlu0 %v3916_v7, %s2355_s6 }
 0x39e   :  { %v1875_v12 = vpop.permute.xlu1 %1874 }
 0x39f   :  { %v1873_v13 = vpop.permute.xlu0 %1872  ;;  %1893 = vst.msk [vmem:[#allocation5 + $0x15] sm:$0x1] %vm1855_vm13, %v1875_v12 }
 0x3a0   :  { %1892 = vst.msk [vmem:[#allocation5 + $0x11] sm:$0x1] %vm1855_vm13, %v1873_v13  ;;  %2135 = vrot.lane.b32.xlu1 %v3922_v10, %s2355_s6 }
 0x3a1   :  { %2133 = vrot.lane.b32.xlu0 %v3924_v11, %s2355_s6 }
 0x3a2   :  { %v1879_v14 = vpop.permute.xlu1 %1878 }
 0x3a3   :  { %v1877_v15 = vpop.permute.xlu0 %1876  ;;  %1895 = vst.msk [vmem:[#allocation5 + $0x1d] sm:$0x1] %vm1855_vm13, %v1879_v14 }
 0x3a4   :  { %1894 = vst.msk [vmem:[#allocation5 + $0x19] sm:$0x1] %vm1855_vm13, %v1877_v15  ;;  %2156 = vrot.lane.b32.xlu1 %v3898_v62, %s2354_s5 }
 0x3a5   :  { %2154 = vrot.lane.b32.xlu0 %v3900_v63, %s2354_s5 }
 0x3a6   :  { %v1899_v16 = vpop.permute.xlu1 %1898 }
 0x3a7   :  { %v1897_v17 = vpop.permute.xlu0 %1896  ;;  %1921 = vst.msk [vmem:[#allocation5 + $0x6] sm:$0x1] %vm1855_vm13, %v1899_v16 }
 0x3a8   :  { %1920 = vst.msk [vmem:[#allocation5 + $0x2] sm:$0x1] %vm1855_vm13, %v1897_v17  ;;  %2160 = vrot.lane.b32.xlu1 %v3906_v2, %s2354_s5 }
 0x3a9   :  { %2158 = vrot.lane.b32.xlu0 %v3908_v3, %s2354_s5 }
 0x3aa   :  { %v1903_v18 = vpop.permute.xlu1 %1902 }
 0x3ab   :  { %v1901_v19 = vpop.permute.xlu0 %1900  ;;  %1923 = vst.msk [vmem:[#allocation5 + $0xe] sm:$0x1] %vm1855_vm13, %v1903_v18 }
 0x3ac   :  { %1922 = vst.msk [vmem:[#allocation5 + $0xa] sm:$0x1] %vm1855_vm13, %v1901_v19  ;;  %2164 = vrot.lane.b32.xlu1 %v3914_v6, %s2354_s5 }
 0x3ad   :  { %2162 = vrot.lane.b32.xlu0 %v3916_v7, %s2354_s5 }
 0x3ae   :  { %v1907_v20 = vpop.permute.xlu1 %1906 }
 0x3af   :  { %v1905_v21 = vpop.permute.xlu0 %1904  ;;  %1925 = vst.msk [vmem:[#allocation5 + $0x16] sm:$0x1] %vm1855_vm13, %v1907_v20 }
 0x3b0   :  { %1924 = vst.msk [vmem:[#allocation5 + $0x12] sm:$0x1] %vm1855_vm13, %v1905_v21  ;;  %2168 = vrot.lane.b32.xlu1 %v3922_v10, %s2354_s5 }
 0x3b1   :  { %2166 = vrot.lane.b32.xlu0 %v3924_v11, %s2354_s5 }
 0x3b2   :  { %v1911_v22 = vpop.permute.xlu1 %1910 }
 0x3b3   :  { %v1909_v23 = vpop.permute.xlu0 %1908  ;;  %1927 = vst.msk [vmem:[#allocation5 + $0x1e] sm:$0x1] %vm1855_vm13, %v1911_v22 }
 0x3b4   :  { %1926 = vst.msk [vmem:[#allocation5 + $0x1a] sm:$0x1] %vm1855_vm13, %v1909_v23  ;;  %2188 = vrot.lane.b32.xlu1 %v3898_v62, %s2353_s4 }
 0x3b5   :  { %2186 = vrot.lane.b32.xlu0 %v3900_v63, %s2353_s4 }
 0x3b6   :  { %v1931_v24 = vpop.permute.xlu1 %1930 }
 0x3b7   :  { %v1929_v25 = vpop.permute.xlu0 %1928  ;;  %1953 = vst.msk [vmem:[#allocation5 + $0x7] sm:$0x1] %vm1855_vm13, %v1931_v24 }
 0x3b8   :  { %1952 = vst.msk [vmem:[#allocation5 + $0x3] sm:$0x1] %vm1855_vm13, %v1929_v25  ;;  %2192 = vrot.lane.b32.xlu1 %v3906_v2, %s2353_s4 }
 0x3b9   :  { %2190 = vrot.lane.b32.xlu0 %v3908_v3, %s2353_s4 }
 0x3ba   :  { %v1935_v26 = vpop.permute.xlu1 %1934 }
 0x3bb   :  { %v1933_v27 = vpop.permute.xlu0 %1932  ;;  %1955 = vst.msk [vmem:[#allocation5 + $0xf] sm:$0x1] %vm1855_vm13, %v1935_v26 }
 0x3bc   :  { %1954 = vst.msk [vmem:[#allocation5 + $0xb] sm:$0x1] %vm1855_vm13, %v1933_v27  ;;  %2196 = vrot.lane.b32.xlu1 %v3914_v6, %s2353_s4 }
 0x3bd   :  { %2194 = vrot.lane.b32.xlu0 %v3916_v7, %s2353_s4 }
 0x3be   :  { %v1939_v28 = vpop.permute.xlu1 %1938 }
 0x3bf   :  { %v1937_v29 = vpop.permute.xlu0 %1936  ;;  %1957 = vst.msk [vmem:[#allocation5 + $0x17] sm:$0x1] %vm1855_vm13, %v1939_v28 }
 0x3c0   :  { %1956 = vst.msk [vmem:[#allocation5 + $0x13] sm:$0x1] %vm1855_vm13, %v1937_v29  ;;  %2200 = vrot.lane.b32.xlu1 %v3922_v10, %s2353_s4 }
 0x3c1   :  { %2198 = vrot.lane.b32.xlu0 %v3924_v11, %s2353_s4 }
 0x3c2   :  { %v1943_v30 = vpop.permute.xlu1 %1942 }
 0x3c3   :  { %v1941_v31 = vpop.permute.xlu0 %1940  ;;  %1959 = vst.msk [vmem:[#allocation5 + $0x1f] sm:$0x1] %vm1855_vm13, %v1943_v30 }
 0x3c4   :  { %1958 = vst.msk [vmem:[#allocation5 + $0x1b] sm:$0x1] %vm1855_vm13, %v1941_v31  ;;  %2220 = vrot.lane.b32.xlu1 %v3898_v62, %s2352_s3 }
 0x3c5   :  { %2218 = vrot.lane.b32.xlu0 %v3900_v63, %s2352_s3 }
 0x3c6   :  { %v1979_v32 = vpop.permute.xlu1 %1978 }
 0x3c7   :  { %v1977_v33 = vpop.permute.xlu0 %1976  ;;  %2002 = vst.msk [vmem:[#allocation5 + $0x4] sm:$0x1] %vm2000_vm14, %v1979_v32 }
 0x3c8   :  { %2001 = vst.msk [vmem:[#allocation5] sm:$0x1] %vm2000_vm14, %v1977_v33  ;;  %2224 = vrot.lane.b32.xlu1 %v3906_v2, %s2352_s3 }
 0x3c9   :  { %2222 = vrot.lane.b32.xlu0 %v3908_v3, %s2352_s3 }
 0x3ca   :  { %v1983_v34 = vpop.permute.xlu1 %1982 }
 0x3cb   :  { %v1981_v35 = vpop.permute.xlu0 %1980  ;;  %2004 = vst.msk [vmem:[#allocation5 + $0xc] sm:$0x1] %vm2000_vm14, %v1983_v34 }
 0x3cc   :  { %2003 = vst.msk [vmem:[#allocation5 + $0x8] sm:$0x1] %vm2000_vm14, %v1981_v35  ;;  %2228 = vrot.lane.b32.xlu1 %v3914_v6, %s2352_s3 }
 0x3cd   :  { %2226 = vrot.lane.b32.xlu0 %v3916_v7, %s2352_s3 }
 0x3ce   :  { %v1987_v36 = vpop.permute.xlu1 %1986 }
 0x3cf   :  { %v1985_v37 = vpop.permute.xlu0 %1984  ;;  %2006 = vst.msk [vmem:[#allocation5 + $0x14] sm:$0x1] %vm2000_vm14, %v1987_v36 }
 0x3d0   :  { %2005 = vst.msk [vmem:[#allocation5 + $0x10] sm:$0x1] %vm2000_vm14, %v1985_v37  ;;  %2232 = vrot.lane.b32.xlu1 %v3922_v10, %s2352_s3 }
 0x3d1   :  { %2230 = vrot.lane.b32.xlu0 %v3924_v11, %s2352_s3 }
 0x3d2   :  { %v1991_v40 = vpop.permute.xlu1 %1990 }
 0x3d3   :  { %v1989_v41 = vpop.permute.xlu0 %1988  ;;  %2008 = vst.msk [vmem:[#allocation5 + $0x1c] sm:$0x1] %vm2000_vm14, %v1991_v40 }
 0x3d4   :  { %2007 = vst.msk [vmem:[#allocation5 + $0x18] sm:$0x1] %vm2000_vm14, %v1989_v41 }
 0x3d6   :  { %v2012_v44 = vpop.permute.xlu1 %2011 }
 0x3d7   :  { %v2010_v45 = vpop.permute.xlu0 %2009  ;;  %2034 = vst.msk [vmem:[#allocation5 + $0x5] sm:$0x1] %vm2000_vm14, %v2012_v44 }
 0x3d8   :  { %2033 = vst.msk [vmem:[#allocation5 + $0x1] sm:$0x1] %vm2000_vm14, %v2010_v45 }
 0x3da   :  { %v2016_v48 = vpop.permute.xlu1 %2015 }
 0x3db   :  { %v2014_v49 = vpop.permute.xlu0 %2013  ;;  %2036 = vst.msk [vmem:[#allocation5 + $0xd] sm:$0x1] %vm2000_vm14, %v2016_v48 }
 0x3dc   :  { %2035 = vst.msk [vmem:[#allocation5 + $0x9] sm:$0x1] %vm2000_vm14, %v2014_v49 }
 0x3de   :  { %v2020_v39 = vpop.permute.xlu1 %2019 }
 0x3df   :  { %v2018_v38 = vpop.permute.xlu0 %2017  ;;  %2038 = vst.msk [vmem:[#allocation5 + $0x15] sm:$0x1] %vm2000_vm14, %v2020_v39 }
 0x3e0   :  { %2037 = vst.msk [vmem:[#allocation5 + $0x11] sm:$0x1] %vm2000_vm14, %v2018_v38 }
 0x3e2   :  { %v2024_v43 = vpop.permute.xlu1 %2023 }
 0x3e3   :  { %v2022_v42 = vpop.permute.xlu0 %2021  ;;  %2040 = vst.msk [vmem:[#allocation5 + $0x1d] sm:$0x1] %vm2000_vm14, %v2024_v43 }
 0x3e4   :  { %2039 = vst.msk [vmem:[#allocation5 + $0x19] sm:$0x1] %vm2000_vm14, %v2022_v42 }
 0x3e6   :  { %v2044_v52 = vpop.permute.xlu1 %2043 }
 0x3e7   :  { %v2042_v53 = vpop.permute.xlu0 %2041  ;;  %2066 = vst.msk [vmem:[#allocation5 + $0x6] sm:$0x1] %vm2000_vm14, %v2044_v52 }
 0x3e8   :  { %2065 = vst.msk [vmem:[#allocation5 + $0x2] sm:$0x1] %vm2000_vm14, %v2042_v53 }
 0x3ea   :  { %v2048_v46 = vpop.permute.xlu1 %2047 }
 0x3eb   :  { %v2046_v47 = vpop.permute.xlu0 %2045  ;;  %2068 = vst.msk [vmem:[#allocation5 + $0xe] sm:$0x1] %vm2000_vm14, %v2048_v46 }
 0x3ec   :  { %2067 = vst.msk [vmem:[#allocation5 + $0xa] sm:$0x1] %vm2000_vm14, %v2046_v47 }
 0x3ee   :  { %v2052_v54 = vpop.permute.xlu1 %2051 }
 0x3ef   :  { %v2050_v55 = vpop.permute.xlu0 %2049  ;;  %2070 = vst.msk [vmem:[#allocation5 + $0x16] sm:$0x1] %vm2000_vm14, %v2052_v54 }
 0x3f0   :  { %2069 = vst.msk [vmem:[#allocation5 + $0x12] sm:$0x1] %vm2000_vm14, %v2050_v55 }
 0x3f2   :  { %v2056_v51 = vpop.permute.xlu1 %2055 }
 0x3f3   :  { %v2054_v56 = vpop.permute.xlu0 %2053  ;;  %2072 = vst.msk [vmem:[#allocation5 + $0x1e] sm:$0x1] %vm2000_vm14, %v2056_v51 }
 0x3f4   :  { %2071 = vst.msk [vmem:[#allocation5 + $0x1a] sm:$0x1] %vm2000_vm14, %v2054_v56 }
 0x3f6   :  { %v2076_v50 = vpop.permute.xlu1 %2075 }
 0x3f7   :  { %v2074_v57 = vpop.permute.xlu0 %2073  ;;  %2098 = vst.msk [vmem:[#allocation5 + $0x7] sm:$0x1] %vm2000_vm14, %v2076_v50 }
 0x3f8   :  { %2097 = vst.msk [vmem:[#allocation5 + $0x3] sm:$0x1] %vm2000_vm14, %v2074_v57 }
 0x3fa   :  { %v2080_v58 = vpop.permute.xlu1 %2079 }
 0x3fb   :  { %v2078_v59 = vpop.permute.xlu0 %2077  ;;  %2100 = vst.msk [vmem:[#allocation5 + $0xf] sm:$0x1] %vm2000_vm14, %v2080_v58 }
 0x3fc   :  { %2099 = vst.msk [vmem:[#allocation5 + $0xb] sm:$0x1] %vm2000_vm14, %v2078_v59 }
 0x3fe   :  { %v2084_v60 = vpop.permute.xlu1 %2083 }
 0x3ff   :  { %v2082_v61 = vpop.permute.xlu0 %2081  ;;  %2102 = vst.msk [vmem:[#allocation5 + $0x17] sm:$0x1] %vm2000_vm14, %v2084_v60 }
 0x400   :  { %2101 = vst.msk [vmem:[#allocation5 + $0x13] sm:$0x1] %vm2000_vm14, %v2082_v61 }
 0x402   :  { %v2088_v62 = vpop.permute.xlu1 %2087 }
 0x403   :  { %v2086_v63 = vpop.permute.xlu0 %2085  ;;  %2104 = vst.msk [vmem:[#allocation5 + $0x1f] sm:$0x1] %vm2000_vm14, %v2088_v62 }
 0x404   :  { %2103 = vst.msk [vmem:[#allocation5 + $0x1b] sm:$0x1] %vm2000_vm14, %v2086_v63 }
 0x406   :  { %v2124_v0 = vpop.permute.xlu1 %2123 }
 0x407   :  { %v2122_v1 = vpop.permute.xlu0 %2121  ;;  %2147 = vst.msk [vmem:[#allocation5 + $0x4] sm:$0x1] %vm2145_vm15, %v2124_v0 }
 0x408   :  { %2146 = vst.msk [vmem:[#allocation5] sm:$0x1] %vm2145_vm15, %v2122_v1 }
 0x40a   :  { %v2128_v2 = vpop.permute.xlu1 %2127 }
 0x40b   :  { %v2126_v3 = vpop.permute.xlu0 %2125  ;;  %2149 = vst.msk [vmem:[#allocation5 + $0xc] sm:$0x1] %vm2145_vm15, %v2128_v2 }
 0x40c   :  { %2148 = vst.msk [vmem:[#allocation5 + $0x8] sm:$0x1] %vm2145_vm15, %v2126_v3 }
 0x40e   :  { %v2132_v4 = vpop.permute.xlu1 %2131 }
 0x40f   :  { %v2130_v5 = vpop.permute.xlu0 %2129  ;;  %2151 = vst.msk [vmem:[#allocation5 + $0x14] sm:$0x1] %vm2145_vm15, %v2132_v4 }
 0x410   :  { %2150 = vst.msk [vmem:[#allocation5 + $0x10] sm:$0x1] %vm2145_vm15, %v2130_v5 }
 0x412   :  { %v2136_v6 = vpop.permute.xlu1 %2135 }
 0x413   :  { %v2134_v7 = vpop.permute.xlu0 %2133  ;;  %2153 = vst.msk [vmem:[#allocation5 + $0x1c] sm:$0x1] %vm2145_vm15, %v2136_v6 }
 0x414   :  { %2152 = vst.msk [vmem:[#allocation5 + $0x18] sm:$0x1] %vm2145_vm15, %v2134_v7 }
 0x416   :  { %v2157_v8 = vpop.permute.xlu1 %2156 }
 0x417   :  { %v2155_v9 = vpop.permute.xlu0 %2154  ;;  %2179 = vst.msk [vmem:[#allocation5 + $0x5] sm:$0x1] %vm2145_vm15, %v2157_v8 }
 0x418   :  { %2178 = vst.msk [vmem:[#allocation5 + $0x1] sm:$0x1] %vm2145_vm15, %v2155_v9 }
 0x41a   :  { %v2161_v10 = vpop.permute.xlu1 %2160 }
 0x41b   :  { %v2159_v11 = vpop.permute.xlu0 %2158  ;;  %2181 = vst.msk [vmem:[#allocation5 + $0xd] sm:$0x1] %vm2145_vm15, %v2161_v10 }
 0x41c   :  { %2180 = vst.msk [vmem:[#allocation5 + $0x9] sm:$0x1] %vm2145_vm15, %v2159_v11 }
 0x41e   :  { %v2165_v12 = vpop.permute.xlu1 %2164 }
 0x41f   :  { %v2163_v13 = vpop.permute.xlu0 %2162  ;;  %2183 = vst.msk [vmem:[#allocation5 + $0x15] sm:$0x1] %vm2145_vm15, %v2165_v12 }
 0x420   :  { %2182 = vst.msk [vmem:[#allocation5 + $0x11] sm:$0x1] %vm2145_vm15, %v2163_v13 }
 0x422   :  { %v2169_v14 = vpop.permute.xlu1 %2168 }
 0x423   :  { %v2167_v15 = vpop.permute.xlu0 %2166  ;;  %2185 = vst.msk [vmem:[#allocation5 + $0x1d] sm:$0x1] %vm2145_vm15, %v2169_v14 }
 0x424   :  { %2184 = vst.msk [vmem:[#allocation5 + $0x19] sm:$0x1] %vm2145_vm15, %v2167_v15 }
 0x426   :  { %v2189_v16 = vpop.permute.xlu1 %2188 }
 0x427   :  { %v2187_v17 = vpop.permute.xlu0 %2186  ;;  %2211 = vst.msk [vmem:[#allocation5 + $0x6] sm:$0x1] %vm2145_vm15, %v2189_v16 }
 0x428   :  { %2210 = vst.msk [vmem:[#allocation5 + $0x2] sm:$0x1] %vm2145_vm15, %v2187_v17 }
 0x42a   :  { %v2193_v18 = vpop.permute.xlu1 %2192 }
 0x42b   :  { %v2191_v19 = vpop.permute.xlu0 %2190  ;;  %2213 = vst.msk [vmem:[#allocation5 + $0xe] sm:$0x1] %vm2145_vm15, %v2193_v18 }
 0x42c   :  { %2212 = vst.msk [vmem:[#allocation5 + $0xa] sm:$0x1] %vm2145_vm15, %v2191_v19 }
 0x42e   :  { %v2197_v20 = vpop.permute.xlu1 %2196 }
 0x42f   :  { %v2195_v21 = vpop.permute.xlu0 %2194  ;;  %2215 = vst.msk [vmem:[#allocation5 + $0x16] sm:$0x1] %vm2145_vm15, %v2197_v20 }
 0x430   :  { %2214 = vst.msk [vmem:[#allocation5 + $0x12] sm:$0x1] %vm2145_vm15, %v2195_v21 }
 0x432   :  { %v2201_v22 = vpop.permute.xlu1 %2200 }
 0x433   :  { %v2199_v23 = vpop.permute.xlu0 %2198  ;;  %2217 = vst.msk [vmem:[#allocation5 + $0x1e] sm:$0x1] %vm2145_vm15, %v2201_v22 }
 0x434   :  { %2216 = vst.msk [vmem:[#allocation5 + $0x1a] sm:$0x1] %vm2145_vm15, %v2199_v23 }
 0x436   :  { %v2221_v24 = vpop.permute.xlu1 %2220 }
 0x437   :  { %v2219_v25 = vpop.permute.xlu0 %2218  ;;  %2243 = vst.msk [vmem:[#allocation5 + $0x7] sm:$0x1] %vm2145_vm15, %v2221_v24 }
 0x438   :  { %2242 = vst.msk [vmem:[#allocation5 + $0x3] sm:$0x1] %vm2145_vm15, %v2219_v25 }
 0x43a   :  { %v2225_v26 = vpop.permute.xlu1 %2224 }
 0x43b   :  { %v2223_v27 = vpop.permute.xlu0 %2222  ;;  %2245 = vst.msk [vmem:[#allocation5 + $0xf] sm:$0x1] %vm2145_vm15, %v2225_v26 }
 0x43c   :  { %2244 = vst.msk [vmem:[#allocation5 + $0xb] sm:$0x1] %vm2145_vm15, %v2223_v27 }
 0x43e   :  { %v2229_v28 = vpop.permute.xlu1 %2228 }
 0x43f   :  { %v2227_v29 = vpop.permute.xlu0 %2226  ;;  %2247 = vst.msk [vmem:[#allocation5 + $0x17] sm:$0x1] %vm2145_vm15, %v2229_v28 }
 0x440   :  { %2246 = vst.msk [vmem:[#allocation5 + $0x13] sm:$0x1] %vm2145_vm15, %v2227_v29 }
 0x442   :  { %v2233_v30 = vpop.permute.xlu1 %2232 }
 0x443   :  { %v2231_v31 = vpop.permute.xlu0 %2230  ;;  %2249 = vst.msk [vmem:[#allocation5 + $0x1f] sm:$0x1] %vm2145_vm15, %v2233_v30 }
 0x444   :  { %2248 = vst.msk [vmem:[#allocation5 + $0x1b] sm:$0x1] %vm2145_vm15, %v2231_v31 }
 0x445   :  { %2321 = shalt.err (!%p2318_p12)
}
 0x446   :  { %s2322_s12 = scalar_lea.hbm %s4076_s1, 512 }
 0x447   :  { %p2323_p13 = scmp.ne.s32.totalorder %s4076_s1, %s2322_s12  ;;  %p2326_p0 = scmp.lt.u32.totalorder %s2322_s12, %s4076_s1 }
 0x449   :  { %p2328_p1 = pnand %p2326_p0, %p2323_p13 }
 0x44b   :  { %2331 = shalt.err (!%p2328_p1)
}
 0x44c   :  { %2261 = dma.vmem_to_hbm [thread:$0]  %s2256_s8, 512, %s4076_s1, [#allocation4], %s2337_s16, %s2337_s16, %s2338_s17  }
 0x44d   :  { %2334 = dma.done.wait [#allocation4], 512  }
 0x44e   :  { %2335 = vsyncadd [#allocation4], 4294966784 }
 0x44f   :  { %2265 = vsyncpa [#allocation3], 1 }
 0x450   :  { %2266 = vsyncpa [#allocation4], 1 }

</bundles_post_ra>
